<compile_context>
chip_gen: v7x
topology: tpu7x:2x2x1
jax: 0.10.0
libtpu: 0.0.40
codegen_flags: <defaults>
</compile_context>

<pallas_src>
import functools

import jax
import jax.numpy as jnp
from jax.experimental import pallas as pl
from jax.experimental.pallas import tpu as pltpu

_BN_EPS = 1e-5


def _silu(x):
    return x * jax.nn.sigmoid(x)


def _vmem_limit_bytes():
    # Generation-gated scoped-VMEM limit: v5e/v6e have 128 MiB physical VMEM,
    # v7x only 64 MiB per TensorCore -> cap at 3/4 of capacity, <= 96 MiB.
    try:
        cap = pltpu.get_tpu_info().vmem_capacity_bytes
    except Exception:
        cap = 64 * 1024 * 1024
    return int(min(cap * 3 // 4, 96 * 1024 * 1024))


def _pick_tile_h(H, W, C1, c_, c2, out_bytes, budget_bytes):
    """Largest divisor of H whose per-tile working set fits the VMEM budget."""
    per_row = W * (
        2 * 2 * C1             # x tile, bf16, double-buffered by the pipeline
        + 4 * 2 * c_           # y12 (f32)
        + 4 * c_ + 2 * c_      # t (f32) + bf16 window copy
        + 2 * 3 * 3 * c_       # W-shifted copies / a_win (bf16)
        + 4 * 2 * c_           # 3x3 accumulator + m (f32)
        + 2 * out_bytes * c2)  # output tile, double-buffered
    max_rows = max(1, budget_bytes // max(per_row, 1))
    # TODO(synk): prime H falls back to tile_h=1 (correct but slow); handle
    # ragged row tiles inside the kernel if that case ever matters.
    best = 1
    for t in range(1, H + 1):
        if H % t == 0 and t <= max_rows:
            best = t
    return best


# ------------------------------------------------------------------
# The single fused C3 kernel
# ------------------------------------------------------------------
def _c3_fused_kernel(xc_ref, xt_ref, xb_ref, w12_ref, b12_ref, w1_ref, b1_ref,
                     wg_ref, b2_ref, wa_ref, wb_ref, b3_ref, o_ref):
    # xc_ref : (1, tile_h, W, C1) bf16      xt_ref/xb_ref: (1, 1, W, C1) bf16
    # w12    : (C1, 2c_) bf16   b12: (1, 2c_) f32       (cv1 | cv2 fused)
    # w1/b1  : (c_, c_) bf16 / (1, c_) f32               (m.cv1)
    # wg     : (3, 3c_, c_) bf16  [kh, kw*c_in+cin, cout]  b2: (1, c_) f32
    # wa/wb  : (c_, c2) bf16   b3: (1, c2) f32            (cv3 split)
    # o_ref  : (1, tile_h, W, c2)
    _, tile_h, W, C1 = xc_ref.shape
    c_ = w1_ref.shape[0]
    i = pl.program_id(1)
    n_i = pl.num_programs(1)

    # ---- cv1 + cv2 (one fused 1x1 matmul) + SiLU on the tile rows ----
    xc = xc_ref[0].reshape(tile_h * W, C1)
    y12 = _silu(jnp.dot(xc, w12_ref[...], preferred_element_type=jnp.float32)
                + b12_ref[...])
    y1 = y12[:, :c_]                               # f32, kept for the shortcut
    y2 = y12[:, c_:].astype(jnp.bfloat16)          # only needed by cv3

    # ---- cv1 recomputed on the +-1 halo rows (cheap; y1 never hits HBM) ----
    xh = jnp.concatenate([xt_ref[0], xb_ref[0]], axis=0).reshape(2 * W, C1)
    y1h = _silu(jnp.dot(xh, w12_ref[...], preferred_element_type=jnp.float32)
                + b12_ref[...])[:, :c_]

    # ---- bottleneck m.cv1 (1x1 + SiLU) on tile + halo rows ----
    t_cur = _silu(jnp.dot(y1.astype(jnp.bfloat16), w1_ref[...],
                          preferred_element_type=jnp.float32) + b1_ref[...])
    t_hal = _silu(jnp.dot(y1h.astype(jnp.bfloat16), w1_ref[...],
                          preferred_element_type=jnp.float32) + b1_ref[...])
    t_hal = t_hal.reshape(2, W, c_)
    # Halo rows that fall outside the image are the 3x3 conv's zero padding of
    # t: mask with a scalar multiply on one row (no full-tile iota/select).
    top_keep = (i > 0).astype(jnp.float32)
    bot_keep = (i < n_i - 1).astype(jnp.float32)
    t_top = (t_hal[0:1] * top_keep).astype(jnp.bfloat16)           # (1, W, c_)
    t_bot = (t_hal[1:2] * bot_keep).astype(jnp.bfloat16)           # (1, W, c_)
    t_win = jnp.concatenate(
        [t_top, t_cur.astype(jnp.bfloat16).reshape(tile_h, W, c_), t_bot],
        axis=0)                                                    # (tile_h+2, W, c_)

    # ---- 3x3 m.cv2 as 3 matmuls of K=3c_ (dw taps stacked on channels) ----
    zcol = jnp.zeros((tile_h + 2, 1, c_), jnp.bfloat16)
    s_l = jnp.concatenate([zcol, t_win[:, :W - 1, :]], axis=1)     # dw = 0 tap
    s_r = jnp.concatenate([t_win[:, 1:, :], zcol], axis=1)         # dw = 2 tap
    a_win = jnp.concatenate([s_l, t_win, s_r], axis=-1)            # (tile_h+2, W, 3c_)

    acc = jnp.dot(a_win[0:tile_h].reshape(tile_h * W, 3 * c_), wg_ref[0],
                  preferred_element_type=jnp.float32)
    acc = acc + jnp.dot(a_win[1:tile_h + 1].reshape(tile_h * W, 3 * c_),
                        wg_ref[1], preferred_element_type=jnp.float32)
    acc = acc + jnp.dot(a_win[2:tile_h + 2].reshape(tile_h * W, 3 * c_),
                        wg_ref[2], preferred_element_type=jnp.float32)
    m = y1 + _silu(acc + b2_ref[...])                              # shortcut (f32)

    # ---- cv3 (concat-free 1x1) + SiLU ----
    out = jnp.dot(m.astype(jnp.bfloat16), wa_ref[...],
                  preferred_element_type=jnp.float32)
    out = out + jnp.dot(y2, wb_ref[...], preferred_element_type=jnp.float32)
    out = _silu(out + b3_ref[...])
    o_ref[...] = out.reshape(1, tile_h, W, -1).astype(o_ref.dtype)


# ------------------------------------------------------------------
# Wrappers
# ------------------------------------------------------------------
def c3_forward_nhwc(x_nhwc, params, tile_h=None, out_dtype=jnp.bfloat16):
    N, H, W, C1 = x_nhwc.shape
    c_ = params["m_cv1_w"].shape[0]
    c2 = params["cv3_b"].shape[0]
    out_bytes = jnp.dtype(out_dtype).itemsize
    vmem_limit = _vmem_limit_bytes()
    if tile_h is None:
        tile_h = _pick_tile_h(H, W, C1, c_, c2, out_bytes, vmem_limit // 6)
    assert H % tile_h == 0, (H, tile_h)
    n_i = H // tile_h

    x = x_nhwc.astype(jnp.bfloat16)          # halve input DMA bytes
    M = N * H * W
    cost = pl.CostEstimate(
        flops=2 * M * (C1 * 2 * c_ + 10 * c_ * c_ + 2 * c_ * c2),
        transcendentals=M * (4 * c_ + c2),
        bytes_accessed=(M + 2 * N * n_i * W) * C1 * 2 + M * c2 * out_bytes)

    halo_top = lambda n, i, th=tile_h: (n, jnp.maximum(i * th - 1, 0), 0, 0)
    halo_bot = lambda n, i, th=tile_h, hh=H: (n, jnp.minimum((i + 1) * th, hh - 1), 0, 0)

    return pl.pallas_call(
        _c3_fused_kernel,
        out_shape=jax.ShapeDtypeStruct((N, H, W, c2), out_dtype),
        grid_spec=pltpu.PrefetchScalarGridSpec(
            num_scalar_prefetch=0,
            grid=(N, n_i),
            in_specs=[
                pl.BlockSpec((1, tile_h, W, C1), lambda n, i: (n, i, 0, 0)),
                pl.BlockSpec((1, 1, W, C1), halo_top),    # row above the tile
                pl.BlockSpec((1, 1, W, C1), halo_bot),    # row below the tile
                pl.BlockSpec((C1, 2 * c_), lambda n, i: (0, 0)),
                pl.BlockSpec((1, 2 * c_), lambda n, i: (0, 0)),
                pl.BlockSpec((c_, c_), lambda n, i: (0, 0)),
                pl.BlockSpec((1, c_), lambda n, i: (0, 0)),
                pl.BlockSpec((3, 3 * c_, c_), lambda n, i: (0, 0, 0)),
                pl.BlockSpec((1, c_), lambda n, i: (0, 0)),
                pl.BlockSpec((c_, c2), lambda n, i: (0, 0)),
                pl.BlockSpec((c_, c2), lambda n, i: (0, 0)),
                pl.BlockSpec((1, c2), lambda n, i: (0, 0)),
            ],
            out_specs=pl.BlockSpec((1, tile_h, W, c2), lambda n, i: (n, i, 0, 0))),
        compiler_params=pltpu.CompilerParams(
            dimension_semantics=("parallel", "parallel"),
            vmem_limit_bytes=vmem_limit),
        cost_estimate=cost,
    )(x, x, x,
      params["w12"], params["b12"].reshape(1, 2 * c_),
      params["m_cv1_w"], params["m_cv1_b"].reshape(1, c_),
      params["m_cv2_wg"], params["m_cv2_b"].reshape(1, c_),
      params["cv3_wa"], params["cv3_wb"], params["cv3_b"].reshape(1, c2))


@functools.partial(jax.jit, static_argnames=("tile_h", "out_dtype"))
def c3_forward(x_nchw, params, tile_h=None, out_dtype=jnp.bfloat16):
    # NCHW boundary kept to match the PyTorch module; the bf16 cast rides the
    # layout change so the kernel ingests half the bytes.  NHWC callers should
    # use c3_forward_nhwc directly and skip both transposes.
    x = jnp.transpose(x_nchw, (0, 2, 3, 1)).astype(jnp.bfloat16)
    out = c3_forward_nhwc(x, params, tile_h=tile_h, out_dtype=out_dtype)
    return jnp.transpose(out, (0, 3, 1, 2))


# ------------------------------------------------------------------
# Parameter construction (deterministic, synthetic) + BN folding
# ------------------------------------------------------------------
def _init_conv_bn(key, c_in, c_out, k):
    kw, kg, kb, km, kv = jax.random.split(key, 5)
    w = jax.random.normal(kw, (c_out, c_in, k, k), jnp.float32) * 0.1   # OIHW
    gamma = jax.random.uniform(kg, (c_out,), jnp.float32, 0.5, 1.5)
    beta = jax.random.normal(kb, (c_out,), jnp.float32) * 0.1
    mean = jax.random.normal(km, (c_out,), jnp.float32) * 0.1
    var = jax.random.uniform(kv, (c_out,), jnp.float32, 0.5, 1.5)
    return dict(w=w, gamma=gamma, beta=beta, mean=mean, var=var)


def _fold_bn(p):
    scale = p["gamma"] / jnp.sqrt(p["var"] + _BN_EPS)
    w_f = p["w"] * scale[:, None, None, None]   # (Cout, Cin, kh, kw)
    b_f = p["beta"] - p["mean"] * scale
    return w_f, b_f


def make_c3_params(key, c1, c2, e=0.5):
    # TODO(synk): only n=1 Bottleneck (the module default) is implemented;
    # n>1 would repeat the bottleneck stage inside the kernel.
    c_ = int(c2 * e)
    ks = jax.random.split(key, 5)
    raw = {
        "cv1": _init_conv_bn(ks[0], c1, c_, 1),
        "cv2": _init_conv_bn(ks[1], c1, c_, 1),
        "cv3": _init_conv_bn(ks[2], 2 * c_, c2, 1),
        "m_cv1": _init_conv_bn(ks[3], c_, c_, 1),     # Bottleneck.cv1 (1x1, e=1.0)
        "m_cv2": _init_conv_bn(ks[4], c_, c_, 3),     # Bottleneck.cv2 (3x3)
    }
    cv1_w, cv1_b = _fold_bn(raw["cv1"])
    cv2_w, cv2_b = _fold_bn(raw["cv2"])
    cv3_w, cv3_b = _fold_bn(raw["cv3"])
    m1_w, m1_b = _fold_bn(raw["m_cv1"])
    m2_w, m2_b = _fold_bn(raw["m_cv2"])

    cv3_mat = cv3_w[:, :, 0, 0].T                     # (2c_, c2)
    folded = {
        # cv1 & cv2 fused into one (C1, 2c_) matmul
        "w12": jnp.concatenate([cv1_w[:, :, 0, 0].T,
                                cv2_w[:, :, 0, 0].T], axis=1).astype(jnp.bfloat16),
        "b12": jnp.concatenate([cv1_b, cv2_b]),                      # f32
        # Bottleneck
        "m_cv1_w": m1_w[:, :, 0, 0].T.astype(jnp.bfloat16),          # (c_, c_)
        "m_cv1_b": m1_b,
        # 3x3 weights grouped by kh, kw taps stacked on the input-channel axis:
        # wg[kh, kw*c_+cin, cout]
        "m_cv2_wg": jnp.transpose(m2_w, (2, 3, 1, 0))
                       .reshape(3, 3 * c_, c_).astype(jnp.bfloat16),
        "m_cv2_b": m2_b,
        # cv3 split so cat([m, y2]) never materializes
        "cv3_wa": cv3_mat[:c_].astype(jnp.bfloat16),
        "cv3_wb": cv3_mat[c_:].astype(jnp.bfloat16),
        "cv3_b": cv3_b,
    }
    return raw, folded


# ------------------------------------------------------------------
# Pure-JAX reference (for correctness check against the Pallas path)
# ------------------------------------------------------------------
def _ref_conv_bn_silu(x, p, pad):
    y = jax.lax.conv_general_dilated(
        x, p["w"], window_strides=(1, 1), padding=((pad, pad), (pad, pad)),
        dimension_numbers=("NCHW", "OIHW", "NCHW"),
        preferred_element_type=jnp.float32)
    scale = p["gamma"] / jnp.sqrt(p["var"] + _BN_EPS)
    shift = p["beta"] - p["mean"] * scale
    y = y * scale[None, :, None, None] + shift[None, :, None, None]
    return y * jax.nn.sigmoid(y)


def c3_reference(x_nchw, raw):
    y1 = _ref_conv_bn_silu(x_nchw, raw["cv1"], 0)
    y2 = _ref_conv_bn_silu(x_nchw, raw["cv2"], 0)
    t = _ref_conv_bn_silu(y1, raw["m_cv1"], 0)
    m = y1 + _ref_conv_bn_silu(t, raw["m_cv2"], 1)
    cat = jnp.concatenate([m, y2], axis=1)
    return _ref_conv_bn_silu(cat, raw["cv3"], 0)


if __name__ == "__main__":
    key = jax.random.PRNGKey(0)
    k_x, k_p = jax.random.split(key)

    # Shapes consistent with C3(c1=4, c2=8, n=1, shortcut=True, e=0.5) -> c_=4
    N, C1, H, W = 2, 4, 16, 16
    C2 = 8
    x = jax.random.normal(k_x, (N, C1, H, W), jnp.float32)

    raw_params, folded_params = make_c3_params(k_p, C1, C2, e=0.5)
    ref = jax.block_until_ready(c3_reference(x, raw_params))

    # Default tiling (whole image in one row-tile at this size).
    out = jax.block_until_ready(c3_forward(x, folded_params))
    assert out.shape == (N, C2, H, W), out.shape
    err = float(jnp.max(jnp.abs(out.astype(jnp.float32) - ref)))
    assert jnp.allclose(out.astype(jnp.float32), ref, rtol=3e-2, atol=3e-2), err

    # Smaller tile_h to exercise the halo / boundary-masking path.
    out4 = jax.block_until_ready(c3_forward(x, folded_params, tile_h=4))
    err4 = float(jnp.max(jnp.abs(out4.astype(jnp.float32) - ref)))
    assert jnp.allclose(out4.astype(jnp.float32), ref, rtol=3e-2, atol=3e-2), err4

    print("KERNEL_OK")
</pallas_src>

<mosaic_0001>
module attributes {stable_mosaic.version = 11 : i64} {
  func.func @_c3_fused_kernel(%arg0: i32, %arg1: i32, %arg2: memref<1x16x16x4xbf16, #tpu.memory_space<vmem>>, %arg3: memref<1x1x16x4xbf16, #tpu.memory_space<vmem>>, %arg4: memref<1x1x16x4xbf16, #tpu.memory_space<vmem>>, %arg5: memref<4x8xbf16, #tpu.memory_space<vmem>>, %arg6: memref<1x8xf32, #tpu.memory_space<vmem>>, %arg7: memref<4x4xbf16, #tpu.memory_space<vmem>>, %arg8: memref<1x4xf32, #tpu.memory_space<vmem>>, %arg9: memref<3x12x4xbf16, #tpu.memory_space<vmem>>, %arg10: memref<1x4xf32, #tpu.memory_space<vmem>>, %arg11: memref<4x8xbf16, #tpu.memory_space<vmem>>, %arg12: memref<4x8xbf16, #tpu.memory_space<vmem>>, %arg13: memref<1x8xf32, #tpu.memory_space<vmem>>, %arg14: memref<1x16x16x8xbf16, #tpu.memory_space<vmem>>) attributes {dimension_semantics = [#tpu.dimension_semantics<parallel>, #tpu.dimension_semantics<parallel>], iteration_bounds = array<i64: 2, 1>, scalar_prefetch = 0 : i64, scratch_operands = 0 : i64, tpu.core_type = #tpu.core_type<tc>, window_params = [{transform_indices = @transform_0, window_bounds = array<i64: 1, 16, 16, 4>}, {transform_indices = @transform_1, window_bounds = array<i64: 1, 1, 16, 4>}, {transform_indices = @transform_2, window_bounds = array<i64: 1, 1, 16, 4>}, {pipeline_mode = #tpu.pipeline_mode<synchronous>, transform_indices = @transform_3, window_bounds = array<i64: 4, 8>}, {pipeline_mode = #tpu.pipeline_mode<synchronous>, transform_indices = @transform_4, window_bounds = array<i64: 1, 8>}, {pipeline_mode = #tpu.pipeline_mode<synchronous>, transform_indices = @transform_5, window_bounds = array<i64: 4, 4>}, {pipeline_mode = #tpu.pipeline_mode<synchronous>, transform_indices = @transform_6, window_bounds = array<i64: 1, 4>}, {pipeline_mode = #tpu.pipeline_mode<synchronous>, transform_indices = @transform_7, window_bounds = array<i64: 3, 12, 4>}, {pipeline_mode = #tpu.pipeline_mode<synchronous>, transform_indices = @transform_8, window_bounds = array<i64: 1, 4>}, {pipeline_mode = #tpu.pipeline_mode<synchronous>, transform_indices = @transform_9, window_bounds = array<i64: 4, 8>}, {pipeline_mode = #tpu.pipeline_mode<synchronous>, transform_indices = @transform_10, window_bounds = array<i64: 4, 8>}, {pipeline_mode = #tpu.pipeline_mode<synchronous>, transform_indices = @transform_11, window_bounds = array<i64: 1, 8>}, {transform_indices = @transform_12, window_bounds = array<i64: 1, 16, 16, 8>}]} {
    %c0 = arith.constant 0 : index
    %c0_0 = arith.constant 0 : index
    %c0_1 = arith.constant 0 : index
    %c0_2 = arith.constant 0 : index
    %0 = vector.load %arg2[%c0, %c0_0, %c0_1, %c0_2] : memref<1x16x16x4xbf16, #tpu.memory_space<vmem>>, vector<1x16x16x4xbf16>
    %1 = vector.shape_cast %0 : vector<1x16x16x4xbf16> to vector<16x16x4xbf16>
    %2 = vector.shape_cast %1 : vector<16x16x4xbf16> to vector<256x4xbf16>
    %c0_3 = arith.constant 0 : index
    %c0_4 = arith.constant 0 : index
    %3 = vector.load %arg5[%c0_3, %c0_4] : memref<4x8xbf16, #tpu.memory_space<vmem>>, vector<4x8xbf16>
    %cst = arith.constant dense<0.000000e+00> : vector<256x8xf32>
    %4 = tpu.matmul %2, %3, %cst {dimension_numbers = #tpu.dot_dimension_numbers<[1], [0], [0], [1], [0, 0, 1, 1], [], []>} : vector<256x4xbf16>, vector<4x8xbf16>, vector<256x8xf32> -> vector<256x8xf32>
    %c0_5 = arith.constant 0 : index
    %c0_6 = arith.constant 0 : index
    %5 = vector.load %arg6[%c0_5, %c0_6] : memref<1x8xf32, #tpu.memory_space<vmem>>, vector<1x8xf32>
    %6 = vector.broadcast %5 : vector<1x8xf32> to vector<256x8xf32>
    %7 = arith.addf %4, %6 : vector<256x8xf32>
    %8 = arith.negf %7 : vector<256x8xf32>
    %9 = math.exp %8 : vector<256x8xf32>
    %cst_7 = arith.constant 1.000000e+00 : f32
    %10 = vector.broadcast %cst_7 : f32 to vector<256x8xf32>
    %11 = arith.addf %10, %9 : vector<256x8xf32>
    %12 = arith.divf %10, %11 : vector<256x8xf32>
    %13 = arith.mulf %7, %12 : vector<256x8xf32>
    %14 = vector.extract_strided_slice %13 {offsets = [0, 0], sizes = [256, 4], strides = [1, 1]} : vector<256x8xf32> to vector<256x4xf32>
    %15 = vector.extract_strided_slice %13 {offsets = [0, 4], sizes = [256, 4], strides = [1, 1]} : vector<256x8xf32> to vector<256x4xf32>
    %16 = arith.truncf %15 : vector<256x4xf32> to vector<256x4xbf16>
    %c0_8 = arith.constant 0 : index
    %c0_9 = arith.constant 0 : index
    %c0_10 = arith.constant 0 : index
    %c0_11 = arith.constant 0 : index
    %17 = vector.load %arg3[%c0_8, %c0_9, %c0_10, %c0_11] : memref<1x1x16x4xbf16, #tpu.memory_space<vmem>>, vector<1x1x16x4xbf16>
    %18 = vector.shape_cast %17 : vector<1x1x16x4xbf16> to vector<1x16x4xbf16>
    %c0_12 = arith.constant 0 : index
    %c0_13 = arith.constant 0 : index
    %c0_14 = arith.constant 0 : index
    %c0_15 = arith.constant 0 : index
    %19 = vector.load %arg4[%c0_12, %c0_13, %c0_14, %c0_15] : memref<1x1x16x4xbf16, #tpu.memory_space<vmem>>, vector<1x1x16x4xbf16>
    %20 = vector.shape_cast %19 : vector<1x1x16x4xbf16> to vector<1x16x4xbf16>
    %21 = tpu.concatenate %18, %20 in 0 : vector<1x16x4xbf16>, vector<1x16x4xbf16> -> vector<2x16x4xbf16>
    %22 = vector.shape_cast %21 : vector<2x16x4xbf16> to vector<32x4xbf16>
    %c0_16 = arith.constant 0 : index
    %c0_17 = arith.constant 0 : index
    %23 = vector.load %arg5[%c0_16, %c0_17] : memref<4x8xbf16, #tpu.memory_space<vmem>>, vector<4x8xbf16>
    %cst_18 = arith.constant dense<0.000000e+00> : vector<32x8xf32>
    %24 = tpu.matmul %22, %23, %cst_18 {dimension_numbers = #tpu.dot_dimension_numbers<[1], [0], [0], [1], [0, 0, 1, 1], [], []>} : vector<32x4xbf16>, vector<4x8xbf16>, vector<32x8xf32> -> vector<32x8xf32>
    %c0_19 = arith.constant 0 : index
    %c0_20 = arith.constant 0 : index
    %25 = vector.load %arg6[%c0_19, %c0_20] : memref<1x8xf32, #tpu.memory_space<vmem>>, vector<1x8xf32>
    %26 = vector.broadcast %25 : vector<1x8xf32> to vector<32x8xf32>
    %27 = arith.addf %24, %26 : vector<32x8xf32>
    %28 = arith.negf %27 : vector<32x8xf32>
    %29 = math.exp %28 : vector<32x8xf32>
    %cst_21 = arith.constant 1.000000e+00 : f32
    %30 = vector.broadcast %cst_21 : f32 to vector<32x8xf32>
    %31 = arith.addf %30, %29 : vector<32x8xf32>
    %32 = arith.divf %30, %31 : vector<32x8xf32>
    %33 = arith.mulf %27, %32 : vector<32x8xf32>
    %34 = vector.extract_strided_slice %33 {offsets = [0, 0], sizes = [32, 4], strides = [1, 1]} : vector<32x8xf32> to vector<32x4xf32>
    %35 = arith.truncf %14 : vector<256x4xf32> to vector<256x4xbf16>
    %c0_22 = arith.constant 0 : index
    %c0_23 = arith.constant 0 : index
    %36 = vector.load %arg7[%c0_22, %c0_23] : memref<4x4xbf16, #tpu.memory_space<vmem>>, vector<4x4xbf16>
    %cst_24 = arith.constant dense<0.000000e+00> : vector<256x4xf32>
    %37 = tpu.matmul %35, %36, %cst_24 {dimension_numbers = #tpu.dot_dimension_numbers<[1], [0], [0], [1], [0, 0, 1, 1], [], []>} : vector<256x4xbf16>, vector<4x4xbf16>, vector<256x4xf32> -> vector<256x4xf32>
    %c0_25 = arith.constant 0 : index
    %c0_26 = arith.constant 0 : index
    %38 = vector.load %arg8[%c0_25, %c0_26] : memref<1x4xf32, #tpu.memory_space<vmem>>, vector<1x4xf32>
    %39 = vector.broadcast %38 : vector<1x4xf32> to vector<256x4xf32>
    %40 = arith.addf %37, %39 : vector<256x4xf32>
    %41 = arith.negf %40 : vector<256x4xf32>
    %42 = math.exp %41 : vector<256x4xf32>
    %cst_27 = arith.constant 1.000000e+00 : f32
    %43 = vector.broadcast %cst_27 : f32 to vector<256x4xf32>
    %44 = arith.addf %43, %42 : vector<256x4xf32>
    %45 = arith.divf %43, %44 : vector<256x4xf32>
    %46 = arith.mulf %40, %45 : vector<256x4xf32>
    %47 = arith.truncf %34 : vector<32x4xf32> to vector<32x4xbf16>
    %c0_28 = arith.constant 0 : index
    %c0_29 = arith.constant 0 : index
    %48 = vector.load %arg7[%c0_28, %c0_29] : memref<4x4xbf16, #tpu.memory_space<vmem>>, vector<4x4xbf16>
    %cst_30 = arith.constant dense<0.000000e+00> : vector<32x4xf32>
    %49 = tpu.matmul %47, %48, %cst_30 {dimension_numbers = #tpu.dot_dimension_numbers<[1], [0], [0], [1], [0, 0, 1, 1], [], []>} : vector<32x4xbf16>, vector<4x4xbf16>, vector<32x4xf32> -> vector<32x4xf32>
    %c0_31 = arith.constant 0 : index
    %c0_32 = arith.constant 0 : index
    %50 = vector.load %arg8[%c0_31, %c0_32] : memref<1x4xf32, #tpu.memory_space<vmem>>, vector<1x4xf32>
    %51 = vector.broadcast %50 : vector<1x4xf32> to vector<32x4xf32>
    %52 = arith.addf %49, %51 : vector<32x4xf32>
    %53 = arith.negf %52 : vector<32x4xf32>
    %54 = math.exp %53 : vector<32x4xf32>
    %cst_33 = arith.constant 1.000000e+00 : f32
    %55 = vector.broadcast %cst_33 : f32 to vector<32x4xf32>
    %56 = arith.addf %55, %54 : vector<32x4xf32>
    %57 = arith.divf %55, %56 : vector<32x4xf32>
    %58 = arith.mulf %52, %57 : vector<32x4xf32>
    %59 = vector.shape_cast %58 : vector<32x4xf32> to vector<2x16x4xf32>
    %c0_i32 = arith.constant 0 : i32
    %60 = arith.cmpi sgt, %arg1, %c0_i32 : i32
    %61 = arith.extui %60 : i1 to i32
    %62 = arith.sitofp %61 : i32 to f32
    %c0_i32_34 = arith.constant 0 : i32
    %63 = arith.cmpi slt, %arg1, %c0_i32_34 : i32
    %64 = arith.extui %63 : i1 to i32
    %65 = arith.sitofp %64 : i32 to f32
    %66 = vector.extract_strided_slice %59 {offsets = [0, 0, 0], sizes = [1, 16, 4], strides = [1, 1, 1]} : vector<2x16x4xf32> to vector<1x16x4xf32>
    %67 = vector.broadcast %62 : f32 to vector<1x16x4xf32>
    %68 = arith.mulf %66, %67 : vector<1x16x4xf32>
    %69 = arith.truncf %68 : vector<1x16x4xf32> to vector<1x16x4xbf16>
    %70 = vector.extract_strided_slice %59 {offsets = [1, 0, 0], sizes = [1, 16, 4], strides = [1, 1, 1]} : vector<2x16x4xf32> to vector<1x16x4xf32>
    %71 = vector.broadcast %65 : f32 to vector<1x16x4xf32>
    %72 = arith.mulf %70, %71 : vector<1x16x4xf32>
    %73 = arith.truncf %72 : vector<1x16x4xf32> to vector<1x16x4xbf16>
    %74 = arith.truncf %46 : vector<256x4xf32> to vector<256x4xbf16>
    %75 = vector.shape_cast %74 : vector<256x4xbf16> to vector<16x16x4xbf16>
    %76 = tpu.concatenate %69, %75, %73 in 0 : vector<1x16x4xbf16>, vector<16x16x4xbf16>, vector<1x16x4xbf16> -> vector<18x16x4xbf16>
    %cst_35 = arith.constant 0.000000e+00 : bf16
    %77 = vector.broadcast %cst_35 : bf16 to vector<18x1x4xbf16>
    %78 = vector.extract_strided_slice %76 {offsets = [0, 0, 0], sizes = [18, 15, 4], strides = [1, 1, 1]} : vector<18x16x4xbf16> to vector<18x15x4xbf16>
    %79 = tpu.concatenate %77, %78 in 1 : vector<18x1x4xbf16>, vector<18x15x4xbf16> -> vector<18x16x4xbf16>
    %80 = vector.extract_strided_slice %76 {offsets = [0, 1, 0], sizes = [18, 15, 4], strides = [1, 1, 1]} : vector<18x16x4xbf16> to vector<18x15x4xbf16>
    %81 = tpu.concatenate %80, %77 in 1 : vector<18x15x4xbf16>, vector<18x1x4xbf16> -> vector<18x16x4xbf16>
    %82 = tpu.concatenate %79, %76, %81 in 2 : vector<18x16x4xbf16>, vector<18x16x4xbf16>, vector<18x16x4xbf16> -> vector<18x16x12xbf16>
    %83 = vector.extract_strided_slice %82 {offsets = [0, 0, 0], sizes = [16, 16, 12], strides = [1, 1, 1]} : vector<18x16x12xbf16> to vector<16x16x12xbf16>
    %84 = vector.shape_cast %83 : vector<16x16x12xbf16> to vector<256x12xbf16>
    %c0_36 = arith.constant 0 : index
    %c0_37 = arith.constant 0 : index
    %c0_38 = arith.constant 0 : index
    %85 = vector.load %arg9[%c0_36, %c0_37, %c0_38] : memref<3x12x4xbf16, #tpu.memory_space<vmem>>, vector<1x12x4xbf16>
    %86 = vector.shape_cast %85 : vector<1x12x4xbf16> to vector<12x4xbf16>
    %cst_39 = arith.constant dense<0.000000e+00> : vector<256x4xf32>
    %87 = tpu.matmul %84, %86, %cst_39 {dimension_numbers = #tpu.dot_dimension_numbers<[1], [0], [0], [1], [0, 0, 1, 1], [], []>} : vector<256x12xbf16>, vector<12x4xbf16>, vector<256x4xf32> -> vector<256x4xf32>
    %88 = vector.extract_strided_slice %82 {offsets = [1, 0, 0], sizes = [16, 16, 12], strides = [1, 1, 1]} : vector<18x16x12xbf16> to vector<16x16x12xbf16>
    %89 = vector.shape_cast %88 : vector<16x16x12xbf16> to vector<256x12xbf16>
    %c1 = arith.constant 1 : index
    %c0_40 = arith.constant 0 : index
    %c0_41 = arith.constant 0 : index
    %90 = vector.load %arg9[%c1, %c0_40, %c0_41] : memref<3x12x4xbf16, #tpu.memory_space<vmem>>, vector<1x12x4xbf16>
    %91 = vector.shape_cast %90 : vector<1x12x4xbf16> to vector<12x4xbf16>
    %cst_42 = arith.constant dense<0.000000e+00> : vector<256x4xf32>
    %92 = tpu.matmul %89, %91, %cst_42 {dimension_numbers = #tpu.dot_dimension_numbers<[1], [0], [0], [1], [0, 0, 1, 1], [], []>} : vector<256x12xbf16>, vector<12x4xbf16>, vector<256x4xf32> -> vector<256x4xf32>
    %93 = arith.addf %87, %92 : vector<256x4xf32>
    %94 = vector.extract_strided_slice %82 {offsets = [2, 0, 0], sizes = [16, 16, 12], strides = [1, 1, 1]} : vector<18x16x12xbf16> to vector<16x16x12xbf16>
    %95 = vector.shape_cast %94 : vector<16x16x12xbf16> to vector<256x12xbf16>
    %c2 = arith.constant 2 : index
    %c0_43 = arith.constant 0 : index
    %c0_44 = arith.constant 0 : index
    %96 = vector.load %arg9[%c2, %c0_43, %c0_44] : memref<3x12x4xbf16, #tpu.memory_space<vmem>>, vector<1x12x4xbf16>
    %97 = vector.shape_cast %96 : vector<1x12x4xbf16> to vector<12x4xbf16>
    %cst_45 = arith.constant dense<0.000000e+00> : vector<256x4xf32>
    %98 = tpu.matmul %95, %97, %cst_45 {dimension_numbers = #tpu.dot_dimension_numbers<[1], [0], [0], [1], [0, 0, 1, 1], [], []>} : vector<256x12xbf16>, vector<12x4xbf16>, vector<256x4xf32> -> vector<256x4xf32>
    %99 = arith.addf %93, %98 : vector<256x4xf32>
    %c0_46 = arith.constant 0 : index
    %c0_47 = arith.constant 0 : index
    %100 = vector.load %arg10[%c0_46, %c0_47] : memref<1x4xf32, #tpu.memory_space<vmem>>, vector<1x4xf32>
    %101 = vector.broadcast %100 : vector<1x4xf32> to vector<256x4xf32>
    %102 = arith.addf %99, %101 : vector<256x4xf32>
    %103 = arith.negf %102 : vector<256x4xf32>
    %104 = math.exp %103 : vector<256x4xf32>
    %cst_48 = arith.constant 1.000000e+00 : f32
    %105 = vector.broadcast %cst_48 : f32 to vector<256x4xf32>
    %106 = arith.addf %105, %104 : vector<256x4xf32>
    %107 = arith.divf %105, %106 : vector<256x4xf32>
    %108 = arith.mulf %102, %107 : vector<256x4xf32>
    %109 = arith.addf %14, %108 : vector<256x4xf32>
    %110 = arith.truncf %109 : vector<256x4xf32> to vector<256x4xbf16>
    %c0_49 = arith.constant 0 : index
    %c0_50 = arith.constant 0 : index
    %111 = vector.load %arg11[%c0_49, %c0_50] : memref<4x8xbf16, #tpu.memory_space<vmem>>, vector<4x8xbf16>
    %cst_51 = arith.constant dense<0.000000e+00> : vector<256x8xf32>
    %112 = tpu.matmul %110, %111, %cst_51 {dimension_numbers = #tpu.dot_dimension_numbers<[1], [0], [0], [1], [0, 0, 1, 1], [], []>} : vector<256x4xbf16>, vector<4x8xbf16>, vector<256x8xf32> -> vector<256x8xf32>
    %c0_52 = arith.constant 0 : index
    %c0_53 = arith.constant 0 : index
    %113 = vector.load %arg12[%c0_52, %c0_53] : memref<4x8xbf16, #tpu.memory_space<vmem>>, vector<4x8xbf16>
    %cst_54 = arith.constant dense<0.000000e+00> : vector<256x8xf32>
    %114 = tpu.matmul %16, %113, %cst_54 {dimension_numbers = #tpu.dot_dimension_numbers<[1], [0], [0], [1], [0, 0, 1, 1], [], []>} : vector<256x4xbf16>, vector<4x8xbf16>, vector<256x8xf32> -> vector<256x8xf32>
    %115 = arith.addf %112, %114 : vector<256x8xf32>
    %c0_55 = arith.constant 0 : index
    %c0_56 = arith.constant 0 : index
    %116 = vector.load %arg13[%c0_55, %c0_56] : memref<1x8xf32, #tpu.memory_space<vmem>>, vector<1x8xf32>
    %117 = vector.broadcast %116 : vector<1x8xf32> to vector<256x8xf32>
    %118 = arith.addf %115, %117 : vector<256x8xf32>
    %119 = arith.negf %118 : vector<256x8xf32>
    %120 = math.exp %119 : vector<256x8xf32>
    %cst_57 = arith.constant 1.000000e+00 : f32
    %121 = vector.broadcast %cst_57 : f32 to vector<256x8xf32>
    %122 = arith.addf %121, %120 : vector<256x8xf32>
    %123 = arith.divf %121, %122 : vector<256x8xf32>
    %124 = arith.mulf %118, %123 : vector<256x8xf32>
    %125 = vector.shape_cast %124 : vector<256x8xf32> to vector<1x16x16x8xf32>
    %126 = arith.truncf %125 : vector<1x16x16x8xf32> to vector<1x16x16x8xbf16>
    %c0_58 = arith.constant 0 : index
    %c0_59 = arith.constant 0 : index
    %c0_60 = arith.constant 0 : index
    %c0_61 = arith.constant 0 : index
    %127 = vector.load %arg14[%c0_58, %c0_59, %c0_60, %c0_61] : memref<1x16x16x8xbf16, #tpu.memory_space<vmem>>, vector<1x16x16x8xbf16>
    tpu.vector_store %arg14[%c0_58, %c0_59, %c0_60, %c0_61], %126 {strides = array<i32>} : memref<1x16x16x8xbf16, #tpu.memory_space<vmem>>, vector<1x16x16x8xbf16>,
    return
  }
  func.func @transform_0(%arg0: i32, %arg1: i32) -> (i32, i32, i32, i32) {
    %c0_i32 = arith.constant 0 : i32
    %c0_i32_0 = arith.constant 0 : i32
    %c0_i32_1 = arith.constant 0 : i32
    return %arg0, %arg1, %c0_i32, %c0_i32_0 : i32, i32, i32, i32
  }
  func.func @transform_1(%arg0: i32, %arg1: i32) -> (i32, i32, i32, i32) {
    %c16_i32 = arith.constant 16 : i32
    %0 = arith.muli %arg1, %c16_i32 : i32
    %c1_i32 = arith.constant 1 : i32
    %1 = arith.subi %0, %c1_i32 : i32
    %c0_i32 = arith.constant 0 : i32
    %2 = arith.maxsi %1, %c0_i32 : i32
    %c0_i32_0 = arith.constant 0 : i32
    %c0_i32_1 = arith.constant 0 : i32
    %c0_i32_2 = arith.constant 0 : i32
    return %arg0, %2, %c0_i32_0, %c0_i32_1 : i32, i32, i32, i32
  }
  func.func @transform_2(%arg0: i32, %arg1: i32) -> (i32, i32, i32, i32) {
    %c1_i32 = arith.constant 1 : i32
    %0 = arith.addi %arg1, %c1_i32 : i32
    %c16_i32 = arith.constant 16 : i32
    %1 = arith.muli %0, %c16_i32 : i32
    %c15_i32 = arith.constant 15 : i32
    %2 = arith.minsi %1, %c15_i32 : i32
    %c0_i32 = arith.constant 0 : i32
    %c0_i32_0 = arith.constant 0 : i32
    %c0_i32_1 = arith.constant 0 : i32
    return %arg0, %2, %c0_i32, %c0_i32_0 : i32, i32, i32, i32
  }
  func.func @transform_3(%arg0: i32, %arg1: i32) -> (i32, i32) {
    %c0_i32 = arith.constant 0 : i32
    %c0_i32_0 = arith.constant 0 : i32
    %c0_i32_1 = arith.constant 0 : i32
    return %c0_i32, %c0_i32_0 : i32, i32
  }
  func.func @transform_4(%arg0: i32, %arg1: i32) -> (i32, i32) {
    %c0_i32 = arith.constant 0 : i32
    %c0_i32_0 = arith.constant 0 : i32
    %c0_i32_1 = arith.constant 0 : i32
    return %c0_i32, %c0_i32_0 : i32, i32
  }
  func.func @transform_5(%arg0: i32, %arg1: i32) -> (i32, i32) {
    %c0_i32 = arith.constant 0 : i32
    %c0_i32_0 = arith.constant 0 : i32
    %c0_i32_1 = arith.constant 0 : i32
    return %c0_i32, %c0_i32_0 : i32, i32
  }
  func.func @transform_6(%arg0: i32, %arg1: i32) -> (i32, i32) {
    %c0_i32 = arith.constant 0 : i32
    %c0_i32_0 = arith.constant 0 : i32
    %c0_i32_1 = arith.constant 0 : i32
    return %c0_i32, %c0_i32_0 : i32, i32
  }
  func.func @transform_7(%arg0: i32, %arg1: i32) -> (i32, i32, i32) {
    %c0_i32 = arith.constant 0 : i32
    %c0_i32_0 = arith.constant 0 : i32
    %c0_i32_1 = arith.constant 0 : i32
    %c0_i32_2 = arith.constant 0 : i32
    return %c0_i32, %c0_i32_0, %c0_i32_1 : i32, i32, i32
  }
  func.func @transform_8(%arg0: i32, %arg1: i32) -> (i32, i32) {
    %c0_i32 = arith.constant 0 : i32
    %c0_i32_0 = arith.constant 0 : i32
    %c0_i32_1 = arith.constant 0 : i32
    return %c0_i32, %c0_i32_0 : i32, i32
  }
  func.func @transform_9(%arg0: i32, %arg1: i32) -> (i32, i32) {
    %c0_i32 = arith.constant 0 : i32
    %c0_i32_0 = arith.constant 0 : i32
    %c0_i32_1 = arith.constant 0 : i32
    return %c0_i32, %c0_i32_0 : i32, i32
  }
  func.func @transform_10(%arg0: i32, %arg1: i32) -> (i32, i32) {
    %c0_i32 = arith.constant 0 : i32
    %c0_i32_0 = arith.constant 0 : i32
    %c0_i32_1 = arith.constant 0 : i32
    return %c0_i32, %c0_i32_0 : i32, i32
  }
  func.func @transform_11(%arg0: i32, %arg1: i32) -> (i32, i32) {
    %c0_i32 = arith.constant 0 : i32
    %c0_i32_0 = arith.constant 0 : i32
    %c0_i32_1 = arith.constant 0 : i32
    return %c0_i32, %c0_i32_0 : i32, i32
  }
  func.func @transform_12(%arg0: i32, %arg1: i32) -> (i32, i32, i32, i32) {
    %c0_i32 = arith.constant 0 : i32
    %c0_i32_0 = arith.constant 0 : i32
    %c0_i32_1 = arith.constant 0 : i32
    return %arg0, %arg1, %c0_i32, %c0_i32_0 : i32, i32, i32, i32
  }
}

</mosaic_0001>

<bundles_post_ra>
// kernel: c3_forward.1
= control target key start
LH: loop header
LB: loop body
LE: loop exit
PB: predicated region body
PF: predicated region fallthrough
CT: control target
= control target key end

     0   :  { %s5717_s21 = smov 0   ;;  %s5719_s22 = smov 0   ;;  %s7265_s0 = inlined_call_operand.vmem [shape: bf16[2,16,16,4], index: 0, kind: input, shape index: {}, may-alias: {0,1,2}]   ;;  %s7266_s1 = inlined_call_operand.vmem [shape: bf16[2,16,16,4], index: 1, kind: input, shape index: {}, may-alias: {0,1,2}]   ;;  %s7267_s2 = inlined_call_operand.vmem [shape: bf16[2,16,16,4], index: 2, kind: input, shape index: {}, may-alias: {0,1,2}]   ;;  %s7268_s3 = inlined_call_operand.vmem [shape: bf16[4,8], index: 3, kind: input, shape index: {}]   ;;  %s7269_s4 = inlined_call_operand.vmem [shape: f32[1,8], index: 4, kind: input, shape index: {}]   ;;  %s7270_s5 = inlined_call_operand.vmem [shape: bf16[4,4], index: 5, kind: input, shape index: {}]   ;;  %s7271_s6 = inlined_call_operand.vmem [shape: f32[1,4], index: 6, kind: input, shape index: {}]   ;;  %s7272_s7 = inlined_call_operand.vmem [shape: bf16[3,12,4], index: 7, kind: input, shape index: {}]   ;;  %s7273_s8 = inlined_call_operand.vmem [shape: f32[1,4], index: 8, kind: input, shape index: {}]   ;;  %s7274_s9 = inlined_call_operand.vmem [shape: bf16[4,8], index: 9, kind: input, shape index: {}]   ;;  %s7275_s10 = inlined_call_operand.vmem [shape: bf16[4,8], index: 10, kind: input, shape index: {}]   ;;  %s7276_s11 = inlined_call_operand.vmem [shape: f32[1,8], index: 11, kind: input, shape index: {}]   ;;  %s7277_s12 = inlined_call_operand.vmem [shape: bf16[2,16,16,8], index: 12, kind: output, shape index: {}]  }
   0x1   :  { %s5721_s23 = smov 0  }
   0x2 LB: > { %s34_s24 = sadd.s32 1, %s5643_s22  ;;  %p4188_p0 = scmp.ge.s32.totalorder %s5647_s23, 1  ;;  %s5647_s23 = sphi %s5721_s23, %s22_s23   ;;  %s5643_s22 = sphi %s5719_s22, %s7395_s22   ;;  %s5639_s21 = sphi %s5717_s21, %s7394_s21  }
   0x3   : > { %p36_p1 = scmp.ge.s32.totalorder %s34_s24, 2  ;;  %p448_p2 = scmp.lt.s32.totalorder %s5647_s23, 3 }
   0x5   : > { %s7397_s24 = smov (%p36_p1, %s34_s24), 0  ;;  %p449_p3 = pnand %p4188_p0, %p448_p2 }
   0x7   : > { %452 = sbr.rel (%p449_p3) target bundleno = 1358 (0x54e), region = 68 }
   0xe   : > { %v615_v0 = vld [vmem:[%s7268_s3] sm:$0x3]  ;;  %vm752_vm0 = vcmask 1041408   ;;  %p527_p4 = scmp.lt.s32.totalorder %s5639_s21, 1  ;;  %vm703_vm1 = vcmask 31744   ;;  %vm2032_vm2 = vcmask 1047552  }
   0xf   : > { %5023 = vmatprep.subr.msk.bf16.mxu0 %vm752_vm0, %v615_v0  ;;  %5024 = vmatprep.subr.msk.bf16.mxu1 %vm752_vm0, %v615_v0  ;;  %v754_v1 = vsel %vm752_vm0, %v615_v0, 0  ;;  %v1254_v20 = vld [vmem:[%s7270_s5] sm:$0x3]  ;;  %vm2033_vm3 = vsmask.f32 7424  ;;  %vm2295_vm5 = vcmask 1045504  }
  0x10   : > { %4676 = vmatpush3.bf16.msra.mxu0 %v754_v1  ;;  %4926 = vmatpush3.bf16.msra.mxu1 %v754_v1  ;;  %s7399_s21 = smov (!%p527_p4, %s5639_s21), 1  ;;  %v1311_v21 = vsel %vm752_vm0, %v1254_v20, 0  ;;  %v5801_v22 = vld [vmem:[%s7269_s4] ss:$0 sm:$0xff]  ;;  %vm6239_vm4 = vmand %vm2032_vm2, %vm2033_vm3  ;;  %s5651_s20 = smov 124   ;;  %vm1957_vm6 = vcmask 1040384  }
  0x11   : > { %5025 = vmatprep.subr.msk.bf16.mxu1 %vm752_vm0, %v615_v0  ;;  %s5742_s27 = sshll.u32 %s7399_s21, 7  ;;  %5027 = vmatprep.subr.msk.bf16.mxu0 %vm752_vm0, %v1254_v20  ;;  %vm1958_vm7 = vsmask.f32 256  ;;  %vm2215_vm9 = vcmask 64512   ;;  %vm2262_vm10 = vcmask 97280   ;;  %vm4013_vm11 = vcmask 60416  }
  0x12   : > { %s5748_s30 = scalar_lea.vmem %s7265_s0, %s5742_s27  ;;  %s4515_s13 = sadd.s32 120, %s5742_s27  ;;  %vm6531_vm8 = vmand %vm1957_vm6, %vm1958_vm7 }
  0x13   : > { %v5060_v2 = vld [vmem:[%s5748_s30] sm:$0xff]   ;;  %v5062_v4 = vld [vmem:[%s5748_s30 + $0x8] sm:$0xff]   ;;  %v5064_v6 = vld [vmem:[%s5748_s30 + $0x10] sm:$0xff]   ;;  %s549_s16 = scalar_lea.vmem %s7266_s1, %s5742_s27  ;;  %s566_s19 = scalar_lea.vmem %s7267_s2, %s4515_s13 }
  0x14   : > { %v5061_v3 = vld [vmem:[%s5748_s30 + $0x40] sm:$0xff]   ;;  %4677 = vmatprep.mubr.msk.bf16.mxu0 %vm703_vm1, %v5060_v2  ;;  %v5063_v5 = vld [vmem:[%s5748_s30 + $0x48] sm:$0xff]   ;;  %v5065_v7 = vld [vmem:[%s5748_s30 + $0x50] sm:$0xff]   ;;  %s5650_s13 = smov 8   ;;  %s7093_s17 = scalar_lea.vmem %s7277_s12, %s5742_s27 }
  0x15   : > { %4693 = vmatprep.mubr.msk.bf16.mxu1 %vm703_vm1, %v5061_v3  ;;  %4678 = vmatmul.mubr.msk.bf16.vlgmr.msra.gmra.mrb[0].mxu0 %vm703_vm1, %v5062_v4  ;;  %v5066_v8 = vld [vmem:[%s5748_s30 + $0x18] sm:$0xff]   ;;  %v5068_v10 = vld [vmem:[%s5748_s30 + $0x20] sm:$0xff]   ;;  %v5070_v12 = vld [vmem:[%s5748_s30 + $0x28] sm:$0xff]  }
  0x16   : > { %4694 = vmatmul.mubr.msk.bf16.vlgmr.msra.gmra.mrb[0].mxu1 %vm703_vm1, %v5063_v5  ;;  %4681 = vmatprep.mubr.msk.bf16.mxu0 %vm703_vm1, %v5064_v6  ;;  %v5067_v9 = vld [vmem:[%s5748_s30 + $0x58] sm:$0xff]   ;;  %v5069_v11 = vld [vmem:[%s5748_s30 + $0x60] sm:$0xff]   ;;  %v5071_v13 = vld [vmem:[%s5748_s30 + $0x68] sm:$0xff]  }
  0x17   : > { %4710 = vmatpush3.bf16.msra.mxu1 %v754_v1  ;;  %4697 = vmatprep.mubr.msk.bf16.mxu1 %vm703_vm1, %v5065_v7  ;;  %v5072_v14 = vld [vmem:[%s5748_s30 + $0x30] sm:$0xff]   ;;  %v5074_v16 = vld [vmem:[%s5748_s30 + $0x38] sm:$0xff]   ;;  %v5076_v18 = vld [vmem:[%s549_s16] sm:$0xff]  }
  0x18   : > { %v5073_v15 = vld [vmem:[%s5748_s30 + $0x70] sm:$0xff]   ;;  %v5075_v17 = vld [vmem:[%s5748_s30 + $0x78] sm:$0xff]   ;;  %v5077_v19 = vld [vmem:[%s566_s19] sm:$0xff]   ;;  %5026 = vmatprep.subr.msk.bf16.mxu1 %vm752_vm0, %v1254_v20  ;;  %4750 = vmatpush3.bf16.msra.mxu0 %v1311_v21  ;;  %s5649_s30 = smov 4  }
  0x1d   : > { %4682 = vmatmul.mubr.msk.bf16.gmra.mrb[4].mxu0 %vm703_vm1, %v5066_v8 }
  0x1e   : > { %4698 = vmatmul.mubr.msk.bf16.gmra.mrb[4].mxu1 %vm703_vm1, %v5067_v9  ;;  %4685 = vmatprep.mubr.msk.bf16.mxu0 %vm703_vm1, %v5068_v10 }
  0x1f   : > { %4701 = vmatprep.mubr.msk.bf16.mxu1 %vm703_vm1, %v5069_v11 }
  0x25   : > { %4686 = vmatmul.mubr.msk.bf16.gmra.mrb[8].mxu0 %vm703_vm1, %v5070_v12 }
  0x26   : > { %4702 = vmatmul.mubr.msk.bf16.gmra.mrb[8].mxu1 %vm703_vm1, %v5071_v13  ;;  %4689 = vmatprep.mubr.msk.bf16.mxu0 %vm703_vm1, %v5072_v14 }
  0x27   : > { %4705 = vmatprep.mubr.msk.bf16.mxu1 %vm703_vm1, %v5073_v15 }
  0x2d   : > { %4690 = vmatmul.mubr.msk.bf16.gmra.mrb[12].mxu0 %vm703_vm1, %v5074_v16 }
  0x2e   : > { %4706 = vmatmul.mubr.msk.bf16.gmra.mrb[12].mxu1 %vm703_vm1, %v5075_v17 }
  0x2f   : > { %4711 = vmatprep.mubr.msk.bf16.mxu1 %vm703_vm1, %v5076_v18 }
  0x36   : > { %4712 = vmatmul.mubr.msk.bf16.vlgmr.msra.gmra.mrb[16].mxu1 %vm703_vm1, %v5077_v19 }
  0x37   : > { %4716 = vmatpush3.bf16.msra.mxu1 %v1311_v21 }
  0xe8   : > { %v4679_v23 = vpop.f32.mrb[0].mxu0 }
  0xe9   : > { %v5804_v24 = vadd.f32 %v4679_v23, %v5801_v22  ;;  %v790_v25 = vpop.f32.mrb[1].mxu0  ;;  %v4695_v26 = vpop.f32.mrb[0].mxu1 }
  0xea   : > { %v5807_v27 = vadd.f32 %v5801_v22, %v790_v25  ;;  %v4680_v28 = vpop.f32.mrb[2].mxu0  ;;  %v854_v29 = vpop.f32.mrb[1].mxu1  ;;  %v5848_v60 = vadd.f32 %v4695_v26, %v5801_v22 }
  0xeb   : > { %v4232_v30 = vmul.f32 -1.442695, %v5804_v24  ;;  %v5811_v31 = vadd.f32 %v4680_v28, %v5801_v22  ;;  %v793_v32 = vpop.f32.mrb[3].mxu0  ;;  %v4696_v33 = vpop.f32.mrb[2].mxu1  ;;  %v5851_v0 = vadd.f32 %v5801_v22, %v854_v29 }
  0xec   : > { %v4230_v34 = vmul.f32 -1.442695, %v5807_v27  ;;  %v5815_v35 = vadd.f32 %v5801_v22, %v793_v32  ;;  %v5817_v36 = vpop.f32.mrb[3].mxu1  ;;  %v4248_v11 = vmul.f32 -1.442695, %v5848_v60  ;;  %v5859_v14 = vadd.f32 %v4696_v33, %v5801_v22 }
  0xed   : > { %5081 = vpow2.f32 %v4232_v30  ;;  %v4233_v37 = vmul.f32 -1.442695, %v5811_v31  ;;  %v4246_v13 = vmul.f32 -1.442695, %v5851_v0  ;;  %v5874_v25 = vadd.f32 %v5801_v22, %v5817_v36 }
  0xee   : > { %5083 = vpow2.f32 %v4230_v34  ;;  %v4231_v38 = vmul.f32 -1.442695, %v5815_v35  ;;  %v4249_v30 = vmul.f32 -1.442695, %v5859_v14 }
  0xef   : > { %5085 = vpow2.f32 %v4233_v37 }
  0xf0   : > { %5087 = vpow2.f32 %v4231_v38  ;;  %v4683_v39 = vpop.f32.mrb[4].mxu0 }
  0xf1   : > { %v5822_v40 = vadd.f32 %v4683_v39, %v5801_v22  ;;  %v806_v41 = vpop.f32.mrb[5].mxu0  ;;  %v4699_v42 = vpop.f32.mrb[4].mxu1 }
  0xf2   : > { %v5825_v43 = vadd.f32 %v5801_v22, %v806_v41  ;;  %v4684_v44 = vpop.f32.mrb[6].mxu0  ;;  %v5828_v45 = vadd.f32 %v4699_v42, %v5801_v22  ;;  %v5830_v46 = vpop.f32.mrb[5].mxu1 }
  0xf3   : > { %v4236_v47 = vmul.f32 -1.442695, %v5822_v40  ;;  %v5834_v48 = vadd.f32 %v4684_v44, %v5801_v22  ;;  %v809_v49 = vpop.f32.mrb[7].mxu0  ;;  %v4700_v50 = vpop.f32.mrb[6].mxu1 }
  0xf4   : > { %v4234_v51 = vmul.f32 -1.442695, %v5825_v43  ;;  %v5838_v52 = vadd.f32 %v5801_v22, %v809_v49  ;;  %v5840_v53 = vpop.f32.mrb[7].mxu1  ;;  %v5844_v55 = vadd.f32 %v4700_v50, %v5801_v22 }
  0xf5   : > { %5089 = vpow2.f32 %v4236_v47  ;;  %v4237_v54 = vmul.f32 -1.442695, %v5834_v48 }
  0xf6   : > { %5091 = vpow2.f32 %v4234_v51  ;;  %v4235_v56 = vmul.f32 -1.442695, %v5838_v52  ;;  %v4247_v51 = vmul.f32 -1.442695, %v5874_v25 }
  0xf7   : > { %v5082_v57 = vpop.eup %5081  ;;  %5093 = vpow2.f32 %v4237_v54 }
  0xf8   : > { %v5084_v58 = vpop.eup %5083  ;;  %v1015_v59 = vadd.f32 1.0, %v5082_v57  ;;  %5095 = vpow2.f32 %v4235_v56  ;;  %v4687_v61 = vpop.f32.mrb[8].mxu0 }
  0xf9   : > { %v5086_v62 = vpop.eup %5085  ;;  %v1013_v63 = vadd.f32 1.0, %v5084_v58  ;;  %v822_v1 = vpop.f32.mrb[9].mxu0  ;;  %v5880_v33 = vadd.f32 %v4687_v61, %v5801_v22 }
  0xfa   : > { %v4703_v2 = vpop.f32.mrb[8].mxu1  ;;  %v5088_v3 = vpop.eup %5087  ;;  %5097 = vrcp.f32 %v1015_v59  ;;  %v1016_v4 = vadd.f32 1.0, %v5086_v62  ;;  %v5885_v39 = vadd.f32 %v5801_v22, %v822_v1 }
  0xfb   : > { %v4688_v5 = vpop.f32.mrb[10].mxu0  ;;  %v5854_v6 = vadd.f32 %v4703_v2, %v5801_v22  ;;  %v886_v7 = vpop.f32.mrb[9].mxu1  ;;  %5099 = vrcp.f32 %v1013_v63  ;;  %v1014_v8 = vadd.f32 1.0, %v5088_v3  ;;  %v4240_v58 = vmul.f32 -1.442695, %v5880_v33 }
  0xfc   : > { %v825_v9 = vpop.f32.mrb[11].mxu0  ;;  %v4704_v10 = vpop.f32.mrb[10].mxu1  ;;  %5101 = vrcp.f32 %v1016_v4  ;;  %v5862_v15 = vadd.f32 %v5801_v22, %v886_v7  ;;  %v5893_v47 = vadd.f32 %v4688_v5, %v5801_v22  ;;  %v4238_v63 = vmul.f32 -1.442695, %v5885_v39 }
  0xfd   : > { %v889_v12 = vpop.f32.mrb[11].mxu1  ;;  %5103 = vrcp.f32 %v1014_v8  ;;  %v5865_v17 = vadd.f32 %v4704_v10, %v5801_v22  ;;  %v5897_v54 = vadd.f32 %v5801_v22, %v825_v9 }
  0xfe   : > { %v5868_v18 = vadd.f32 %v5801_v22, %v889_v12  ;;  %5105 = vpow2.f32 %v4248_v11  ;;  %v4241_v4 = vmul.f32 -1.442695, %v5893_v47 }
  0xff   : > { %v5090_v16 = vpop.eup %5089  ;;  %5107 = vpow2.f32 %v4246_v13  ;;  %v4239_v7 = vmul.f32 -1.442695, %v5897_v54 }
 0x100   : > { %v5092_v19 = vpop.eup %5091  ;;  %v1019_v20 = vadd.f32 1.0, %v5090_v16  ;;  %v5870_v21 = vpop.f32.mrb[12].mxu0 }
 0x101   : > { %v5094_v23 = vpop.eup %5093  ;;  %v1017_v26 = vadd.f32 1.0, %v5092_v19  ;;  %v5876_v28 = vpop.f32.mrb[13].mxu0 }
 0x102   : > { %v5096_v29 = vpop.eup %5095  ;;  %5109 = vrcp.f32 %v1019_v20  ;;  %v1020_v32 = vadd.f32 1.0, %v5094_v23  ;;  %v5882_v34 = vpop.f32.mrb[14].mxu0 }
 0x103   : > { %v4707_v37 = vpop.f32.mrb[12].mxu1  ;;  %5111 = vrcp.f32 %v1017_v26  ;;  %v1018_v38 = vadd.f32 1.0, %v5096_v29  ;;  %v5887_v36 = vpop.f32.mrb[15].mxu0 }
 0x104   : > { %v5890_v41 = vadd.f32 %v4707_v37, %v5801_v22  ;;  %v902_v42 = vpop.f32.mrb[13].mxu1  ;;  %v5098_v44 = vpop.eup %5097  ;;  %5113 = vrcp.f32 %v1020_v32 }
 0x105   : > { %v4708_v49 = vpop.f32.mrb[14].mxu1  ;;  %v5100_v50 = vpop.eup %5099  ;;  %5115 = vrcp.f32 %v1018_v38  ;;  %v5901_v59 = vadd.f32 %v5801_v22, %v902_v42 }
 0x106   : > { %v905_v56 = vpop.f32.mrb[15].mxu1  ;;  %v5102_v57 = vpop.eup %5101  ;;  %5117 = vpow2.f32 %v4249_v30  ;;  %v5908_v1 = vadd.f32 %v4708_v49, %v5801_v22  ;;  %v5911_v2 = vmul.f32 %v5100_v50, %v5807_v27  ;;  %v4252_v30 = vmul.f32 -1.442695, %v5828_v45 }
 0x107   : > { %v5104_v61 = vpop.eup %5103  ;;  %v5904_v62 = vmul.f32 %v5102_v57, %v5811_v31  ;;  %v5918_v5 = vadd.f32 %v5801_v22, %v905_v56  ;;  %v5921_v31 = vmul.f32 %v5098_v44, %v5804_v24  ;;  %5119 = vpow2.f32 %v4247_v51 }
 0x108   : > { %7315 = vst [vmem:[#allocation3_spill] sm:$0xff] %v5911_v2  ;;  %v5914_v3 = vmul.f32 %v5104_v61, %v5815_v35  ;;  %v5106_v9 = vpop.eup %5105  ;;  %5121 = vpow2.f32 %v4240_v58  ;;  %v5979_v58 = vadd.f32 %v5801_v22, %v5830_v46 }
 0x109   : > { %7314 = vst [vmem:[#allocation2_spill] sm:$0xff] %v5904_v62  ;;  %7317 = vst [vmem:[#allocation5_spill] sm:$0xff] %v5921_v31  ;;  %v5924_v8 = vpop.f32.mrb[16].mxu1  ;;  %v5108_v10 = vpop.eup %5107  ;;  %v5934_v11 = vpack.c.bf16 %v5904_v62, %v5921_v31  ;;  %5123 = vpow2.f32 %v4238_v63  ;;  %v1031_v37 = vadd.f32 1.0, %v5106_v9  ;;  %v5984_v63 = vadd.f32 %v5801_v22, %v5840_v53 }
 0x10a   : > { %7316 = vst [vmem:[#allocation4_spill] sm:$0xff] %v5914_v3  ;;  %v5928_v27 = vpack.c.bf16 %v5914_v3, %v5911_v2  ;;  %v5930_v35 = vpop.f32.mrb[17].mxu1  ;;  %5125 = vpow2.f32 %v4241_v4  ;;  %v1029_v42 = vadd.f32 1.0, %v5108_v10  ;;  %v5989_v10 = vadd.f32 %v5882_v34, %v5801_v22 }
 0x10b   : > { %v5936_v24 = vpop.f32.mrb[18].mxu1  ;;  %5127 = vpow2.f32 %v4239_v7  ;;  %v4251_v53 = vmul.f32 -1.442695, %v5984_v63 }
 0x10c   : > { %v5110_v12 = vpop.eup %5109  ;;  %v5938_v13 = vpop.f32.mrb[19].mxu1  ;;  %4717 = vmatprep.mubr.msk.bf16.mxu1 %vm703_vm1, %v5928_v27  ;;  %5129 = vpow2.f32 %v4252_v30 }
 0x10d   : > { %v5112_v16 = vpop.eup %5111  ;;  %4718 = vmatmul.mubr.msk.bf16.vlgmr.msra.gmra.mrb[20].mxu1 %vm703_vm1, %v5934_v11  ;;  %v5955_v38 = vmul.f32 %v5110_v12, %v5822_v40  ;;  %v5971_v40 = vadd.f32 %v5801_v22, %v5876_v28  ;;  %5131 = vrcp.f32 %v1031_v37  ;;  %v5993_v12 = vadd.f32 %v5801_v22, %v5887_v36 }
 0x10e   : > { %v5114_v19 = vpop.eup %5113  ;;  %v5948_v26 = vmul.f32 %v5112_v16, %v5825_v43  ;;  %5133 = vrcp.f32 %v1029_v42  ;;  %v4250_v16 = vmul.f32 -1.442695, %v5979_v58  ;;  %v4253_v36 = vmul.f32 -1.442695, %v5844_v55 }
 0x10f   : > { %v5116_v20 = vpop.eup %5115  ;;  %v5945_v23 = vmul.f32 %v5114_v19, %v5834_v48  ;;  %7321 = vst [vmem:[#allocation9_spill] sm:$0xff] %v5955_v38  ;;  %v4242_v7 = vmul.f32 -1.442695, %v5971_v40  ;;  %v4245_v19 = vmul.f32 -1.442695, %v5989_v10 }
 0x110   : > { %7319 = vst [vmem:[#allocation7_spill] sm:$0xff] %v5948_v26  ;;  %v5951_v29 = vmul.f32 %v5116_v20, %v5838_v52  ;;  %v5118_v32 = vpop.eup %5117  ;;  %v5967_v52 = vadd.f32 %v5870_v21, %v5801_v22  ;;  %v4243_v34 = vmul.f32 -1.442695, %v5993_v12  ;;  %v4256_v42 = vmul.f32 -1.442695, %v5854_v6 }
 0x111   : > { %7318 = vst [vmem:[#allocation6_spill] sm:$0xff] %v5945_v23  ;;  %v5120_v48 = vpop.eup %5119  ;;  %v5963_v43 = vpack.c.bf16 %v5945_v23, %v5955_v38  ;;  %v1032_v9 = vadd.f32 1.0, %v5118_v32  ;;  %v6006_v32 = vadd.f32 %v5924_v8, %v5801_v22  ;;  %v4257_v8 = vmul.f32 -1.442695, %v5865_v17 }
 0x112   : > { %7320 = vst [vmem:[#allocation8_spill] sm:$0xff] %v5951_v29  ;;  %v5959_v44 = vpack.c.bf16 %v5951_v29, %v5948_v26  ;;  %v5122_v49 = vpop.eup %5121  ;;  %v4244_v61 = vmul.f32 -1.442695, %v5967_v52  ;;  %v1030_v46 = vadd.f32 1.0, %v5120_v48  ;;  %v6013_v48 = vadd.f32 %v5801_v22, %v5930_v35 }
 0x113   : > { %v5124_v50 = vpop.eup %5123  ;;  %v1023_v51 = vadd.f32 1.0, %v5122_v49  ;;  %v4268_v35 = vmul.f32 -1.442695, %v6006_v32 }
 0x114   : > { %4721 = vmatprep.mubr.msk.bf16.mxu1 %vm703_vm1, %v5959_v44  ;;  %v5126_v56 = vpop.eup %5125  ;;  %v1021_v57 = vadd.f32 1.0, %v5124_v50  ;;  %v4254_v50 = vmul.f32 -1.442695, %v5862_v15 }
 0x115   : > { %4722 = vmatmul.mubr.msk.bf16.gmra.mrb[24].mxu1 %vm703_vm1, %v5963_v43  ;;  %v5128_v21 = vpop.eup %5127  ;;  %5135 = vrcp.f32 %v1023_v51  ;;  %v1024_v28 = vadd.f32 1.0, %v5126_v56  ;;  %v6018_v51 = vadd.f32 %v5936_v24, %v5801_v22  ;;  %v4266_v24 = vmul.f32 -1.442695, %v6013_v48 }
 0x116   : > { %5137 = vrcp.f32 %v1021_v57  ;;  %v1022_v4 = vadd.f32 1.0, %v5128_v21  ;;  %v5998_v20 = vpop.eup %5129  ;;  %v6023_v57 = vadd.f32 %v5801_v22, %v5938_v13 }
 0x117   : > { %5139 = vrcp.f32 %v1024_v28  ;;  %v6001_v30 = vpop.eup %5131  ;;  %v4269_v22 = vmul.f32 -1.442695, %v6018_v51 }
 0x118   : > { %5141 = vrcp.f32 %v1022_v4  ;;  %v6008_v37 = vpop.eup %5133 }
 0x119   : > { %5143 = vpow2.f32 %v4244_v61 }
 0x11a   : > { %5145 = vpow2.f32 %v4242_v7 }
 0x11b   : > { %5147 = vrcp.f32 %v1032_v9 }
 0x11c   : > { %5149 = vrcp.f32 %v1030_v46 }
 0x11d   : > { %5151 = vpow2.f32 %v4250_v16 }
 0x11e   : > { %5153 = vpow2.f32 %v4251_v53 }
 0x11f   : > { %v5136_v49 = vpop.eup %5135  ;;  %5155 = vpow2.f32 %v4245_v19 }
 0x120   : > { %v5138_v56 = vpop.eup %5137  ;;  %5157 = vpow2.f32 %v4243_v34  ;;  %v6038_v46 = vmul.f32 %v5136_v49, %v5880_v33 }
 0x121   : > { %v5140_v21 = vpop.eup %5139  ;;  %5159 = vpow2.f32 %v4253_v36  ;;  %v6031_v7 = vmul.f32 %v5138_v56, %v5885_v39  ;;  %v4255_v39 = vmul.f32 -1.442695, %v5868_v18 }
 0x122   : > { %v5142_v28 = vpop.eup %5141  ;;  %v6027_v61 = vmul.f32 %v5140_v21, %v5893_v47  ;;  %5161 = vpow2.f32 %v4256_v42  ;;  %7325 = vst [vmem:[#allocation13_spill] sm:$0xff] %v6038_v46  ;;  %v4267_v47 = vmul.f32 -1.442695, %v6023_v57 }
 0x123   : > { %v5144_v4 = vpop.eup %5143  ;;  %7323 = vst [vmem:[#allocation11_spill] sm:$0xff] %v6031_v7  ;;  %v6034_v9 = vmul.f32 %v5142_v28, %v5897_v54  ;;  %5163 = vpow2.f32 %v4254_v50 }
 0x124   : > { %7322 = vst [vmem:[#allocation10_spill] sm:$0xff] %v6027_v61  ;;  %v5146_v13 = vpop.eup %5145  ;;  %5165 = vpow2.f32 %v4257_v8  ;;  %v6050_v19 = vpack.c.bf16 %v6027_v61, %v6038_v46  ;;  %v1027_v34 = vadd.f32 1.0, %v5144_v4  ;;  %v4258_v4 = vmul.f32 -1.442695, %v5901_v59 }
 0x125   : > { %7324 = vst [vmem:[#allocation12_spill] sm:$0xff] %v6034_v9  ;;  %v6041_v16 = vpop.eup %5147  ;;  %v6045_v53 = vpack.c.bf16 %v6034_v9, %v6031_v7  ;;  %5167 = vpow2.f32 %v4268_v35  ;;  %v1025_v36 = vadd.f32 1.0, %v5146_v13  ;;  %v4259_v13 = vmul.f32 -1.442695, %v5918_v5 }
 0x126   : > { %v5150_v54 = vpop.eup %5149  ;;  %5169 = vpow2.f32 %v4266_v24 }
 0x127   : > { %v5152_v33 = vpop.eup %5151  ;;  %5171 = vpow2.f32 %v4269_v22  ;;  %4725 = vmatprep.mubr.msk.bf16.mxu1 %vm703_vm1, %v6045_v53 }
 0x128   : > { %v5154_v42 = vpop.eup %5153  ;;  %5173 = vpow2.f32 %v4267_v47  ;;  %4726 = vmatmul.mubr.msk.bf16.gmra.mrb[28].mxu1 %vm703_vm1, %v6050_v19  ;;  %v1033_v56 = vadd.f32 1.0, %v5152_v33 }
 0x129   : > { %v5156_v49 = vpop.eup %5155  ;;  %5175 = vpow2.f32 %v4255_v39  ;;  %v1034_v35 = vadd.f32 1.0, %v5154_v42 }
 0x12a   : > { %v5158_v50 = vpop.eup %5157  ;;  %5177 = vrcp.f32 %v1027_v34  ;;  %v1028_v8 = vadd.f32 1.0, %v5156_v49  ;;  %v1035_v49 = vadd.f32 1.0, %v5998_v20  ;;  %v6063_v20 = vmul.f32 %v6008_v37, %v5851_v0 }
 0x12b   : > { %v5160_v21 = vpop.eup %5159  ;;  %5179 = vrcp.f32 %v1025_v36  ;;  %v1026_v28 = vadd.f32 1.0, %v5158_v50 }
 0x12c   : > { %v5162_v24 = vpop.eup %5161  ;;  %5181 = vrcp.f32 %v1028_v8  ;;  %v1036_v7 = vadd.f32 1.0, %v5160_v21  ;;  %7326 = vst [vmem:[#allocation14_spill] sm:$0xff] %v6063_v20 }
 0x12d   : > { %v5164_v22 = vpop.eup %5163  ;;  %5183 = vrcp.f32 %v1026_v28 }
 0x12e   : > { %v5166_v47 = vpop.eup %5165  ;;  %5185 = vrcp.f32 %v1033_v56  ;;  %v4260_v56 = vmul.f32 -1.442695, %v5890_v41 }
 0x12f   : > { %v5168_v9 = vpop.eup %5167  ;;  %5187 = vrcp.f32 %v1034_v35 }
 0x130   : > { %v5170_v39 = vpop.eup %5169  ;;  %5189 = vpow2.f32 %v4258_v4  ;;  %v1240_v34 = vadd.f32 1.0, %v5168_v9  ;;  %v4261_v4 = vmul.f32 -1.442695, %v5908_v1 }
 0x131   : > { %v5172_v33 = vpop.eup %5171  ;;  %5191 = vpow2.f32 %v4259_v13  ;;  %v1238_v42 = vadd.f32 1.0, %v5170_v39  ;;  %v1037_v13 = vadd.f32 1.0, %v5164_v22 }
 0x132   : > { %v5174_v36 = vpop.eup %5173  ;;  %5193 = vrcp.f32 %v1240_v34  ;;  %v1241_v50 = vadd.f32 1.0, %v5172_v33 }
 0x133   : > { %v5176_v8 = vpop.eup %5175  ;;  %5195 = vrcp.f32 %v1238_v42  ;;  %v1239_v28 = vadd.f32 1.0, %v5174_v36  ;;  %v6069_v42 = vmul.f32 %v5150_v54, %v5874_v25  ;;  %v1040_v54 = vadd.f32 1.0, %v5166_v47 }
 0x134   : > { %v5178_v61 = vpop.eup %5177  ;;  %5197 = vrcp.f32 %v1241_v50  ;;  %v1038_v21 = vadd.f32 1.0, %v5176_v8  ;;  %v6106_v47 = vmul.f32 %v6041_v16, %v5859_v14 }
 0x135   : > { %v5180_v35 = vpop.eup %5179  ;;  %5199 = vrcp.f32 %v1239_v28  ;;  %7328 = vst [vmem:[#allocation16_spill] sm:$0xff] %v6069_v42  ;;  %v6078_v0 = vmul.f32 %v5178_v61, %v5967_v52  ;;  %v1039_v52 = vadd.f32 1.0, %v5162_v24  ;;  %v6102_v24 = vmul.f32 %v6001_v30, %v5848_v60 }
 0x136   : > { %v5182_v9 = vpop.eup %5181  ;;  %5201 = vrcp.f32 %v1035_v49  ;;  %v6072_v36 = vmul.f32 %v5180_v35, %v5971_v40  ;;  %7333 = vst [vmem:[#allocation21_spill] sm:$0xff] %v6106_v47 }
 0x137   : > { %v5184_v39 = vpop.eup %5183  ;;  %5203 = vrcp.f32 %v1036_v7  ;;  %v6066_v34 = vmul.f32 %v5182_v9, %v5989_v10  ;;  %7331 = vst [vmem:[#allocation19_spill] sm:$0xff] %v6078_v0  ;;  %v6090_v7 = vpack.c.bf16 %v6069_v42, %v6063_v20  ;;  %7332 = vst [vmem:[#allocation20_spill] sm:$0xff] %v6102_v24 }
 0x138   : > { %v5186_v33 = vpop.eup %5185  ;;  %7329 = vst [vmem:[#allocation17_spill] sm:$0xff] %v6072_v36  ;;  %v6075_v49 = vmul.f32 %v5184_v39, %v5993_v12  ;;  %5205 = vpow2.f32 %v4260_v56 }
 0x139   : > { %7327 = vst [vmem:[#allocation15_spill] sm:$0xff] %v6066_v34  ;;  %v5188_v22 = vpop.eup %5187  ;;  %5207 = vpow2.f32 %v4261_v4  ;;  %v6086_v40 = vpack.c.bf16 %v6066_v34, %v6078_v0 }
 0x13a   : > { %7330 = vst [vmem:[#allocation18_spill] sm:$0xff] %v6075_v49  ;;  %v5190_v37 = vpop.eup %5189  ;;  %5209 = vrcp.f32 %v1037_v13  ;;  %v6082_v10 = vpack.c.bf16 %v6075_v49, %v6072_v36  ;;  %v6110_v13 = vmul.f32 %v5186_v33, %v5979_v58 }
 0x13b   : > { %v5192_v25 = vpop.eup %5191  ;;  %5211 = vrcp.f32 %v1038_v21  ;;  %v1041_v28 = vadd.f32 1.0, %v5190_v37 }
 0x13c   : > { %v5194_v12 = vpop.eup %5193  ;;  %4729 = vmatprep.mubr.msk.bf16.mxu1 %vm703_vm1, %v6082_v10  ;;  %7334 = vst [vmem:[#allocation22_spill] sm:$0xff] %v6110_v13  ;;  %5213 = vrcp.f32 %v1039_v52 }
 0x13d   : > { %v5196_v61 = vpop.eup %5195  ;;  %v1252_v50 = vmul.f32 %v5194_v12, %v6006_v32  ;;  %4730 = vmatmul.mubr.msk.bf16.gmra.mrb[32].mxu1 %vm703_vm1, %v6086_v40  ;;  %v1042_v32 = vadd.f32 1.0, %v5192_v25  ;;  %5215 = vrcp.f32 %v1040_v54 }
 0x13e   : > { %v5198_v8 = vpop.eup %5197  ;;  %v1250_v56 = vmul.f32 %v5196_v61, %v6013_v48  ;;  %4733 = vmatprep.mubr.msk.bf16.mxu1 %vm703_vm1, %v6090_v7  ;;  %v6113_v48 = vmul.f32 %v5188_v22, %v5984_v63  ;;  %5217 = vrcp.f32 %v1041_v28 }
 0x13f   : > { %v5200_v35 = vpop.eup %5199  ;;  %v1253_v4 = vmul.f32 %v5198_v8, %v6018_v51  ;;  %v6118_v51 = vpack.c.bf16 %v6106_v47, %v6102_v24  ;;  %5219 = vrcp.f32 %v1042_v32 }
 0x140   : > { %v5202_v9 = vpop.eup %5201  ;;  %7335 = vst [vmem:[#allocation23_spill] sm:$0xff] %v6113_v48  ;;  %v1251_v39 = vmul.f32 %v5200_v35, %v6023_v57  ;;  %v6122_v63 = vpack.c.bf16 %v6113_v48, %v6110_v13 }
 0x141   : > { %v5204_v21 = vpop.eup %5203  ;;  %v1699_v60 = vpack.c.bf16 %v1253_v4, %v1252_v50  ;;  %v6131_v37 = vmul.f32 %v5202_v9, %v5828_v45 }
 0x142   : > { %v5206_v30 = vpop.eup %5205  ;;  %v1698_v14 = vpack.c.bf16 %v1251_v39, %v1250_v56  ;;  %v6134_v25 = vmul.f32 %v5204_v21, %v5844_v55 }
 0x143   : > { %v5208_v16 = vpop.eup %5207  ;;  %v1043_v33 = vadd.f32 1.0, %v5206_v30  ;;  %7336 = vst [vmem:[#allocation24_spill] sm:$0xff] %v6131_v37 }
 0x144   : > { %v5210_v58 = vpop.eup %5209  ;;  %4751 = vmatprep.mubr.msk.bf16.mxu0 %vm703_vm1, %v1698_v14  ;;  %v1044_v22 = vadd.f32 1.0, %v5208_v16  ;;  %7337 = vst [vmem:[#allocation25_spill] sm:$0xff] %v6134_v25  ;;  %v6144_v50 = vpack.c.bf16 %v6134_v25, %v6131_v37 }
 0x145   : > { %v5212_v57 = vpop.eup %5211  ;;  %4734 = vmatmul.mubr.msk.bf16.gmra.mrb[36].mxu1 %vm703_vm1, %v6118_v51  ;;  %4752 = vmatmul.mubr.msk.bf16.vlgmr.msra.gmra.mrb[16].mxu0 %vm703_vm1, %v1699_v60  ;;  %v6137_v12 = vmul.f32 %v5210_v58, %v5862_v15  ;;  %5221 = vrcp.f32 %v1043_v33 }
 0x146   : > { %4737 = vmatprep.mubr.msk.bf16.mxu1 %vm703_vm1, %v6122_v63  ;;  %v6140_v52 = vmul.f32 %v5212_v57, %v5868_v18  ;;  %v5214_v61 = vpop.eup %5213  ;;  %5223 = vrcp.f32 %v1044_v22 }
 0x147   : > { %7338 = vst [vmem:[#allocation26_spill] sm:$0xff] %v6137_v12  ;;  %v5216_v54 = vpop.eup %5215  ;;  %v6155_v15 = vmul.f32 %v5214_v61, %v5854_v6 }
 0x148   : > { %7339 = vst [vmem:[#allocation27_spill] sm:$0xff] %v6140_v52  ;;  %v5218_v8 = vpop.eup %5217  ;;  %v6148_v45 = vpack.c.bf16 %v6140_v52, %v6137_v12  ;;  %v6158_v18 = vmul.f32 %v5216_v54, %v5865_v17 }
 0x149   : > { %v5220_v55 = vpop.eup %5219  ;;  %7341 = vst [vmem:[#allocation29_spill] sm:$0xff] %v6155_v15  ;;  %v6161_v28 = vmul.f32 %v5218_v8, %v5901_v59 }
 0x14a   : > { %7340 = vst [vmem:[#allocation28_spill] sm:$0xff] %v6148_v45  ;;  %7342 = vst [vmem:[#allocation30_spill] sm:$0xff] %v6158_v18  ;;  %v6164_v56 = vmul.f32 %v5220_v55, %v5918_v5  ;;  %v6168_v32 = vpack.c.bf16 %v6158_v18, %v6155_v15  ;;  %v6193_v5 = vld [vmem:[%s7271_s6] ss:$0 sm:$0xff] }
 0x14b   : > { %7343 = vst [vmem:[#allocation31_spill] sm:$0xff] %v6161_v28 }
 0x14c   : > { %7344 = vst [vmem:[#allocation32_spill] sm:$0xff] %v6164_v56  ;;  %7345 = vst [vmem:[#allocation33_spill] sm:$0xff] %v6168_v32  ;;  %v6172_v9 = vpack.c.bf16 %v6164_v56, %v6161_v28 }
 0x14d   : > { %4738 = vmatmul.mubr.msk.bf16.gmra.mrb[40].mxu1 %vm703_vm1, %v6144_v50 }
 0x14e   : > { %4741 = vmatprep.mubr.msk.bf16.mxu1 %vm703_vm1, %v6148_v45  ;;  %7346 = vst [vmem:[#allocation34_spill] sm:$0xff] %v6172_v9 }
 0x14f   : > { %v5222_v35 = vpop.eup %5221 }
 0x150   : > { %v5224_v4 = vpop.eup %5223  ;;  %v6179_v6 = vmul.f32 %v5222_v35, %v5890_v41 }
 0x151   : > { %v6182_v17 = vmul.f32 %v5224_v4, %v5908_v1 }
 0x152   : > { %7347 = vst [vmem:[#allocation35_spill] sm:$0xff] %v6179_v6 }
 0x153   : > { %7348 = vst [vmem:[#allocation36_spill] sm:$0xff] %v6182_v17  ;;  %v6186_v59 = vpack.c.bf16 %v6182_v17, %v6179_v6 }
 0x155   : > { %4742 = vmatmul.mubr.msk.bf16.gmra.mrb[44].mxu1 %vm703_vm1, %v6168_v32  ;;  %7349 = vst [vmem:[#allocation37_spill] sm:$0xff] %v6186_v59 }
 0x156   : > { %4745 = vmatprep.mubr.msk.bf16.mxu1 %vm703_vm1, %v6172_v9 }
 0x15d   : > { %4746 = vmatmul.mubr.msk.bf16.gmra.mrb[48].mxu1 %vm703_vm1, %v6186_v59 }
 0x1e0   : > { %v4719_v39 = vpop.f32.mrb[20].mxu1 }
 0x1e1   : > { %v1356_v21 = vadd.f32 %v4719_v39, %v6193_v5  ;;  %v1347_v41 = vpop.f32.mrb[21].mxu1 }
 0x1e2   : > { %v6197_v60 = vadd.f32 %v6193_v5, %v1347_v41  ;;  %v4720_v1 = vpop.f32.mrb[22].mxu1 }
 0x1e3   : > { %v4289_v30 = vmul.f32 -1.442695, %v1356_v21  ;;  %v1359_v14 = vadd.f32 %v4720_v1, %v6193_v5  ;;  %v1350_v16 = vpop.f32.mrb[23].mxu1 }
 0x1e4   : > { %v4287_v58 = vmul.f32 -1.442695, %v6197_v60  ;;  %v1351_v57 = vadd.f32 %v6193_v5, %v1350_v16 }
 0x1e5   : > { %5225 = vpow2.f32 %v4289_v30  ;;  %v4290_v33 = vmul.f32 -1.442695, %v1359_v14 }
 0x1e6   : > { %5227 = vpow2.f32 %v4287_v58  ;;  %v4288_v22 = vmul.f32 -1.442695, %v1351_v57 }
 0x1e7   : > { %5229 = vpow2.f32 %v4290_v33 }
 0x1e8   : > { %5231 = vpow2.f32 %v4288_v22  ;;  %v4723_v61 = vpop.f32.mrb[24].mxu1 }
 0x1e9   : > { %v6203_v54 = vadd.f32 %v4723_v61, %v6193_v5  ;;  %v1363_v8 = vpop.f32.mrb[25].mxu1 }
 0x1ea   : > { %v6206_v55 = vadd.f32 %v6193_v5, %v1363_v8  ;;  %v4724_v35 = vpop.f32.mrb[26].mxu1 }
 0x1eb   : > { %v4293_v4 = vmul.f32 -1.442695, %v6203_v54  ;;  %v6210_v39 = vadd.f32 %v4724_v35, %v6193_v5  ;;  %v1366_v41 = vpop.f32.mrb[27].mxu1 }
 0x1ec   : > { %v4291_v1 = vmul.f32 -1.442695, %v6206_v55  ;;  %v6214_v30 = vadd.f32 %v6193_v5, %v1366_v41 }
 0x1ed   : > { %5233 = vpow2.f32 %v4293_v4  ;;  %v4294_v16 = vmul.f32 -1.442695, %v6210_v39 }
 0x1ee   : > { %5235 = vpow2.f32 %v4291_v1  ;;  %v4292_v58 = vmul.f32 -1.442695, %v6214_v30 }
 0x1ef   : > { %v5226_v33 = vpop.eup %5225  ;;  %5237 = vpow2.f32 %v4294_v16 }
 0x1f0   : > { %v5228_v22 = vpop.eup %5227  ;;  %v1572_v61 = vadd.f32 1.0, %v5226_v33  ;;  %5239 = vpow2.f32 %v4292_v58 }
 0x1f1   : > { %v5230_v8 = vpop.eup %5229  ;;  %v1570_v35 = vadd.f32 1.0, %v5228_v22 }
 0x1f2   : > { %v5232_v56 = vpop.eup %5231  ;;  %5241 = vrcp.f32 %v1572_v61  ;;  %v1573_v28 = vadd.f32 1.0, %v5230_v8 }
 0x1f3   : > { %5243 = vrcp.f32 %v1570_v35  ;;  %v1571_v17 = vadd.f32 1.0, %v5232_v56 }
 0x1f4   : > { %5245 = vrcp.f32 %v1573_v28 }
 0x1f5   : > { %5247 = vrcp.f32 %v1571_v17 }
 0x1f7   : > { %v5234_v4 = vpop.eup %5233 }
 0x1f8   : > { %v5236_v41 = vpop.eup %5235  ;;  %v1576_v6 = vadd.f32 1.0, %v5234_v4 }
 0x1f9   : > { %v5238_v1 = vpop.eup %5237  ;;  %v1574_v52 = vadd.f32 1.0, %v5236_v41 }
 0x1fa   : > { %v5240_v12 = vpop.eup %5239  ;;  %5249 = vrcp.f32 %v1576_v6  ;;  %v1577_v16 = vadd.f32 1.0, %v5238_v1 }
 0x1fb   : > { %5251 = vrcp.f32 %v1574_v52  ;;  %v1575_v33 = vadd.f32 1.0, %v5240_v12  ;;  %v4727_v61 = vpop.f32.mrb[28].mxu1 }
 0x1fc   : > { %v5242_v58 = vpop.eup %5241  ;;  %5253 = vrcp.f32 %v1577_v16  ;;  %v6219_v56 = vadd.f32 %v4727_v61, %v6193_v5  ;;  %v1379_v28 = vpop.f32.mrb[29].mxu1 }
 0x1fd   : > { %v5244_v22 = vpop.eup %5243  ;;  %5255 = vrcp.f32 %v1575_v33  ;;  %v1668_v35 = vmul.f32 %v5242_v58, %v1356_v21  ;;  %v6222_v41 = vadd.f32 %v6193_v5, %v1379_v28  ;;  %v4728_v6 = vpop.f32.mrb[30].mxu1 }
 0x1fe   : > { %v5246_v8 = vpop.eup %5245  ;;  %v1666_v52 = vmul.f32 %v5244_v22, %v6197_v60  ;;  %v4297_v1 = vmul.f32 -1.442695, %v6219_v56  ;;  %v6227_v16 = vadd.f32 %v4728_v6, %v6193_v5  ;;  %v1382_v33 = vpop.f32.mrb[31].mxu1 }
 0x1ff   : > { %v5248_v17 = vpop.eup %5247  ;;  %v1669_v4 = vmul.f32 %v5246_v8, %v1359_v14  ;;  %v4295_v61 = vmul.f32 -1.442695, %v6222_v41  ;;  %v6231_v18 = vadd.f32 %v6193_v5, %v1382_v33 }
 0x200   : > { %v1667_v12 = vmul.f32 %v5248_v17, %v1351_v57  ;;  %5257 = vpow2.f32 %v4297_v1  ;;  %v4298_v14 = vmul.f32 -1.442695, %v6227_v16 }
 0x201   : > { %v1798_v21 = vpack.c.bf16 %v1669_v4, %v1668_v35  ;;  %5259 = vpow2.f32 %v4295_v61  ;;  %v4296_v60 = vmul.f32 -1.442695, %v6231_v18 }
 0x202   : > { %v1797_v58 = vpack.c.bf16 %v1667_v12, %v1666_v52  ;;  %5261 = vpow2.f32 %v4298_v14 }
 0x203   : > { %v1828_v57 = vshrl.u32 %v1798_v21, 16  ;;  %v1831_v22 = vshll.u32 %v1798_v21, 16  ;;  %5263 = vpow2.f32 %v4296_v60 }
 0x204   : > { %v5250_v8 = vpop.eup %5249  ;;  %2073 = vrot.lane.b32.xlu0 %v1797_v58, %s5649_s30  ;;  %v1821_v28 = vshrl.u32 %v1797_v58, 16  ;;  %v1824_v17 = vshll.u32 %v1797_v58, 16 }
 0x205   : > { %v5252_v6 = vpop.eup %5251  ;;  %v1830_v35 = vrot.slane %v1828_v57, 7  ;;  %v1982_v4 = vrot.slane %v1831_v22, 1  ;;  %v1672_v61 = vmul.f32 %v5250_v8, %v6203_v54 }
 0x206   : > { %v5254_v1 = vpop.eup %5253  ;;  %v1980_v52 = vrot.slane %v1824_v17, 1  ;;  %v1823_v12 = vrot.slane %v1821_v28, 7  ;;  %v1670_v58 = vmul.f32 %v5252_v6, %v6206_v55 }
 0x207   : > { %v5256_v33 = vpop.eup %5255  ;;  %v1673_v15 = vmul.f32 %v5254_v1, %v6210_v39  ;;  %v6243_v48 = vor.u32 %v1831_v22, %v1830_v35  ;;  %v1983_v37 = vor.u32 %v1982_v4, %v1828_v57 }
 0x208   : > { %v1671_v60 = vmul.f32 %v5256_v33, %v6214_v30  ;;  %2075 = vrot.lane.b32.xlu0 %v1798_v21, %s5649_s30  ;;  %v1981_v13 = vor.u32 %v1980_v52, %v1821_v28  ;;  %v6248_v25 = vor.u32 %v1824_v17, %v1823_v12  ;;  %v5078_v12 = vld [vmem:[%s7272_s7 + $0x8] sm:$0x3f]  }
 0x209   : > { %v1800_v54 = vpack.c.bf16 %v1673_v15, %v1672_v61  ;;  %v2037_v57 = vsel %vm6239_vm4, %v1983_v37, 0  ;;  %v6263_v37 = vld [vmem:[%s7272_s7] sm:$0x3f]   ;;  %5028 = vmatprep.subr.msk.bf16.mxu0 %vm2295_vm5, %v5078_v12 }
 0x20a   : > { %v2036_v39 = vsel %vm6239_vm4, %v1981_v13, 0  ;;  %v1799_v8 = vpack.c.bf16 %v1671_v60, %v1670_v58  ;;  %v5258_v1 = vpop.eup %5257 }
 0x20b   : > { %2127 = vrot.lane.b32.xlu1 %v2036_v39, %s5650_s13  ;;  %v1842_v22 = vshrl.u32 %v1800_v54, 16  ;;  %v1845_v35 = vshll.u32 %v1800_v54, 16  ;;  %v5260_v21 = vpop.eup %5259  ;;  %v1580_v28 = vadd.f32 1.0, %v5258_v1  ;;  %v2297_v39 = vsel %vm2295_vm5, %v5078_v12, 0 }
 0x20c   : > { %2077 = vrot.lane.b32.xlu0 %v1799_v8, %s5649_s30  ;;  %v1835_v55 = vshrl.u32 %v1799_v8, 16  ;;  %v1838_v30 = vshll.u32 %v1799_v8, 16  ;;  %v5262_v6 = vpop.eup %5261  ;;  %v1578_v13 = vadd.f32 1.0, %v5260_v21  ;;  %4756 = vmatpush3.bf16.msra.mxu0 %v2297_v39 }
 0x20d   : > { %v1844_v15 = vrot.slane %v1842_v22, 7  ;;  %v1986_v17 = vrot.slane %v1845_v35, 1  ;;  %v5264_v33 = vpop.eup %5263  ;;  %5265 = vrcp.f32 %v1580_v28  ;;  %v1581_v61 = vadd.f32 1.0, %v5262_v6  ;;  %5029 = vmatprep.subr.msk.bf16.mxu0 %vm2295_vm5, %v6263_v37 }
 0x20e   : > { %v1837_v4 = vrot.slane %v1835_v55, 7  ;;  %v1984_v52 = vrot.slane %v1838_v30, 1  ;;  %5267 = vrcp.f32 %v1578_v13  ;;  %v1579_v58 = vadd.f32 1.0, %v5264_v33 }
 0x20f   : > { %2129 = vrot.lane.b32.xlu1 %v2037_v57, %s5650_s13  ;;  %5269 = vrcp.f32 %v1581_v61  ;;  %v1987_v28 = vor.u32 %v1986_v17, %v1842_v22  ;;  %v6273_v57 = vor.u32 %v1845_v35, %v1844_v15 }
 0x210   : > { %v1985_v60 = vor.u32 %v1984_v52, %v1835_v55  ;;  %v6267_v8 = vor.u32 %v1838_v30, %v1837_v4  ;;  %5271 = vrcp.f32 %v1579_v58  ;;  %v4731_v1 = vpop.f32.mrb[32].mxu1 }
 0x211   : > { %v6276_v55 = vadd.f32 %v4731_v1, %v6193_v5  ;;  %v1395_v6 = vpop.f32.mrb[33].mxu1  ;;  %v2039_v52 = vsel %vm6239_vm4, %v1987_v28, 0 }
 0x212   : > { %v2038_v21 = vsel %vm6239_vm4, %v1985_v60, 0  ;;  %v6281_v30 = vadd.f32 %v6193_v5, %v1395_v6  ;;  %v4732_v13 = vpop.f32.mrb[34].mxu1 }
 0x213   : > { %2131 = vrot.lane.b32.xlu0 %v2038_v21, %s5650_s13  ;;  %2079 = vrot.lane.b32.xlu1 %v1800_v54, %s5649_s30  ;;  %v4301_v4 = vmul.f32 -1.442695, %v6276_v55  ;;  %v6285_v22 = vadd.f32 %v4732_v13, %v6193_v5  ;;  %v1398_v17 = vpop.f32.mrb[35].mxu1 }
 0x214   : > { %v4299_v35 = vmul.f32 -1.442695, %v6281_v30  ;;  %v6289_v15 = vadd.f32 %v6193_v5, %v1398_v17 }
 0x215   : > { %5273 = vpow2.f32 %v4301_v4  ;;  %v4302_v54 = vmul.f32 -1.442695, %v6285_v22 }
 0x216   : > { %5275 = vpow2.f32 %v4299_v35  ;;  %v4300_v12 = vmul.f32 -1.442695, %v6289_v15 }
 0x217   : > { %2133 = vrot.lane.b32.xlu1 %v2039_v52, %s5650_s13  ;;  %v5266_v33 = vpop.eup %5265  ;;  %5277 = vpow2.f32 %v4302_v54 }
 0x218   : > { %v5268_v61 = vpop.eup %5267  ;;  %5279 = vpow2.f32 %v4300_v12  ;;  %v4735_v58 = vpop.f32.mrb[36].mxu1 }
 0x219   : > { %v4753_v60 = vpop.f32.mrb[16].mxu0  ;;  %v5270_v39 = vpop.eup %5269  ;;  %v6297_v1 = vadd.f32 %v4735_v58, %v6193_v5  ;;  %v1674_v4 = vmul.f32 %v5268_v61, %v6222_v41 }
 0x21a   : > { %v6300_v21 = vadd.f32 %v4753_v60, %v6193_v5  ;;  %v1411_v28 = vpop.f32.mrb[37].mxu1  ;;  %v1740_v6 = vpop.f32.mrb[17].mxu0  ;;  %v1677_v17 = vmul.f32 %v5270_v39, %v6227_v16  ;;  %v1676_v16 = vmul.f32 %v5266_v33, %v6219_v56 }
 0x21b   : > { %v5272_v13 = vpop.eup %5271  ;;  %v6305_v35 = vadd.f32 %v6193_v5, %v1411_v28  ;;  %v6308_v52 = vadd.f32 %v6193_v5, %v1740_v6  ;;  %v4736_v54 = vpop.f32.mrb[38].mxu1  ;;  %v4305_v60 = vmul.f32 -1.442695, %v6297_v1 }
 0x21c   : > { %v4754_v12 = vpop.f32.mrb[18].mxu0  ;;  %v1675_v58 = vmul.f32 %v5272_v13, %v6231_v18  ;;  %v4323_v42 = vmul.f32 -1.442695, %v6300_v21  ;;  %v6314_v20 = vadd.f32 %v4736_v54, %v6193_v5  ;;  %v1414_v41 = vpop.f32.mrb[39].mxu1  ;;  %v1802_v54 = vpack.c.bf16 %v1677_v17, %v1676_v16 }
 0x21d   : > { %v1743_v61 = vpop.f32.mrb[19].mxu0  ;;  %v4303_v39 = vmul.f32 -1.442695, %v6305_v35  ;;  %v4321_v28 = vmul.f32 -1.442695, %v6308_v52  ;;  %v6320_v6 = vadd.f32 %v4754_v12, %v6193_v5  ;;  %5281 = vpow2.f32 %v4305_v60 }
 0x21e   : > { %v4306_v18 = vmul.f32 -1.442695, %v6314_v20  ;;  %v1801_v13 = vpack.c.bf16 %v1675_v58, %v1674_v4  ;;  %5283 = vpow2.f32 %v4323_v42  ;;  %v6324_v47 = vadd.f32 %v6193_v5, %v1414_v41  ;;  %2083 = vrot.lane.b32.xlu1 %v1802_v54, %s5649_s30 }
 0x21f   : > { %v5274_v24 = vpop.eup %5273  ;;  %5285 = vpow2.f32 %v4303_v39  ;;  %v6327_v56 = vadd.f32 %v6193_v5, %v1743_v61  ;;  %v4324_v60 = vmul.f32 -1.442695, %v6320_v6  ;;  %v1856_v42 = vshrl.u32 %v1802_v54, 16 }
 0x220   : > { %2081 = vrot.lane.b32.xlu0 %v1801_v13, %s5649_s30  ;;  %v1849_v33 = vshrl.u32 %v1801_v13, 16  ;;  %v1852_v49 = vshll.u32 %v1801_v13, 16  ;;  %v5276_v12 = vpop.eup %5275  ;;  %v1584_v34 = vadd.f32 1.0, %v5274_v24  ;;  %5287 = vpow2.f32 %v4321_v28  ;;  %v4739_v4 = vpop.f32.mrb[40].mxu1 }
 0x221   : > { %v5278_v58 = vpop.eup %5277  ;;  %v1582_v17 = vadd.f32 1.0, %v5276_v12  ;;  %5289 = vpow2.f32 %v4306_v18  ;;  %v6333_v41 = vadd.f32 %v4739_v4, %v6193_v5  ;;  %v1427_v61 = vpop.f32.mrb[41].mxu1  ;;  %v1859_v16 = vshll.u32 %v1802_v54, 16 }
 0x222   : > { %v5280_v39 = vpop.eup %5279  ;;  %5291 = vrcp.f32 %v1584_v34  ;;  %v1585_v13 = vadd.f32 1.0, %v5278_v58  ;;  %v4740_v36 = vpop.f32.mrb[42].mxu1  ;;  %v1851_v24 = vrot.slane %v1849_v33, 7  ;;  %v1988_v28 = vrot.slane %v1852_v49, 1 }
 0x223   : > { %5293 = vrcp.f32 %v1582_v17  ;;  %v1583_v0 = vadd.f32 1.0, %v5280_v39  ;;  %v4304_v46 = vmul.f32 -1.442695, %v6324_v47  ;;  %v1430_v29 = vpop.f32.mrb[43].mxu1  ;;  %v4322_v12 = vmul.f32 -1.442695, %v6327_v56 }
 0x224   : > { %5295 = vrcp.f32 %v1585_v13  ;;  %v1989_v18 = vor.u32 %v1988_v28, %v1849_v33  ;;  %v4309_v4 = vmul.f32 -1.442695, %v6333_v41  ;;  %v1858_v23 = vrot.slane %v1856_v42, 7 }
 0x225   : > { %5297 = vrcp.f32 %v1583_v0  ;;  %v1990_v54 = vrot.slane %v1859_v16, 1  ;;  %v6340_v58 = vor.u32 %v1852_v49, %v1851_v24  ;;  %v6343_v39 = vadd.f32 %v6193_v5, %v1427_v61 }
 0x226   : > { %5299 = vpow2.f32 %v4324_v60  ;;  %v2040_v34 = vsel %vm6239_vm4, %v1989_v18, 0  ;;  %v6346_v33 = vor.u32 %v1859_v16, %v1858_v23  ;;  %v6349_v60 = vadd.f32 %v4740_v36, %v6193_v5 }
 0x227   : > { %7352 = vst [vmem:[#allocation38_spill] sm:$0xff] %v6340_v58  ;;  %v5282_v17 = vpop.eup %5281  ;;  %5301 = vpow2.f32 %v4304_v46  ;;  %2135 = vrot.lane.b32.xlu0 %v2040_v34, %s5650_s13  ;;  %v1991_v13 = vor.u32 %v1990_v54, %v1856_v42  ;;  %v6352_v46 = vadd.f32 %v6193_v5, %v1430_v29 }
 0x228   : > { %7353 = vst [vmem:[#allocation39_spill] sm:$0xff] %v6346_v33  ;;  %v5284_v0 = vpop.eup %5283  ;;  %v1588_v28 = vadd.f32 1.0, %v5282_v17  ;;  %5303 = vpow2.f32 %v4322_v12  ;;  %v4743_v26 = vpop.f32.mrb[44].mxu1 }
 0x229   : > { %v5286_v18 = vpop.eup %5285  ;;  %v1769_v49 = vadd.f32 1.0, %v5284_v0  ;;  %5305 = vpow2.f32 %v4309_v4  ;;  %v1443_v61 = vpop.f32.mrb[45].mxu1  ;;  %v2041_v24 = vsel %vm6239_vm4, %v1991_v13, 0  ;;  %v6357_v16 = vadd.f32 %v4743_v26, %v6193_v5 }
 0x22a   : > { %v5288_v42 = vpop.eup %5287  ;;  %5307 = vrcp.f32 %v1588_v28  ;;  %v1586_v23 = vadd.f32 1.0, %v5286_v18  ;;  %v4744_v12 = vpop.f32.mrb[46].mxu1  ;;  %2137 = vrot.lane.b32.xlu1 %v2041_v24, %s5650_s13  ;;  %v4307_v4 = vmul.f32 -1.442695, %v6343_v39  ;;  %v4310_v13 = vmul.f32 -1.442695, %v6349_v60 }
 0x22b   : > { %v5290_v36 = vpop.eup %5289  ;;  %5309 = vrcp.f32 %v1769_v49  ;;  %v1767_v54 = vadd.f32 1.0, %v5288_v42  ;;  %v1446_v29 = vpop.f32.mrb[47].mxu1  ;;  %v4308_v28 = vmul.f32 -1.442695, %v6352_v46  ;;  %v4313_v18 = vmul.f32 -1.442695, %v6357_v16 }
 0x22c   : > { %v5292_v34 = vpop.eup %5291  ;;  %5311 = vrcp.f32 %v1586_v23  ;;  %v1589_v17 = vadd.f32 1.0, %v5290_v36  ;;  %v6365_v24 = vadd.f32 %v6193_v5, %v1443_v61  ;;  %v6370_v23 = vadd.f32 %v4744_v12, %v6193_v5 }
 0x22d   : > { %v5294_v0 = vpop.eup %5293  ;;  %5313 = vrcp.f32 %v1767_v54  ;;  %v1680_v42 = vmul.f32 %v5292_v34, %v6276_v55 }
 0x22e   : > { %v5296_v26 = vpop.eup %5295  ;;  %5315 = vrcp.f32 %v1589_v17  ;;  %v1678_v54 = vmul.f32 %v5294_v0, %v6281_v30  ;;  %v6375_v17 = vadd.f32 %v6193_v5, %v1446_v29 }
 0x22f   : > { %v5298_v49 = vpop.eup %5297  ;;  %v1681_v38 = vmul.f32 %v5296_v26, %v6285_v22  ;;  %5317 = vpow2.f32 %v4307_v4  ;;  %v4311_v26 = vmul.f32 -1.442695, %v6365_v24 }
 0x230   : > { %v5300_v36 = vpop.eup %5299  ;;  %v1679_v3 = vmul.f32 %v5298_v49, %v6289_v15  ;;  %5319 = vpow2.f32 %v4310_v13  ;;  %v4747_v61 = vpop.f32.mrb[48].mxu1 }
 0x231   : > { %v5302_v2 = vpop.eup %5301  ;;  %v1770_v62 = vadd.f32 1.0, %v5300_v36  ;;  %5321 = vpow2.f32 %v4308_v28  ;;  %v6378_v55 = vadd.f32 %v4747_v61, %v6193_v5  ;;  %v1459_v22 = vpop.f32.mrb[49].mxu1  ;;  %v6380_v4 = vpack.c.bf16 %v1681_v38, %v1680_v42 }
 0x232   : > { %v5304_v12 = vpop.eup %5303  ;;  %v1587_v34 = vadd.f32 1.0, %v5302_v2  ;;  %5323 = vpow2.f32 %v4313_v18  ;;  %v6383_v30 = vadd.f32 %v6193_v5, %v1459_v22  ;;  %v4748_v15 = vpop.f32.mrb[50].mxu1  ;;  %v1803_v13 = vpack.c.bf16 %v1679_v3, %v1678_v54 }
 0x233   : > { %v5306_v29 = vpop.eup %5305  ;;  %5325 = vrcp.f32 %v1770_v62  ;;  %v1768_v0 = vadd.f32 1.0, %v5304_v12  ;;  %v6387_v28 = vadd.f32 %v4748_v15, %v6193_v5  ;;  %v1462_v49 = vpop.f32.mrb[51].mxu1  ;;  %2087 = vrot.lane.b32.xlu1 %v6380_v4, %s5649_s30  ;;  %v4314_v18 = vmul.f32 -1.442695, %v6370_v23 }
 0x234   : > { %v5308_v38 = vpop.eup %5307  ;;  %5327 = vrcp.f32 %v1587_v34  ;;  %v1592_v2 = vadd.f32 1.0, %v5306_v29  ;;  %v6393_v42 = vadd.f32 %v6193_v5, %v1462_v49  ;;  %2085 = vrot.lane.b32.xlu0 %v1803_v13, %s5649_s30  ;;  %v4312_v3 = vmul.f32 -1.442695, %v6375_v17 }
 0x235   : > { %v5310_v62 = vpop.eup %5309  ;;  %5329 = vrcp.f32 %v1768_v0  ;;  %v1863_v36 = vshrl.u32 %v1803_v13, 16  ;;  %v4317_v61 = vmul.f32 -1.442695, %v6378_v55  ;;  %v4315_v22 = vmul.f32 -1.442695, %v6383_v30 }
 0x236   : > { %v5312_v54 = vpop.eup %5311  ;;  %5331 = vrcp.f32 %v1592_v2  ;;  %v1866_v12 = vshll.u32 %v1803_v13, 16  ;;  %v1684_v15 = vmul.f32 %v5308_v38, %v6297_v1  ;;  %v1781_v5 = vmul.f32 %v5310_v62, %v6300_v21 }
 0x237   : > { %v5314_v34 = vpop.eup %5313  ;;  %5333 = vpow2.f32 %v4311_v26  ;;  %v4318_v29 = vmul.f32 -1.442695, %v6387_v28  ;;  %v4316_v0 = vmul.f32 -1.442695, %v6393_v42  ;;  %v1865_v31 = vrot.slane %v1863_v36, 7 }
 0x238   : > { %v5316_v49 = vpop.eup %5315  ;;  %5335 = vpow2.f32 %v4314_v18  ;;  %v1992_v33 = vrot.slane %v1866_v12, 1  ;;  %v1870_v13 = vshrl.u32 %v6380_v4, 16  ;;  %v1873_v9 = vshll.u32 %v6380_v4, 16 }
 0x239   : > { %v5318_v2 = vpop.eup %5317  ;;  %v1685_v58 = vmul.f32 %v5316_v49, %v6314_v20  ;;  %5337 = vpow2.f32 %v4312_v3  ;;  %v1779_v21 = vmul.f32 %v5314_v34, %v6308_v52  ;;  %v6411_v49 = vor.u32 %v1866_v12, %v1865_v31 }
 0x23a   : > { %v5320_v1 = vpop.eup %5319  ;;  %v1590_v26 = vadd.f32 1.0, %v5318_v2  ;;  %5339 = vpow2.f32 %v4317_v61  ;;  %v1993_v38 = vor.u32 %v1992_v33, %v1863_v36  ;;  %v1994_v59 = vrot.slane %v1873_v9, 1 }
 0x23b   : > { %v5322_v62 = vpop.eup %5321  ;;  %v1593_v18 = vadd.f32 1.0, %v5320_v1  ;;  %5341 = vpow2.f32 %v4315_v22  ;;  %v6407_v45 = vpack.c.bf16 %v1685_v58, %v1684_v15  ;;  %v1682_v52 = vmul.f32 %v5312_v54, %v6305_v35 }
 0x23c   : > { %v5324_v32 = vpop.eup %5323  ;;  %5343 = vrcp.f32 %v1590_v26  ;;  %v1591_v20 = vadd.f32 1.0, %v5322_v62  ;;  %v2042_v3 = vsel %vm6239_vm4, %v1993_v38, 0  ;;  %v1872_v33 = vrot.slane %v1870_v13, 7 }
 0x23d   : > { %v5326_v4 = vpop.eup %5325  ;;  %5345 = vrcp.f32 %v1593_v18  ;;  %2139 = vrot.lane.b32.xlu0 %v2042_v3, %s5650_s13  ;;  %v1995_v36 = vor.u32 %v1994_v59, %v1870_v13  ;;  %v1596_v22 = vadd.f32 1.0, %v5324_v32  ;;  %v1887_v34 = vshll.u32 %v6407_v45, 16 }
 0x23e   : > { %v5328_v61 = vpop.eup %5327  ;;  %v1782_v58 = vmul.f32 %v5326_v4, %v6320_v6  ;;  %5347 = vrcp.f32 %v1591_v20  ;;  %v1794_v2 = vmul.f32 0.0, %v1781_v5  ;;  %v1790_v1 = vmul.f32 0.0, %v1779_v21 }
 0x23f   : > { %v5330_v15 = vpop.eup %5329  ;;  %v1683_v31 = vmul.f32 %v5328_v61, %v6324_v47  ;;  %v2043_v35 = vsel %vm6239_vm4, %v1995_v36, 0  ;;  %5349 = vpow2.f32 %v4318_v29  ;;  %v1998_v59 = vrot.slane %v1887_v34, 1 }
 0x240   : > { %v5332_v54 = vpop.eup %5331  ;;  %v1795_v12 = vmul.f32 0.0, %v1782_v58  ;;  %v1780_v26 = vmul.f32 %v5330_v15, %v6327_v56  ;;  %2141 = vrot.lane.b32.xlu1 %v2043_v35, %s5650_s13  ;;  %5351 = vpow2.f32 %v4316_v0  ;;  %v1884_v13 = vshrl.u32 %v6407_v45, 16 }
 0x241   : > { %v5334_v6 = vpop.eup %5333  ;;  %v1805_v32 = vpack.c.bf16 %v1683_v31, %v1682_v52  ;;  %v6423_v5 = vor.u32 %v1873_v9, %v1872_v33  ;;  %5353 = vrcp.f32 %v1596_v22 }
 0x242   : > { %v5336_v21 = vpop.eup %5335  ;;  %v1791_v47 = vmul.f32 0.0, %v1780_v26  ;;  %v1594_v38 = vadd.f32 1.0, %v5334_v6  ;;  %v6425_v62 = vpack.c.bf16 %v1795_v12, %v1794_v2  ;;  %v1999_v3 = vor.u32 %v1998_v59, %v1884_v13 }
 0x243   : > { %v5338_v18 = vpop.eup %5337  ;;  %v1597_v20 = vadd.f32 1.0, %v5336_v21  ;;  %2089 = vrot.lane.b32.xlu0 %v1805_v32, %s5649_s30  ;;  %v1877_v56 = vshrl.u32 %v1805_v32, 16  ;;  %v1880_v29 = vshll.u32 %v1805_v32, 16  ;;  %v1886_v2 = vrot.slane %v1884_v13, 7 }
 0x244   : > { %v5340_v4 = vpop.eup %5339  ;;  %5355 = vrcp.f32 %v1594_v38  ;;  %v1595_v0 = vadd.f32 1.0, %v5338_v18  ;;  %2091 = vrot.lane.b32.xlu1 %v6407_v45, %s5649_s30  ;;  %v6430_v9 = vpack.c.bf16 %v1791_v47, %v1790_v1  ;;  %v2045_v31 = vsel %vm6239_vm4, %v1999_v3, 0 }
 0x245   : > { %v5342_v52 = vpop.eup %5341  ;;  %5357 = vrcp.f32 %v1597_v20  ;;  %v1996_v33 = vrot.slane %v1880_v29, 1  ;;  %v1600_v61 = vadd.f32 1.0, %v5340_v4  ;;  %v1879_v58 = vrot.slane %v1877_v56, 7 }
 0x246   : > { %v5344_v36 = vpop.eup %5343  ;;  %5359 = vrcp.f32 %v1595_v0  ;;  %v1688_v12 = vmul.f32 %v5332_v54, %v6333_v41  ;;  %v1598_v1 = vadd.f32 1.0, %v5342_v52  ;;  %v1814_v32 = vshrl.u32 %v6430_v9, 16 }
 0x247   : > { %v5346_v22 = vpop.eup %5345  ;;  %v1997_v15 = vor.u32 %v1996_v33, %v1877_v56  ;;  %v1686_v26 = vmul.f32 %v5344_v36, %v6343_v39  ;;  %5361 = vrcp.f32 %v1600_v61  ;;  %v6443_v41 = vor.u32 %v1880_v29, %v1879_v58 }
 0x248   : > { %v5348_v35 = vpop.eup %5347  ;;  %v1689_v45 = vmul.f32 %v5346_v22, %v6349_v60  ;;  %2145 = vrot.lane.b32.xlu1 %v2045_v31, %s5650_s13  ;;  %v1933_v38 = vshrl.u32 %v6425_v62, 16  ;;  %v6446_v39 = vor.u32 %v1887_v34, %v1886_v2  ;;  %5363 = vrcp.f32 %v1598_v1 }
 0x249   : > { %v1687_v59 = vmul.f32 %v5348_v35, %v6352_v46  ;;  %v2044_v6 = vsel %vm6239_vm4, %v1997_v15, 0  ;;  %v5350_v13 = vpop.eup %5349  ;;  %v1816_v29 = vrot.slane %v1814_v32, 7  ;;  %v1817_v33 = vshll.u32 %v6430_v9, 16 }
 0x24a   : > { %2143 = vrot.lane.b32.xlu0 %v2044_v6, %s5650_s13  ;;  %v1808_v21 = vpack.c.bf16 %v1689_v45, %v1688_v12  ;;  %v5352_v60 = vpop.eup %5351  ;;  %v1601_v54 = vadd.f32 1.0, %v5350_v13  ;;  %v1935_v15 = vrot.slane %v1933_v38, 7 }
 0x24b   : > { %v1807_v47 = vpack.c.bf16 %v1687_v59, %v1686_v26  ;;  %v5354_v46 = vpop.eup %5353  ;;  %v1599_v18 = vadd.f32 1.0, %v5352_v60  ;;  %v6463_v6 = vor.u32 %v1817_v33, %v1816_v29 }
 0x24c   : > { %2095 = vrot.lane.b32.xlu1 %v1808_v21, %s5649_s30  ;;  %v1898_v20 = vshrl.u32 %v1808_v21, 16  ;;  %v1901_v56 = vshll.u32 %v1808_v21, 16  ;;  %5365 = vrcp.f32 %v1601_v54  ;;  %v1692_v61 = vmul.f32 %v5354_v46, %v6357_v16 }
 0x24d   : > { %v1891_v3 = vshrl.u32 %v1807_v47, 16  ;;  %v1894_v4 = vshll.u32 %v1807_v47, 16  ;;  %5367 = vrcp.f32 %v1599_v18  ;;  %v1936_v21 = vshll.u32 %v6425_v62, 16 }
 0x24e   : > { %v5356_v0 = vpop.eup %5355  ;;  %2093 = vrot.lane.b32.xlu0 %v1807_v47, %s5649_s30  ;;  %v1900_v52 = vrot.slane %v1898_v20, 7  ;;  %v2002_v34 = vrot.slane %v1901_v56, 1 }
 0x24f   : > { %v5358_v36 = vpop.eup %5357  ;;  %v1893_v58 = vrot.slane %v1891_v3, 7  ;;  %v2000_v22 = vrot.slane %v1894_v4, 1  ;;  %v1690_v31 = vmul.f32 %v5356_v0, %v6365_v24  ;;  %v6472_v47 = vor.u32 %v1936_v21, %v1935_v15 }
 0x250   : > { %v5360_v2 = vpop.eup %5359  ;;  %v1693_v35 = vmul.f32 %v5358_v36, %v6370_v23  ;;  %v2003_v12 = vor.u32 %v2002_v34, %v1898_v20  ;;  %v6458_v45 = vor.u32 %v1901_v56, %v1900_v52 }
 0x251   : > { %v1691_v1 = vmul.f32 %v5360_v2, %v6375_v17  ;;  %v2001_v26 = vor.u32 %v2000_v22, %v1891_v3  ;;  %v6461_v59 = vor.u32 %v1894_v4, %v1893_v58  ;;  %v5362_v60 = vpop.eup %5361 }
 0x252   : > { %v2047_v16 = vsel %vm6239_vm4, %v2003_v12, 0  ;;  %v1810_v13 = vpack.c.bf16 %v1693_v35, %v1692_v61  ;;  %v5364_v20 = vpop.eup %5363  ;;  %v1696_v34 = vmul.f32 %v5362_v60, %v6378_v55 }
 0x253   : > { %v2046_v24 = vsel %vm6239_vm4, %v2001_v26, 0  ;;  %v1809_v23 = vpack.c.bf16 %v1691_v1, %v1690_v31  ;;  %2149 = vrot.lane.b32.xlu1 %v2047_v16, %s5650_s13  ;;  %v1694_v22 = vmul.f32 %v5364_v20, %v6383_v30 }
 0x254   : > { %2147 = vrot.lane.b32.xlu0 %v2046_v24, %s5650_s13  ;;  %v1912_v17 = vshrl.u32 %v1810_v13, 16  ;;  %v1915_v54 = vshll.u32 %v1810_v13, 16  ;;  %v1978_v24 = vrot.slane %v1817_v33, 1  ;;  %v3149_v33 = vld [vmem:[%s7275_s10] sm:$0x3] }
 0x255   : > { %v1905_v46 = vshrl.u32 %v1809_v23, 16  ;;  %v1908_v18 = vshll.u32 %v1809_v23, 16  ;;  %5031 = vmatprep.subr.msk.bf16.mxu1 %vm752_vm0, %v3149_v33 }
 0x256   : > { %v1914_v56 = vrot.slane %v1912_v17, 7  ;;  %v2006_v3 = vrot.slane %v1915_v54, 1  ;;  %v5366_v4 = vpop.eup %5365 }
 0x257   : > { %v1907_v29 = vrot.slane %v1905_v46, 7  ;;  %v2004_v0 = vrot.slane %v1908_v18, 1  ;;  %2099 = vrot.lane.b32.xlu1 %v1810_v13, %s5649_s30  ;;  %v5368_v52 = vpop.eup %5367  ;;  %v1697_v36 = vmul.f32 %v5366_v4, %v6387_v28 }
 0x258   : > { %2097 = vrot.lane.b32.xlu0 %v1809_v23, %s5649_s30  ;;  %v2007_v61 = vor.u32 %v2006_v3, %v1912_v17  ;;  %v6478_v58 = vor.u32 %v1915_v54, %v1914_v56  ;;  %v1695_v15 = vmul.f32 %v5368_v52, %v6393_v42  ;;  %v1979_v56 = vor.u32 %v1978_v24, %v1814_v32 }
 0x259   : > { %v2005_v2 = vor.u32 %v2004_v0, %v1905_v46  ;;  %v6482_v31 = vor.u32 %v1908_v18, %v1907_v29  ;;  %v1812_v12 = vpack.c.bf16 %v1697_v36, %v1696_v34  ;;  %v2012_v3 = vrot.slane %v1936_v21, 1 }
 0x25a   : > { %v2049_v35 = vsel %vm6239_vm4, %v2007_v61, 0  ;;  %v1811_v28 = vpack.c.bf16 %v1695_v15, %v1694_v22  ;;  %v3247_v29 = vsel %vm752_vm0, %v3149_v33, 0  ;;  %v2035_v32 = vsel %vm6239_vm4, %v1979_v56, 0  ;;  %v7357_v22 = vld [vmem:[#allocation28_spill] sm:$0xff]  ;;  %v7358_v15 = vld [vmem:[#allocation37_spill] sm:$0xff] }
 0x25b   : > { %v2048_v55 = vsel %vm6239_vm4, %v2005_v2, 0  ;;  %2153 = vrot.lane.b32.xlu1 %v2049_v35, %s5650_s13  ;;  %v1926_v1 = vshrl.u32 %v1812_v12, 16  ;;  %v1929_v26 = vshll.u32 %v1812_v12, 16  ;;  %4858 = vmatpush3.bf16.msra.mxu1 %v3247_v29  ;;  %v2013_v21 = vor.u32 %v2012_v3, %v1933_v38  ;;  %v6561_v38 = vld [vmem:[%s7272_s7 + $0x10] sm:$0x3f]  }
 0x25c   : > { %2151 = vrot.lane.b32.xlu0 %v2048_v55, %s5650_s13  ;;  %v1919_v30 = vshrl.u32 %v1811_v28, 16  ;;  %v1922_v16 = vshll.u32 %v1811_v28, 16  ;;  %v1968_v3 = vsel %vm6531_vm8, 0, %v6423_v5  ;;  %v1969_v5 = vsel %vm6531_vm8, 0, %v6443_v41 }
 0x25d   : > { %v1928_v42 = vrot.slane %v1926_v1, 7  ;;  %v2010_v13 = vrot.slane %v1929_v26, 1  ;;  %v2052_v0 = vsel %vm6239_vm4, %v2013_v21, 0  ;;  %v1970_v21 = vsel %vm6531_vm8, 0, %v6446_v39 }
 0x25e   : > { %v1921_v23 = vrot.slane %v1919_v30, 7  ;;  %v2008_v60 = vrot.slane %v1922_v16, 1  ;;  %v1972_v41 = vsel %vm6531_vm8, 0, %v6458_v45 }
 0x25f   : > { %2103 = vrot.lane.b32.xlu1 %v1812_v12, %s5649_s30  ;;  %v2011_v17 = vor.u32 %v2010_v13, %v1926_v1  ;;  %v6492_v54 = vor.u32 %v1929_v26, %v1928_v42  ;;  %v7360_v12 = vld [vmem:[#allocation38_spill] sm:$0xff] }
 0x260   : > { %2101 = vrot.lane.b32.xlu0 %v1811_v28, %s5649_s30  ;;  %v2009_v46 = vor.u32 %v2008_v60, %v1919_v30  ;;  %v6494_v18 = vor.u32 %v1922_v16, %v1921_v23  ;;  %v1965_v55 = vsel %vm6531_vm8, 0, %v7360_v12  ;;  %v7361_v30 = vld [vmem:[#allocation39_spill] sm:$0xff] }
 0x261   : > { %v2051_v20 = vsel %vm6239_vm4, %v2011_v17, 0  ;;  %v1966_v16 = vsel %vm6531_vm8, 0, %v7361_v30  ;;  %v1967_v17 = vsel %vm6531_vm8, 0, %v6411_v49 }
 0x262   : > { %v2050_v4 = vsel %vm6239_vm4, %v2009_v46, 0 }
 0x263   : > { %2157 = vrot.lane.b32.xlu1 %v2051_v20, %s5650_s13 }
 0x264   : > { %2155 = vrot.lane.b32.xlu0 %v2050_v4, %s5650_s13 }
 0x267   : > { %2125 = vrot.lane.b32.xlu1 %v2035_v32, %s5650_s13 }
 0x268   : > { %2071 = vrot.lane.b32.xlu0 %v6430_v9, %s5649_s30 }
 0x26b   : > { %2159 = vrot.lane.b32.xlu1 %v2052_v0, %s5650_s13 }
 0x26c   : > { %2105 = vrot.lane.b32.xlu0 %v6425_v62, %s5649_s30 }
 0x26f   : > { %3168 = vrot.lane.b32.xlu1 %v5934_v11, %s5651_s20  ;;  %v1961_v11 = vsel %vm6531_vm8, 0, %v6248_v25 }
 0x270   : > { %3166 = vrot.lane.b32.xlu0 %v5928_v27, %s5651_s20 }
 0x273   : > { %3172 = vrot.lane.b32.xlu1 %v5963_v43, %s5651_s20 }
 0x274   : > { %3170 = vrot.lane.b32.xlu0 %v5959_v44, %s5651_s20 }
 0x276   : > { %v2074_v14 = vpop.permute.xlu0 %2073 }
 0x277   : > { %3176 = vrot.lane.b32.xlu1 %v6050_v19, %s5651_s20  ;;  %v2166_v44 = vsel %vm703_vm1, %v1961_v11, %v2074_v14 }
 0x278   : > { %3174 = vrot.lane.b32.xlu0 %v6045_v53, %s5651_s20  ;;  %v1962_v53 = vsel %vm6531_vm8, 0, %v6243_v48 }
 0x27a   : > { %v2076_v27 = vpop.permute.xlu0 %2075 }
 0x27b   : > { %3180 = vrot.lane.b32.xlu1 %v6086_v40, %s5651_s20  ;;  %v2169_v40 = vsel %vm703_vm1, %v1962_v53, %v2076_v27 }
 0x27c   : > { %3178 = vrot.lane.b32.xlu0 %v6082_v10, %s5651_s20  ;;  %v2468_v10 = vsel %vm2295_vm5, %v6263_v37, 0 }
 0x27d   : > { %v2128_v43 = vpop.permute.xlu1 %2127 }
 0x27e   : > { %v6546_v19 = vsel %vm2215_vm9, %v2166_v44, %v2128_v43  ;;  %v2078_v25 = vpop.permute.xlu0 %2077 }
 0x27f   : > { %4757 = vmatprep.mubr.msk.bf16.mxu0 %vm2262_vm10, %v6546_v19  ;;  %3184 = vrot.lane.b32.xlu1 %v6118_v51, %s5651_s20  ;;  %v1963_v51 = vsel %vm6531_vm8, 0, %v6267_v8  ;;  %v7356_v8 = vld [vmem:[#allocation33_spill] sm:$0xff] }
 0x280   : > { %3182 = vrot.lane.b32.xlu0 %v6090_v7, %s5651_s20  ;;  %v2172_v37 = vsel %vm703_vm1, %v1963_v51, %v2078_v25 }
 0x281   : > { %v2130_v9 = vpop.permute.xlu1 %2129 }
 0x282   : > { %v6566_v48 = vsel %vm2215_vm9, %v2169_v40, %v2130_v9  ;;  %v1971_v40 = vsel %vm6531_vm8, 0, %v6461_v59 }
 0x283   : > { %4758 = vmatmul.mubr.msk.bf16.vlgmr.msra.gmra.mrb[20].mxu0 %vm2262_vm10, %v6566_v48  ;;  %3188 = vrot.lane.b32.xlu1 %v6144_v50, %s5651_s20  ;;  %v1964_v50 = vsel %vm6531_vm8, 0, %v6273_v57  ;;  %v7359_v57 = vld [vmem:[#allocation34_spill] sm:$0xff] }
 0x284   : > { %4790 = vmatpush3.bf16.msra.mxu0 %v2468_v10  ;;  %3186 = vrot.lane.b32.xlu0 %v6122_v63, %s5651_s20 }
 0x285   : > { %v2132_v52 = vpop.permute.xlu0 %2131  ;;  %v2080_v34 = vpop.permute.xlu1 %2079  ;;  %5030 = vmatprep.subr.msk.bf16.mxu0 %vm2295_vm5, %v6561_v38 }
 0x286   : > { %v6581_v7 = vsel %vm2215_vm9, %v2172_v37, %v2132_v52  ;;  %v2175_v36 = vsel %vm703_vm1, %v1964_v50, %v2080_v34  ;;  %v1974_v34 = vsel %vm6531_vm8, 0, %v6478_v58  ;;  %v1973_v50 = vsel %vm6531_vm8, 0, %v6482_v31 }
 0x287   : > { %4761 = vmatprep.mubr.msk.bf16.mxu0 %vm2262_vm10, %v6581_v7  ;;  %3192 = vrot.lane.b32.xlu1 %v7356_v8, %s5651_s20 }
 0x288   : > { %3190 = vrot.lane.b32.xlu0 %v7357_v22, %s5651_s20 }
 0x289   : > { %v2134_v61 = vpop.permute.xlu1 %2133 }
 0x28a   : > { %v6594_v63 = vsel %vm2215_vm9, %v2175_v36, %v2134_v61 }
 0x28b   : > { %4762 = vmatmul.mubr.msk.bf16.gmra.mrb[24].mxu0 %vm2262_vm10, %v6594_v63  ;;  %3196 = vrot.lane.b32.xlu1 %v7358_v15, %s5651_s20 }
 0x28c   : > { %3194 = vrot.lane.b32.xlu0 %v7359_v57, %s5651_s20 }
 0x290   : > { %v2084_v35 = vpop.permute.xlu1 %2083 }
 0x291   : > { %v2181_v42 = vsel %vm703_vm1, %v1966_v16, %v2084_v35  ;;  %v1975_v35 = vsel %vm6531_vm8, 0, %v6494_v18  ;;  %v3148_v18 = vld [vmem:[%s7274_s9] sm:$0x3] }
 0x292   : > { %v2082_v2 = vpop.permute.xlu0 %2081  ;;  %5032 = vmatprep.subr.msk.bf16.mxu1 %vm752_vm0, %v3148_v18 }
 0x293   : > { %v2178_v28 = vsel %vm703_vm1, %v1965_v55, %v2082_v2  ;;  %v1976_v2 = vsel %vm6531_vm8, 0, %v6492_v54 }
 0x299   : > { %v2136_v1 = vpop.permute.xlu0 %2135 }
 0x29a   : > { %v6607_v26 = vsel %vm2215_vm9, %v2178_v28, %v2136_v1 }
 0x29b   : > { %4765 = vmatprep.mubr.msk.bf16.mxu0 %vm2262_vm10, %v6607_v26 }
 0x29c   : > { %v2138_v13 = vpop.permute.xlu1 %2137 }
 0x29d   : > { %v6616_v24 = vsel %vm2215_vm9, %v2181_v42, %v2138_v13  ;;  %v1960_v42 = vsel %vm6531_vm8, 0, %v6463_v6  ;;  %v2642_v6 = vsel %vm2295_vm5, %v6561_v38, 0 }
 0x29e   : > { %4766 = vmatmul.mubr.msk.bf16.gmra.mrb[28].mxu0 %vm2262_vm10, %v6616_v24 }
 0x2a5   : > { %v2088_v60 = vpop.permute.xlu1 %2087 }
 0x2a6   : > { %v2086_v23 = vpop.permute.xlu0 %2085  ;;  %v2187_v33 = vsel %vm703_vm1, %v1968_v3, %v2088_v60 }
 0x2a7   : > { %v2184_v46 = vsel %vm703_vm1, %v1967_v17, %v2086_v23 }
 0x2af   : > { %v2140_v20 = vpop.permute.xlu0 %2139 }
 0x2b0   : > { %v6625_v56 = vsel %vm2215_vm9, %v2184_v46, %v2140_v20  ;;  %v1977_v46 = vsel %vm6531_vm8, 0, %v6472_v47  ;;  %v3459_v47 = vsel %vm752_vm0, %v3148_v18, 0 }
 0x2b1   : > { %4769 = vmatprep.mubr.msk.bf16.mxu0 %vm2262_vm10, %v6625_v56 }
 0x2b2   : > { %v2142_v4 = vpop.permute.xlu1 %2141 }
 0x2b3   : > { %v6634_v29 = vsel %vm2215_vm9, %v2187_v33, %v2142_v4 }
 0x2b4   : > { %4770 = vmatmul.mubr.msk.bf16.gmra.mrb[32].mxu0 %vm2262_vm10, %v6634_v29 }
 0x2b5   : > { %v2090_v49 = vpop.permute.xlu0 %2089 }
 0x2b6   : > { %v2092_v32 = vpop.permute.xlu1 %2091  ;;  %v2190_v27 = vsel %vm703_vm1, %v1969_v5, %v2090_v49 }
 0x2b7   : > { %v2193_v14 = vsel %vm703_vm1, %v1970_v21, %v2092_v32 }
 0x2ba   : > { %v2146_v0 = vpop.permute.xlu1 %2145 }
 0x2bb   : > { %v6647_v44 = vsel %vm2215_vm9, %v2193_v14, %v2146_v0 }
 0x2bc   : > { %v2144_v11 = vpop.permute.xlu0 %2143 }
 0x2bd   : > { %v6650_v43 = vsel %vm2215_vm9, %v2190_v27, %v2144_v11 }
 0x2be   : > { %4773 = vmatprep.mubr.msk.bf16.mxu0 %vm2262_vm10, %v6650_v43  ;;  %v2096_v39 = vpop.permute.xlu1 %2095 }
 0x2bf   : > { %4774 = vmatmul.mubr.msk.bf16.gmra.mrb[36].mxu0 %vm2262_vm10, %v6647_v44  ;;  %v2199_v25 = vsel %vm703_vm1, %v1972_v41, %v2096_v39 }
 0x2c0   : > { %v2094_v53 = vpop.permute.xlu0 %2093 }
 0x2c1   : > { %v2196_v10 = vsel %vm703_vm1, %v1971_v40, %v2094_v53 }
 0x2c5   : > { %v2150_v9 = vpop.permute.xlu1 %2149 }
 0x2c6   : > { %v2148_v51 = vpop.permute.xlu0 %2147  ;;  %v6665_v37 = vsel %vm2215_vm9, %v2199_v25, %v2150_v9 }
 0x2c7   : > { %v6668_v52 = vsel %vm2215_vm9, %v2196_v10, %v2148_v51 }
 0x2c8   : > { %4777 = vmatprep.mubr.msk.bf16.mxu0 %vm2262_vm10, %v6668_v52 }
 0x2c9   : > { %4778 = vmatmul.mubr.msk.bf16.gmra.mrb[40].mxu0 %vm2262_vm10, %v6665_v37  ;;  %v2100_v45 = vpop.permute.xlu1 %2099 }
 0x2ca   : > { %v2098_v59 = vpop.permute.xlu0 %2097  ;;  %v2205_v8 = vsel %vm703_vm1, %v1974_v34, %v2100_v45 }
 0x2cb   : > { %v2202_v61 = vsel %vm703_vm1, %v1973_v50, %v2098_v59 }
 0x2cd   : > { %v2154_v36 = vpop.permute.xlu1 %2153 }
 0x2ce   : > { %v2152_v22 = vpop.permute.xlu0 %2151  ;;  %v6683_v15 = vsel %vm2215_vm9, %v2205_v8, %v2154_v36 }
 0x2cf   : > { %v6686_v57 = vsel %vm2215_vm9, %v2202_v61, %v2152_v22 }
 0x2d0   : > { %4781 = vmatprep.mubr.msk.bf16.mxu0 %vm2262_vm10, %v6686_v57 }
 0x2d1   : > { %4782 = vmatmul.mubr.msk.bf16.gmra.mrb[44].mxu0 %vm2262_vm10, %v6683_v15  ;;  %v2104_v58 = vpop.permute.xlu1 %2103 }
 0x2d2   : > { %v2102_v31 = vpop.permute.xlu0 %2101  ;;  %v2211_v12 = vsel %vm703_vm1, %v1976_v2, %v2104_v58 }
 0x2d3   : > { %v2208_v28 = vsel %vm703_vm1, %v1975_v35, %v2102_v31 }
 0x2d5   : > { %v2158_v55 = vpop.permute.xlu1 %2157 }
 0x2d6   : > { %v2156_v1 = vpop.permute.xlu0 %2155  ;;  %v6701_v30 = vsel %vm2215_vm9, %v2211_v12, %v2158_v55 }
 0x2d7   : > { %v6704_v16 = vsel %vm2215_vm9, %v2208_v28, %v2156_v1 }
 0x2d8   : > { %4785 = vmatprep.mubr.msk.bf16.mxu0 %vm2262_vm10, %v6704_v16 }
 0x2d9   : > { %4786 = vmatmul.mubr.msk.bf16.gmra.mrb[48].mxu0 %vm2262_vm10, %v6701_v30  ;;  %v2126_v54 = vpop.permute.xlu1 %2125 }
 0x2da   : > { %v2072_v13 = vpop.permute.xlu0 %2071 }
 0x2db   : > { %v2163_v23 = vsel %vm703_vm1, %v1960_v42, %v2072_v13 }
 0x2dc   : > { %v2217_v60 = vsel %vm2215_vm9, %v2163_v23, %v2126_v54 }
 0x2dd   : > { %4791 = vmatprep.mubr.msk.bf16.mxu0 %vm2262_vm10, %v2217_v60  ;;  %v2160_v17 = vpop.permute.xlu1 %2159 }
 0x2de   : > { %v2106_v20 = vpop.permute.xlu0 %2105 }
 0x2df   : > { %v2214_v3 = vsel %vm703_vm1, %v1977_v46, %v2106_v20 }
 0x2e0   : > { %v6727_v33 = vsel %vm2215_vm9, %v2214_v3, %v2160_v17 }
 0x2e1   : > { %4792 = vmatmul.mubr.msk.bf16.vlgmr.msra.gmra.mrb[20].mxu0 %vm2262_vm10, %v6546_v19  ;;  %v3169_v4 = vpop.permute.xlu1 %3168 }
 0x2e2   : > { %v3167_v49 = vpop.permute.xlu0 %3166  ;;  %4824 = vmatpush3.bf16.msra.mxu0 %v2642_v6  ;;  %4795 = vmatprep.mubr.msk.bf16.mxu0 %vm2262_vm10, %v6566_v48 }
 0x2e3   : > { %4859 = vmatprep.mubr.msk.bf16.mxu1 %vm703_vm1, %v3167_v49 }
 0x2e4   : > { %4860 = vmatmul.mubr.msk.bf16.vlgmr.msra.gmra.mrb[52].mxu1 %vm703_vm1, %v3169_v4 }
 0x2e5   : > { %4892 = vmatpush3.bf16.msra.mxu1 %v3459_v47  ;;  %v3173_v19 = vpop.permute.xlu1 %3172 }
 0x2e6   : > { %v3171_v62 = vpop.permute.xlu0 %3170 }
 0x2e7   : > { %4863 = vmatprep.mubr.msk.bf16.mxu1 %vm703_vm1, %v3171_v62 }
 0x2e9   : > { %4796 = vmatmul.mubr.msk.bf16.gmra.mrb[24].mxu0 %vm2262_vm10, %v6581_v7  ;;  %v3177_v32 = vpop.permute.xlu1 %3176 }
 0x2ea   : > { %4799 = vmatprep.mubr.msk.bf16.mxu0 %vm2262_vm10, %v6594_v63  ;;  %v3175_v38 = vpop.permute.xlu0 %3174 }
 0x2ec   : > { %4864 = vmatmul.mubr.msk.bf16.gmra.mrb[56].mxu1 %vm703_vm1, %v3173_v19 }
 0x2ed   : > { %4867 = vmatprep.mubr.msk.bf16.mxu1 %vm703_vm1, %v3175_v38  ;;  %v3181_v0 = vpop.permute.xlu1 %3180 }
 0x2ee   : > { %v3179_v21 = vpop.permute.xlu0 %3178 }
 0x2f1   : > { %4800 = vmatmul.mubr.msk.bf16.gmra.mrb[28].mxu0 %vm2262_vm10, %v6607_v26  ;;  %v3185_v14 = vpop.permute.xlu1 %3184 }
 0x2f2   : > { %4803 = vmatprep.mubr.msk.bf16.mxu0 %vm2262_vm10, %v6616_v24  ;;  %v3183_v5 = vpop.permute.xlu0 %3182 }
 0x2f4   : > { %4868 = vmatmul.mubr.msk.bf16.gmra.mrb[60].mxu1 %vm703_vm1, %v3177_v32 }
 0x2f5   : > { %4871 = vmatprep.mubr.msk.bf16.mxu1 %vm703_vm1, %v3179_v21  ;;  %v3189_v11 = vpop.permute.xlu1 %3188 }
 0x2f6   : > { %v3187_v27 = vpop.permute.xlu0 %3186 }
 0x2f9   : > { %4804 = vmatmul.mubr.msk.bf16.gmra.mrb[32].mxu0 %vm2262_vm10, %v6625_v56  ;;  %v3193_v53 = vpop.permute.xlu1 %3192 }
 0x2fa   : > { %4807 = vmatprep.mubr.msk.bf16.mxu0 %vm2262_vm10, %v6634_v29  ;;  %v3191_v39 = vpop.permute.xlu0 %3190 }
 0x2fc   : > { %4872 = vmatmul.mubr.msk.bf16.gmra.mrb[64].mxu1 %vm703_vm1, %v3181_v0 }
 0x2fd   : > { %4875 = vmatprep.mubr.msk.bf16.mxu1 %vm703_vm1, %v3183_v5  ;;  %v3197_v40 = vpop.permute.xlu1 %3196 }
 0x2fe   : > { %v3195_v41 = vpop.permute.xlu0 %3194 }
 0x301   : > { %4808 = vmatmul.mubr.msk.bf16.gmra.mrb[36].mxu0 %vm2262_vm10, %v6650_v43 }
 0x302   : > { %4811 = vmatprep.mubr.msk.bf16.mxu0 %vm2262_vm10, %v6647_v44 }
 0x304   : > { %4876 = vmatmul.mubr.msk.bf16.gmra.mrb[68].mxu1 %vm703_vm1, %v3185_v14 }
 0x305   : > { %4879 = vmatprep.mubr.msk.bf16.mxu1 %vm703_vm1, %v3187_v27 }
 0x309   : > { %4812 = vmatmul.mubr.msk.bf16.gmra.mrb[40].mxu0 %vm2262_vm10, %v6668_v52 }
 0x30a   : > { %4815 = vmatprep.mubr.msk.bf16.mxu0 %vm2262_vm10, %v6665_v37 }
 0x30c   : > { %4880 = vmatmul.mubr.msk.bf16.gmra.mrb[72].mxu1 %vm703_vm1, %v3189_v11 }
 0x30d   : > { %4883 = vmatprep.mubr.msk.bf16.mxu1 %vm703_vm1, %v3191_v39 }
 0x311   : > { %4816 = vmatmul.mubr.msk.bf16.gmra.mrb[44].mxu0 %vm2262_vm10, %v6686_v57 }
 0x312   : > { %4819 = vmatprep.mubr.msk.bf16.mxu0 %vm2262_vm10, %v6683_v15 }
 0x314   : > { %4884 = vmatmul.mubr.msk.bf16.gmra.mrb[76].mxu1 %vm703_vm1, %v3193_v53 }
 0x315   : > { %4887 = vmatprep.mubr.msk.bf16.mxu1 %vm703_vm1, %v3195_v41 }
 0x319   : > { %4820 = vmatmul.mubr.msk.bf16.gmra.mrb[48].mxu0 %vm2262_vm10, %v6704_v16 }
 0x31a   : > { %4825 = vmatprep.mubr.msk.bf16.mxu0 %vm2262_vm10, %v6566_v48  ;;  %v6811_v48 = vld [vmem:[%s7273_s8] ss:$0 sm:$0xff] }
 0x31c   : > { %4888 = vmatmul.mubr.msk.bf16.gmra.mrb[80].mxu1 %vm703_vm1, %v3197_v40 }
 0x321   : > { %4826 = vmatmul.mubr.msk.bf16.vlgmr.msra.gmra.mrb[20].mxu0 %vm2262_vm10, %v6581_v7 }
 0x322   : > { %4829 = vmatprep.mubr.msk.bf16.mxu0 %vm2262_vm10, %v6594_v63 }
 0x329   : > { %4830 = vmatmul.mubr.msk.bf16.gmra.mrb[24].mxu0 %vm2262_vm10, %v6607_v26 }
 0x32a   : > { %4833 = vmatprep.mubr.msk.bf16.mxu0 %vm2262_vm10, %v6616_v24 }
 0x331   : > { %4834 = vmatmul.mubr.msk.bf16.gmra.mrb[28].mxu0 %vm2262_vm10, %v6625_v56 }
 0x332   : > { %4837 = vmatprep.mubr.msk.bf16.mxu0 %vm2262_vm10, %v6634_v29 }
 0x339   : > { %4838 = vmatmul.mubr.msk.bf16.gmra.mrb[32].mxu0 %vm2262_vm10, %v6650_v43 }
 0x33a   : > { %4841 = vmatprep.mubr.msk.bf16.mxu0 %vm2262_vm10, %v6647_v44 }
 0x341   : > { %4842 = vmatmul.mubr.msk.bf16.gmra.mrb[36].mxu0 %vm2262_vm10, %v6668_v52 }
 0x342   : > { %4845 = vmatprep.mubr.msk.bf16.mxu0 %vm2262_vm10, %v6665_v37 }
 0x349   : > { %4846 = vmatmul.mubr.msk.bf16.gmra.mrb[40].mxu0 %vm2262_vm10, %v6686_v57 }
 0x34a   : > { %4849 = vmatprep.mubr.msk.bf16.mxu0 %vm2262_vm10, %v6683_v15 }
 0x351   : > { %4850 = vmatmul.mubr.msk.bf16.gmra.mrb[44].mxu0 %vm2262_vm10, %v6704_v16 }
 0x352   : > { %4853 = vmatprep.mubr.msk.bf16.mxu0 %vm2262_vm10, %v6701_v30 }
 0x359   : > { %4854 = vmatmul.mubr.msk.bf16.gmra.mrb[48].mxu0 %vm2262_vm10, %v6727_v33 }
 0x3f4   : > { %v4827_v7 = vpop.f32.mrb[20].mxu0 }
 0x3f5   : > { %v6814_v63 = vadd.f32 %v4827_v7, %v6811_v48  ;;  %v2678_v26 = vpop.f32.mrb[21].mxu0 }
 0x3f6   : > { %v6817_v24 = vadd.f32 %v6811_v48, %v2678_v26  ;;  %v4828_v56 = vpop.f32.mrb[22].mxu0 }
 0x3f7   : > { %v4383_v29 = vmul.f32 -1.442695, %v6814_v63  ;;  %v6821_v44 = vadd.f32 %v4828_v56, %v6811_v48  ;;  %v2681_v43 = vpop.f32.mrb[23].mxu0 }
 0x3f8   : > { %v4381_v25 = vmul.f32 -1.442695, %v6817_v24  ;;  %v6825_v9 = vadd.f32 %v6811_v48, %v2681_v43 }
 0x3f9   : > { %5369 = vpow2.f32 %v4383_v29  ;;  %v4384_v10 = vmul.f32 -1.442695, %v6821_v44 }
 0x3fa   : > { %5371 = vpow2.f32 %v4381_v25  ;;  %v4382_v51 = vmul.f32 -1.442695, %v6825_v9 }
 0x3fb   : > { %5373 = vpow2.f32 %v4384_v10 }
 0x3fc   : > { %5375 = vpow2.f32 %v4382_v51  ;;  %v4831_v37 = vpop.f32.mrb[24].mxu0 }
 0x3fd   : > { %v6830_v52 = vadd.f32 %v4831_v37, %v6811_v48  ;;  %v2694_v45 = vpop.f32.mrb[25].mxu0 }
 0x3fe   : > { %v6833_v59 = vadd.f32 %v6811_v48, %v2694_v45  ;;  %v4832_v34 = vpop.f32.mrb[26].mxu0  ;;  %v7362_v45 = vld [vmem:[#allocation5_spill] sm:$0xff] }
 0x3ff   : > { %v4387_v50 = vmul.f32 -1.442695, %v6830_v52  ;;  %v6837_v8 = vadd.f32 %v4832_v34, %v6811_v48  ;;  %v2697_v36 = vpop.f32.mrb[27].mxu0 }
 0x400   : > { %v4385_v61 = vmul.f32 -1.442695, %v6833_v59  ;;  %v6841_v22 = vadd.f32 %v6811_v48, %v2697_v36 }
 0x401   : > { %5377 = vpow2.f32 %v4387_v50  ;;  %v4388_v15 = vmul.f32 -1.442695, %v6837_v8 }
 0x402   : > { %5379 = vpow2.f32 %v4385_v61  ;;  %v4386_v57 = vmul.f32 -1.442695, %v6841_v22  ;;  %v7363_v61 = vld [vmem:[#allocation2_spill] sm:$0xff] }
 0x403   : > { %v5370_v58 = vpop.eup %5369  ;;  %5381 = vpow2.f32 %v4388_v15 }
 0x404   : > { %v5372_v31 = vpop.eup %5371  ;;  %v2974_v2 = vadd.f32 1.0, %v5370_v58  ;;  %5383 = vpow2.f32 %v4386_v57  ;;  %v4835_v35 = vpop.f32.mrb[28].mxu0 }
 0x405   : > { %v5374_v12 = vpop.eup %5373  ;;  %v2972_v55 = vadd.f32 1.0, %v5372_v31  ;;  %v6846_v28 = vadd.f32 %v4835_v35, %v6811_v48  ;;  %v2710_v1 = vpop.f32.mrb[29].mxu0  ;;  %v7365_v35 = vld [vmem:[#allocation4_spill] sm:$0xff] }
 0x406   : > { %v5376_v30 = vpop.eup %5375  ;;  %5385 = vrcp.f32 %v2974_v2  ;;  %v2975_v16 = vadd.f32 1.0, %v5374_v12  ;;  %v6849_v54 = vadd.f32 %v6811_v48, %v2710_v1  ;;  %v4836_v18 = vpop.f32.mrb[30].mxu0  ;;  %v7364_v2 = vld [vmem:[#allocation3_spill] sm:$0xff] }
 0x407   : > { %5387 = vrcp.f32 %v2972_v55  ;;  %v2973_v42 = vadd.f32 1.0, %v5376_v30  ;;  %v4391_v13 = vmul.f32 -1.442695, %v6846_v28  ;;  %v6853_v23 = vadd.f32 %v4836_v18, %v6811_v48  ;;  %v2713_v60 = vpop.f32.mrb[31].mxu0 }
 0x408   : > { %5389 = vrcp.f32 %v2975_v16  ;;  %v4389_v17 = vmul.f32 -1.442695, %v6849_v54  ;;  %v6857_v46 = vadd.f32 %v6811_v48, %v2713_v60 }
 0x409   : > { %5391 = vrcp.f32 %v2973_v42  ;;  %v4392_v20 = vmul.f32 -1.442695, %v6853_v23 }
 0x40a   : > { %5393 = vpow2.f32 %v4391_v13  ;;  %v4390_v3 = vmul.f32 -1.442695, %v6857_v46 }
 0x40b   : > { %v5378_v6 = vpop.eup %5377  ;;  %5395 = vpow2.f32 %v4389_v17 }
 0x40c   : > { %v5380_v33 = vpop.eup %5379  ;;  %v2978_v4 = vadd.f32 1.0, %v5378_v6  ;;  %5397 = vpow2.f32 %v4392_v20  ;;  %v4839_v49 = vpop.f32.mrb[32].mxu0 }
 0x40d   : > { %v5382_v47 = vpop.eup %5381  ;;  %v2976_v62 = vadd.f32 1.0, %v5380_v33  ;;  %5399 = vpow2.f32 %v4390_v3  ;;  %v6862_v19 = vadd.f32 %v4839_v49, %v6811_v48  ;;  %v2726_v38 = vpop.f32.mrb[33].mxu0 }
 0x40e   : > { %v5384_v32 = vpop.eup %5383  ;;  %5401 = vrcp.f32 %v2978_v4  ;;  %v2979_v21 = vadd.f32 1.0, %v5382_v47  ;;  %v6865_v0 = vadd.f32 %v6811_v48, %v2726_v38  ;;  %v4840_v5 = vpop.f32.mrb[34].mxu0 }
 0x40f   : > { %5403 = vrcp.f32 %v2976_v62  ;;  %v2977_v14 = vadd.f32 1.0, %v5384_v32  ;;  %v4395_v27 = vmul.f32 -1.442695, %v6862_v19  ;;  %v6869_v11 = vadd.f32 %v4840_v5, %v6811_v48  ;;  %v2729_v39 = vpop.f32.mrb[35].mxu0  ;;  %v7366_v32 = vld [vmem:[#allocation9_spill] sm:$0xff] }
 0x410   : > { %v5386_v53 = vpop.eup %5385  ;;  %5405 = vrcp.f32 %v2979_v21  ;;  %v4393_v41 = vmul.f32 -1.442695, %v6865_v0  ;;  %v6873_v40 = vadd.f32 %v6811_v48, %v2729_v39 }
 0x411   : > { %v5388_v7 = vpop.eup %5387  ;;  %v3070_v26 = vmul.f32 %v5386_v53, %v6814_v63  ;;  %5407 = vrcp.f32 %v2977_v14  ;;  %v4396_v56 = vmul.f32 -1.442695, %v6869_v11 }
 0x412   : > { %v5390_v29 = vpop.eup %5389  ;;  %v3068_v43 = vmul.f32 %v5388_v7, %v6817_v24  ;;  %5409 = vpow2.f32 %v4395_v27  ;;  %v4394_v25 = vmul.f32 -1.442695, %v6873_v40  ;;  %v7367_v27 = vld [vmem:[#allocation7_spill] sm:$0xff] }
 0x413   : > { %v5392_v10 = vpop.eup %5391  ;;  %v3071_v51 = vmul.f32 %v5390_v29, %v6821_v44  ;;  %5411 = vpow2.f32 %v4393_v41  ;;  %v3102_v34 = vadd.f32 %v3070_v26, %v7362_v45  ;;  %v7368_v26 = vld [vmem:[#allocation6_spill] sm:$0xff] }
 0x414   : > { %v5394_v37 = vpop.eup %5393  ;;  %v3069_v50 = vmul.f32 %v5392_v10, %v6825_v9  ;;  %5413 = vpow2.f32 %v4396_v56  ;;  %v4843_v63 = vpop.f32.mrb[36].mxu0  ;;  %v3100_v44 = vadd.f32 %v3068_v43, %v7364_v2  ;;  %v7369_v10 = vld [vmem:[#allocation8_spill] sm:$0xff] }
 0x415   : > { %v5396_v36 = vpop.eup %5395  ;;  %v3103_v15 = vadd.f32 %v3071_v51, %v7363_v61  ;;  %v2982_v57 = vadd.f32 1.0, %v5394_v37  ;;  %5415 = vpow2.f32 %v4394_v25  ;;  %v6884_v24 = vadd.f32 %v4843_v63, %v6811_v48  ;;  %v2742_v58 = vpop.f32.mrb[37].mxu0 }
 0x416   : > { %v5398_v31 = vpop.eup %5397  ;;  %v3101_v12 = vadd.f32 %v3069_v50, %v7365_v35  ;;  %v2980_v55 = vadd.f32 1.0, %v5396_v36  ;;  %v6889_v1 = vadd.f32 %v6811_v48, %v2742_v58  ;;  %v4844_v9 = vpop.f32.mrb[38].mxu0 }
 0x417   : > { %v5400_v30 = vpop.eup %5399  ;;  %v3133_v16 = vpack.c.bf16 %v3103_v15, %v3102_v34  ;;  %5417 = vrcp.f32 %v2982_v57  ;;  %v2983_v18 = vadd.f32 1.0, %v5398_v31  ;;  %v4399_v42 = vmul.f32 -1.442695, %v6884_v24  ;;  %v2745_v13 = vpop.f32.mrb[39].mxu0 }
 0x418   : > { %v5402_v60 = vpop.eup %5401  ;;  %v3132_v17 = vpack.c.bf16 %v3101_v12, %v3100_v44  ;;  %5419 = vrcp.f32 %v2980_v55  ;;  %v2981_v20 = vadd.f32 1.0, %v5400_v30  ;;  %v4397_v3 = vmul.f32 -1.442695, %v6889_v1 }
 0x419   : > { %v5404_v6 = vpop.eup %5403  ;;  %v3074_v33 = vmul.f32 %v5402_v60, %v6830_v52  ;;  %5421 = vrcp.f32 %v2983_v18  ;;  %v6895_v4 = vadd.f32 %v4844_v9, %v6811_v48  ;;  %v6898_v49 = vadd.f32 %v6811_v48, %v2745_v13 }
 0x41a   : > { %v5406_v47 = vpop.eup %5405  ;;  %v3072_v62 = vmul.f32 %v5404_v6, %v6833_v59  ;;  %5423 = vrcp.f32 %v2981_v20  ;;  %4893 = vmatprep.mubr.msk.bf16.mxu1 %vm703_vm1, %v3132_v17 }
 0x41b   : > { %v5408_v38 = vpop.eup %5407  ;;  %v3106_v21 = vadd.f32 %v3074_v33, %v7366_v32  ;;  %v3075_v5 = vmul.f32 %v5406_v47, %v6837_v8  ;;  %5425 = vpow2.f32 %v4399_v42  ;;  %v4400_v52 = vmul.f32 -1.442695, %v6895_v4  ;;  %4894 = vmatmul.mubr.msk.bf16.vlgmr.msra.gmra.mrb[52].mxu1 %vm703_vm1, %v3133_v16  ;;  %v7371_v33 = vld [vmem:[#allocation10_spill] sm:$0xff] }
 0x41c   : > { %v5410_v14 = vpop.eup %5409  ;;  %v3104_v39 = vadd.f32 %v3072_v62, %v7367_v27  ;;  %v3073_v53 = vmul.f32 %v5408_v38, %v6841_v22  ;;  %5427 = vpow2.f32 %v4397_v3  ;;  %v4398_v59 = vmul.f32 -1.442695, %v6898_v49  ;;  %v4847_v41 = vpop.f32.mrb[40].mxu0 }
 0x41d   : > { %v5412_v7 = vpop.eup %5411  ;;  %v3107_v56 = vadd.f32 %v3075_v5, %v7368_v26  ;;  %v2986_v29 = vadd.f32 1.0, %v5410_v14  ;;  %5429 = vpow2.f32 %v4400_v52  ;;  %v6911_v8 = vadd.f32 %v4847_v41, %v6811_v48  ;;  %v2758_v43 = vpop.f32.mrb[41].mxu0  ;;  %v7373_v52 = vld [vmem:[#allocation12_spill] sm:$0xff] }
 0x41e   : > { %v5414_v25 = vpop.eup %5413  ;;  %v3105_v51 = vadd.f32 %v3073_v53, %v7369_v10  ;;  %v2984_v37 = vadd.f32 1.0, %v5412_v7  ;;  %5431 = vpow2.f32 %v4398_v59  ;;  %v6915_v22 = vadd.f32 %v6811_v48, %v2758_v43  ;;  %v4848_v45 = vpop.f32.mrb[42].mxu0 }
 0x41f   : > { %v5416_v34 = vpop.eup %5415  ;;  %v3135_v50 = vpack.c.bf16 %v3107_v56, %v3106_v21  ;;  %5433 = vrcp.f32 %v2986_v29  ;;  %v2987_v63 = vadd.f32 1.0, %v5414_v25  ;;  %v4403_v36 = vmul.f32 -1.442695, %v6911_v8  ;;  %v2761_v61 = vpop.f32.mrb[43].mxu0  ;;  %v7372_v21 = vld [vmem:[#allocation11_spill] sm:$0xff] }
 0x420   : > { %v3134_v15 = vpack.c.bf16 %v3105_v51, %v3104_v39  ;;  %5435 = vrcp.f32 %v2984_v37  ;;  %v2985_v57 = vadd.f32 1.0, %v5416_v34  ;;  %v4401_v58 = vmul.f32 -1.442695, %v6915_v22 }
 0x421   : > { %v5418_v31 = vpop.eup %5417  ;;  %5437 = vrcp.f32 %v2987_v63  ;;  %v6920_v2 = vadd.f32 %v4848_v45, %v6811_v48  ;;  %v6923_v44 = vadd.f32 %v6811_v48, %v2761_v61  ;;  %v7374_v63 = vld [vmem:[#allocation19_spill] sm:$0xff] }
 0x422   : > { %v5420_v35 = vpop.eup %5419  ;;  %v3078_v12 = vmul.f32 %v5418_v31, %v6846_v28  ;;  %5439 = vrcp.f32 %v2985_v57  ;;  %4897 = vmatprep.mubr.msk.bf16.mxu1 %vm703_vm1, %v3134_v15  ;;  %v7370_v28 = vld [vmem:[#allocation13_spill] sm:$0xff] }
 0x423   : > { %v5422_v55 = vpop.eup %5421  ;;  %v3076_v9 = vmul.f32 %v5420_v35, %v6849_v54  ;;  %5441 = vpow2.f32 %v4403_v36  ;;  %v4404_v30 = vmul.f32 -1.442695, %v6920_v2  ;;  %v4402_v16 = vmul.f32 -1.442695, %v6923_v44  ;;  %4898 = vmatmul.mubr.msk.bf16.gmra.mrb[56].mxu1 %vm703_vm1, %v3135_v50 }
 0x424   : > { %v5424_v18 = vpop.eup %5423  ;;  %v3079_v42 = vmul.f32 %v5422_v55, %v6853_v23  ;;  %5443 = vpow2.f32 %v4401_v58  ;;  %v4851_v13 = vpop.f32.mrb[44].mxu0  ;;  %v3110_v17 = vadd.f32 %v3078_v12, %v7370_v28  ;;  %v7375_v58 = vld [vmem:[#allocation17_spill] sm:$0xff] }
 0x425   : > { %v5426_v60 = vpop.eup %5425  ;;  %v3077_v20 = vmul.f32 %v5424_v18, %v6857_v46  ;;  %5445 = vpow2.f32 %v4404_v30  ;;  %v6935_v54 = vadd.f32 %v4851_v13, %v6811_v48  ;;  %v2774_v3 = vpop.f32.mrb[45].mxu0  ;;  %v3108_v5 = vadd.f32 %v3076_v9, %v7372_v21  ;;  %v7376_v9 = vld [vmem:[#allocation15_spill] sm:$0xff]  ;;  %v7377_v13 = vld [vmem:[#allocation18_spill] sm:$0xff] }
 0x426   : > { %v5428_v6 = vpop.eup %5427  ;;  %v3111_v47 = vadd.f32 %v3079_v42, %v7371_v33  ;;  %v2990_v62 = vadd.f32 1.0, %v5426_v60  ;;  %5447 = vpow2.f32 %v4402_v16  ;;  %v6939_v38 = vadd.f32 %v6811_v48, %v2774_v3  ;;  %v4852_v23 = vpop.f32.mrb[46].mxu0 }
 0x427   : > { %v5430_v32 = vpop.eup %5429  ;;  %v3109_v14 = vadd.f32 %v3077_v20, %v7373_v52  ;;  %v2988_v46 = vadd.f32 1.0, %v5428_v6  ;;  %v6944_v27 = vadd.f32 %v4852_v23, %v6811_v48  ;;  %v2777_v39 = vpop.f32.mrb[47].mxu0  ;;  %v4407_v7 = vmul.f32 -1.442695, %v6935_v54 }
 0x428   : > { %v5432_v53 = vpop.eup %5431  ;;  %v3137_v59 = vpack.c.bf16 %v3111_v47, %v3110_v17  ;;  %5449 = vrcp.f32 %v2990_v62  ;;  %v2991_v41 = vadd.f32 1.0, %v5430_v32  ;;  %v4405_v43 = vmul.f32 -1.442695, %v6939_v38 }
 0x429   : > { %v5434_v26 = vpop.eup %5433  ;;  %v3136_v56 = vpack.c.bf16 %v3109_v14, %v3108_v5  ;;  %5451 = vrcp.f32 %v2988_v46  ;;  %v2989_v29 = vadd.f32 1.0, %v5432_v53  ;;  %v4408_v51 = vmul.f32 -1.442695, %v6944_v27 }
 0x42a   : > { %v5436_v25 = vpop.eup %5435  ;;  %v3082_v10 = vmul.f32 %v5434_v26, %v6862_v19  ;;  %5453 = vrcp.f32 %v2991_v41  ;;  %v6951_v37 = vadd.f32 %v6811_v48, %v2777_v39  ;;  %v7378_v26 = vld [vmem:[#allocation20_spill] sm:$0xff] }
 0x42b   : > { %v5438_v45 = vpop.eup %5437  ;;  %v3080_v34 = vmul.f32 %v5436_v25, %v6865_v0  ;;  %5455 = vrcp.f32 %v2989_v29  ;;  %4901 = vmatprep.mubr.msk.bf16.mxu1 %vm703_vm1, %v3136_v56  ;;  %v7379_v29 = vld [vmem:[#allocation21_spill] sm:$0xff] }
 0x42c   : > { %v5440_v50 = vpop.eup %5439  ;;  %v3114_v36 = vadd.f32 %v3082_v10, %v7374_v63  ;;  %v3083_v61 = vmul.f32 %v5438_v45, %v6869_v11  ;;  %5457 = vpow2.f32 %v4407_v7  ;;  %v4406_v19 = vmul.f32 -1.442695, %v6951_v37  ;;  %4902 = vmatmul.mubr.msk.bf16.gmra.mrb[60].mxu1 %vm703_vm1, %v3137_v59  ;;  %v4855_v15 = vpop.f32.mrb[48].mxu0  ;;  %v7380_v10 = vld [vmem:[#allocation14_spill] sm:$0xff]  ;;  %v7381_v45 = vld [vmem:[#allocation16_spill] sm:$0xff] }
 0x42d   : > { %v5442_v57 = vpop.eup %5441  ;;  %v3112_v31 = vadd.f32 %v3080_v34, %v7375_v58  ;;  %v3081_v35 = vmul.f32 %v5440_v50, %v6873_v40  ;;  %5459 = vpow2.f32 %v4405_v43  ;;  %v6962_v0 = vadd.f32 %v4855_v15, %v6811_v48  ;;  %v2790_v12 = vpop.f32.mrb[49].mxu0 }
 0x42e   : > { %v5444_v55 = vpop.eup %5443  ;;  %v3115_v30 = vadd.f32 %v3083_v61, %v7376_v9  ;;  %v2994_v11 = vadd.f32 1.0, %v5442_v57  ;;  %5461 = vpow2.f32 %v4408_v51  ;;  %v6966_v16 = vadd.f32 %v6811_v48, %v2790_v12  ;;  %v4856_v18 = vpop.f32.mrb[50].mxu0 }
 0x42f   : > { %v5446_v42 = vpop.eup %5445  ;;  %v3113_v60 = vadd.f32 %v3081_v35, %v7377_v13  ;;  %v2992_v28 = vadd.f32 1.0, %v5444_v55  ;;  %5463 = vpow2.f32 %v4406_v19  ;;  %v4411_v40 = vmul.f32 -1.442695, %v6962_v0  ;;  %v2793_v17 = vpop.f32.mrb[51].mxu0 }
 0x430   : > { %v5448_v20 = vpop.eup %5447  ;;  %v3139_v3 = vpack.c.bf16 %v3115_v30, %v3114_v36  ;;  %5465 = vrcp.f32 %v2994_v11  ;;  %v2995_v6 = vadd.f32 1.0, %v5446_v42  ;;  %v4409_v33 = vmul.f32 -1.442695, %v6966_v16  ;;  %v7382_v11 = vld [vmem:[#allocation24_spill] sm:$0xff]  ;;  %v7383_v42 = vld [vmem:[#allocation25_spill] sm:$0xff] }
 0x431   : > { %v3138_v47 = vpack.c.bf16 %v3113_v60, %v3112_v31  ;;  %5467 = vrcp.f32 %v2992_v28  ;;  %v2993_v62 = vadd.f32 1.0, %v5448_v20  ;;  %v6972_v23 = vadd.f32 %v4856_v18, %v6811_v48  ;;  %v7384_v28 = vld [vmem:[#allocation22_spill] sm:$0xff] }
 0x432   : > { %v5450_v32 = vpop.eup %5449  ;;  %5469 = vrcp.f32 %v2995_v6  ;;  %v6975_v21 = vadd.f32 %v6811_v48, %v2793_v17 }
 0x433   : > { %v5452_v5 = vpop.eup %5451  ;;  %v3086_v52 = vmul.f32 %v5450_v32, %v6884_v24  ;;  %5471 = vrcp.f32 %v2993_v62  ;;  %v4412_v14 = vmul.f32 -1.442695, %v6972_v23  ;;  %4905 = vmatprep.mubr.msk.bf16.mxu1 %vm703_vm1, %v3138_v47 }
 0x434   : > { %v5454_v46 = vpop.eup %5453  ;;  %v3084_v39 = vmul.f32 %v5452_v5, %v6889_v1  ;;  %5473 = vpow2.f32 %v4411_v40  ;;  %v4410_v53 = vmul.f32 -1.442695, %v6975_v21  ;;  %4906 = vmatmul.mubr.msk.bf16.gmra.mrb[64].mxu1 %vm703_vm1, %v3139_v3  ;;  %v7385_v40 = vld [vmem:[#allocation23_spill] sm:$0xff] }
 0x435   : > { %v5456_v59 = vpop.eup %5455  ;;  %v3087_v48 = vmul.f32 %v5454_v46, %v6895_v4  ;;  %5475 = vpow2.f32 %v4409_v33  ;;  %v3118_v56 = vadd.f32 %v3086_v52, %v7378_v26 }
 0x436   : > { %v5458_v41 = vpop.eup %5457  ;;  %v3085_v24 = vmul.f32 %v5456_v59, %v6898_v49  ;;  %5477 = vpow2.f32 %v4412_v14  ;;  %v3116_v51 = vadd.f32 %v3084_v39, %v7380_v10 }
 0x437   : > { %v5460_v7 = vpop.eup %5459  ;;  %v3119_v43 = vadd.f32 %v3087_v48, %v7379_v29  ;;  %v2998_v25 = vadd.f32 1.0, %v5458_v41  ;;  %5479 = vpow2.f32 %v4410_v53  ;;  %v7386_v53 = vld [vmem:[#allocation29_spill] sm:$0xff]  ;;  %v7387_v48 = vld [vmem:[#allocation30_spill] sm:$0xff] }
 0x438   : > { %v5462_v1 = vpop.eup %5461  ;;  %v3117_v34 = vadd.f32 %v3085_v24, %v7381_v45  ;;  %v2996_v50 = vadd.f32 1.0, %v5460_v7  ;;  %v7388_v24 = vld [vmem:[#allocation26_spill] sm:$0xff]  ;;  %v7390_v45 = vld [vmem:[#allocation35_spill] sm:$0xff] }
 0x439   : > { %v5464_v63 = vpop.eup %5463  ;;  %v3141_v4 = vpack.c.bf16 %v3119_v43, %v3118_v56  ;;  %5481 = vrcp.f32 %v2998_v25  ;;  %v2999_v36 = vadd.f32 1.0, %v5462_v1 }
 0x43a   : > { %v5466_v61 = vpop.eup %5465  ;;  %v3140_v49 = vpack.c.bf16 %v3117_v34, %v3116_v51  ;;  %5483 = vrcp.f32 %v2996_v50  ;;  %v2997_v19 = vadd.f32 1.0, %v5464_v63  ;;  %v7391_v50 = vld [vmem:[#allocation36_spill] sm:$0xff] }
 0x43b   : > { %v5468_v15 = vpop.eup %5467  ;;  %v3090_v57 = vmul.f32 %v5466_v61, %v6911_v8  ;;  %5485 = vrcp.f32 %v2999_v36  ;;  %v7393_v61 = vld [vmem:[#allocation32_spill] sm:$0xff] }
 0x43c   : > { %v5470_v58 = vpop.eup %5469  ;;  %v3088_v31 = vmul.f32 %v5468_v15, %v6915_v22  ;;  %5487 = vrcp.f32 %v2997_v19  ;;  %4909 = vmatprep.mubr.msk.bf16.mxu1 %vm703_vm1, %v3140_v49 }
 0x43d   : > { %v5472_v35 = vpop.eup %5471  ;;  %v3091_v12 = vmul.f32 %v5470_v58, %v6920_v2  ;;  %4910 = vmatmul.mubr.msk.bf16.gmra.mrb[68].mxu1 %vm703_vm1, %v3141_v4  ;;  %v3122_v18 = vadd.f32 %v3090_v57, %v7382_v11  ;;  %v7392_v4 = vld [vmem:[#allocation31_spill] sm:$0xff] }
 0x43e   : > { %v5474_v55 = vpop.eup %5473  ;;  %v3089_v9 = vmul.f32 %v5472_v35, %v6923_v44  ;;  %v3120_v22 = vadd.f32 %v3088_v31, %v7384_v28 }
 0x43f   : > { %v5476_v30 = vpop.eup %5475  ;;  %v3123_v8 = vadd.f32 %v3091_v12, %v7383_v42  ;;  %v3002_v13 = vadd.f32 1.0, %v5474_v55 }
 0x440   : > { %v5478_v60 = vpop.eup %5477  ;;  %v3121_v17 = vadd.f32 %v3089_v9, %v7385_v40  ;;  %v3000_v20 = vadd.f32 1.0, %v5476_v30 }
 0x441   : > { %v5480_v3 = vpop.eup %5479  ;;  %v3143_v6 = vpack.c.bf16 %v3123_v8, %v3122_v18  ;;  %5489 = vrcp.f32 %v3002_v13  ;;  %v3003_v2 = vadd.f32 1.0, %v5478_v60 }
 0x442   : > { %v3142_v33 = vpack.c.bf16 %v3121_v17, %v3120_v22  ;;  %5491 = vrcp.f32 %v3000_v20  ;;  %v3001_v47 = vadd.f32 1.0, %v5480_v3 }
 0x443   : > { %v5482_v44 = vpop.eup %5481  ;;  %5493 = vrcp.f32 %v3003_v2 }
 0x444   : > { %v5484_v62 = vpop.eup %5483  ;;  %v3094_v32 = vmul.f32 %v5482_v44, %v6935_v54  ;;  %5495 = vrcp.f32 %v3001_v47  ;;  %4913 = vmatprep.mubr.msk.bf16.mxu1 %vm703_vm1, %v3142_v33  ;;  %v7389_v54 = vld [vmem:[#allocation27_spill] sm:$0xff] }
 0x445   : > { %v5486_v5 = vpop.eup %5485  ;;  %v3092_v52 = vmul.f32 %v5484_v62, %v6939_v38  ;;  %4914 = vmatmul.mubr.msk.bf16.gmra.mrb[72].mxu1 %vm703_vm1, %v3143_v6 }
 0x446   : > { %v5488_v14 = vpop.eup %5487  ;;  %v3095_v46 = vmul.f32 %v5486_v5, %v6944_v27  ;;  %v3126_v59 = vadd.f32 %v3094_v32, %v7386_v53 }
 0x447   : > { %v3093_v39 = vmul.f32 %v5488_v14, %v6951_v37  ;;  %v3124_v7 = vadd.f32 %v3092_v52, %v7388_v24 }
 0x448   : > { %v3127_v41 = vadd.f32 %v3095_v46, %v7387_v48 }
 0x449   : > { %v3125_v26 = vadd.f32 %v3093_v39, %v7389_v54 }
 0x44a   : > { %v3145_v56 = vpack.c.bf16 %v3127_v41, %v3126_v59 }
 0x44b   : > { %v5490_v29 = vpop.eup %5489  ;;  %v3144_v43 = vpack.c.bf16 %v3125_v26, %v3124_v7 }
 0x44c   : > { %v5492_v25 = vpop.eup %5491  ;;  %v3098_v38 = vmul.f32 %v5490_v29, %v6962_v0 }
 0x44d   : > { %v5494_v1 = vpop.eup %5493  ;;  %v3096_v10 = vmul.f32 %v5492_v25, %v6966_v16  ;;  %4917 = vmatprep.mubr.msk.bf16.mxu1 %vm703_vm1, %v3144_v43  ;;  %v7024_v16 = vld [vmem:[%s7276_s11] ss:$0 sm:$0xff] }
 0x44e   : > { %v5496_v27 = vpop.eup %5495  ;;  %v3099_v37 = vmul.f32 %v5494_v1, %v6972_v23  ;;  %4918 = vmatmul.mubr.msk.bf16.gmra.mrb[76].mxu1 %vm703_vm1, %v3145_v56  ;;  %v3130_v34 = vadd.f32 %v3098_v38, %v7390_v45 }
 0x44f   : > { %v3097_v51 = vmul.f32 %v5496_v27, %v6975_v21  ;;  %v3128_v36 = vadd.f32 %v3096_v10, %v7392_v4 }
 0x450   : > { %v3131_v63 = vadd.f32 %v3099_v37, %v7391_v50 }
 0x451   : > { %v3129_v0 = vadd.f32 %v3097_v51, %v7393_v61 }
 0x452   : > { %v3147_v49 = vpack.c.bf16 %v3131_v63, %v3130_v34 }
 0x453   : > { %v3146_v19 = vpack.c.bf16 %v3129_v0, %v3128_v36 }
 0x455   : > { %4921 = vmatprep.mubr.msk.bf16.mxu1 %vm703_vm1, %v3146_v19 }
 0x456   : > { %4922 = vmatmul.mubr.msk.bf16.gmra.mrb[80].mxu1 %vm703_vm1, %v3147_v49 }
 0x4ee   : > { %v4895_v23 = vpop.f32.mrb[52].mxu1 }
 0x4ef   : > { %v7027_v21 = vadd.f32 %v4895_v23, %v7024_v16  ;;  %v3495_v15 = vpop.f32.mrb[53].mxu1 }
 0x4f0   : > { %v7030_v57 = vadd.f32 %v7024_v16, %v3495_v15  ;;  %v4896_v58 = vpop.f32.mrb[54].mxu1 }
 0x4f1   : > { %v4448_v31 = vmul.f32 -1.442695, %v7027_v21  ;;  %v7034_v35 = vadd.f32 %v4896_v58, %v7024_v16  ;;  %v3498_v12 = vpop.f32.mrb[55].mxu1 }
 0x4f2   : > { %v4446_v55 = vmul.f32 -1.442695, %v7030_v57  ;;  %v7038_v9 = vadd.f32 %v7024_v16, %v3498_v12 }
 0x4f3   : > { %5497 = vpow2.f32 %v4448_v31  ;;  %v4449_v30 = vmul.f32 -1.442695, %v7034_v35 }
 0x4f4   : > { %5499 = vpow2.f32 %v4446_v55  ;;  %v4447_v11 = vmul.f32 -1.442695, %v7038_v9 }
 0x4f5   : > { %5501 = vpow2.f32 %v4449_v30 }
 0x4f6   : > { %5503 = vpow2.f32 %v4447_v11  ;;  %v4899_v18 = vpop.f32.mrb[56].mxu1 }
 0x4f7   : > { %v7043_v42 = vadd.f32 %v4899_v18, %v7024_v16  ;;  %v3511_v8 = vpop.f32.mrb[57].mxu1 }
 0x4f8   : > { %v7046_v13 = vadd.f32 %v7024_v16, %v3511_v8  ;;  %v4900_v60 = vpop.f32.mrb[58].mxu1 }
 0x4f9   : > { %v4452_v28 = vmul.f32 -1.442695, %v7043_v42  ;;  %v7050_v22 = vadd.f32 %v4900_v60, %v7024_v16  ;;  %v3514_v40 = vpop.f32.mrb[59].mxu1 }
 0x4fa   : > { %v4450_v17 = vmul.f32 -1.442695, %v7046_v13  ;;  %v7054_v20 = vadd.f32 %v7024_v16, %v3514_v40 }
 0x4fb   : > { %5505 = vpow2.f32 %v4452_v28  ;;  %v4453_v3 = vmul.f32 -1.442695, %v7050_v22 }
 0x4fc   : > { %5507 = vpow2.f32 %v4450_v17  ;;  %v4451_v6 = vmul.f32 -1.442695, %v7054_v20 }
 0x4fd   : > { %v5498_v2 = vpop.eup %5497  ;;  %5509 = vpow2.f32 %v4453_v3 }
 0x4fe   : > { %v5500_v33 = vpop.eup %5499  ;;  %v3759_v47 = vadd.f32 1.0, %v5498_v2  ;;  %5511 = vpow2.f32 %v4451_v6 }
 0x4ff   : > { %v5502_v44 = vpop.eup %5501  ;;  %v3757_v62 = vadd.f32 1.0, %v5500_v33  ;;  %v4903_v32 = vpop.f32.mrb[60].mxu1 }
 0x500   : > { %v5504_v5 = vpop.eup %5503  ;;  %5513 = vrcp.f32 %v3759_v47  ;;  %v3760_v52 = vadd.f32 1.0, %v5502_v44  ;;  %v7059_v14 = vadd.f32 %v4903_v32, %v7024_v16  ;;  %v3527_v46 = vpop.f32.mrb[61].mxu1 }
 0x501   : > { %5515 = vrcp.f32 %v3757_v62  ;;  %v3758_v39 = vadd.f32 1.0, %v5504_v5  ;;  %v7062_v53 = vadd.f32 %v7024_v16, %v3527_v46  ;;  %v4904_v59 = vpop.f32.mrb[62].mxu1 }
 0x502   : > { %5517 = vrcp.f32 %v3760_v52  ;;  %v4456_v48 = vmul.f32 -1.442695, %v7059_v14  ;;  %v7066_v41 = vadd.f32 %v4904_v59, %v7024_v16  ;;  %v3530_v24 = vpop.f32.mrb[63].mxu1 }
 0x503   : > { %5519 = vrcp.f32 %v3758_v39  ;;  %v4454_v7 = vmul.f32 -1.442695, %v7062_v53  ;;  %v7070_v54 = vadd.f32 %v7024_v16, %v3530_v24 }
 0x504   : > { %5521 = vpow2.f32 %v4456_v48  ;;  %v4457_v26 = vmul.f32 -1.442695, %v7066_v41 }
 0x505   : > { %v5506_v56 = vpop.eup %5505  ;;  %5523 = vpow2.f32 %v4454_v7  ;;  %v4455_v29 = vmul.f32 -1.442695, %v7070_v54 }
 0x506   : > { %v5508_v43 = vpop.eup %5507  ;;  %v3763_v25 = vadd.f32 1.0, %v5506_v56  ;;  %5525 = vpow2.f32 %v4457_v26 }
 0x507   : > { %v5510_v38 = vpop.eup %5509  ;;  %v3761_v1 = vadd.f32 1.0, %v5508_v43  ;;  %5527 = vpow2.f32 %v4455_v29  ;;  %v4907_v10 = vpop.f32.mrb[64].mxu1 }
 0x508   : > { %v5512_v27 = vpop.eup %5511  ;;  %5529 = vrcp.f32 %v3763_v25  ;;  %v3764_v37 = vadd.f32 1.0, %v5510_v38  ;;  %v7075_v51 = vadd.f32 %v4907_v10, %v7024_v16  ;;  %v3543_v45 = vpop.f32.mrb[65].mxu1 }
 0x509   : > { %5531 = vrcp.f32 %v3761_v1  ;;  %v3762_v34 = vadd.f32 1.0, %v5512_v27  ;;  %v7078_v50 = vadd.f32 %v7024_v16, %v3543_v45  ;;  %v4908_v63 = vpop.f32.mrb[66].mxu1 }
 0x50a   : > { %v5514_v4 = vpop.eup %5513  ;;  %5533 = vrcp.f32 %v3764_v37  ;;  %v4460_v36 = vmul.f32 -1.442695, %v7075_v51  ;;  %v7082_v61 = vadd.f32 %v4908_v63, %v7024_v16  ;;  %v3546_v0 = vpop.f32.mrb[67].mxu1 }
 0x50b   : > { %v5516_v49 = vpop.eup %5515  ;;  %v3855_v19 = vmul.f32 %v5514_v4, %v7027_v21  ;;  %5535 = vrcp.f32 %v3762_v34  ;;  %v4458_v23 = vmul.f32 -1.442695, %v7078_v50  ;;  %v7087_v15 = vadd.f32 %v7024_v16, %v3546_v0 }
 0x50c   : > { %v5518_v58 = vpop.eup %5517  ;;  %v3853_v31 = vmul.f32 %v5516_v49, %v7030_v57  ;;  %5537 = vpow2.f32 %v4460_v36  ;;  %v4461_v12 = vmul.f32 -1.442695, %v7082_v61 }
 0x50d   : > { %v5520_v21 = vpop.eup %5519  ;;  %v4519_v55 = vpack.c.bf16 %v3855_v19, %v3855_v19  ;;  %v3856_v30 = vmul.f32 %v5518_v58, %v7034_v35  ;;  %5539 = vpow2.f32 %v4458_v23  ;;  %v4459_v11 = vmul.f32 -1.442695, %v7087_v15 }
 0x50e   : > { %v5522_v18 = vpop.eup %5521  ;;  %v4517_v8 = vpack.c.bf16 %v3853_v31, %v3853_v31  ;;  %v3854_v60 = vmul.f32 %v5520_v21, %v7038_v9  ;;  %5541 = vpow2.f32 %v4461_v12 }
 0x50f   : > { %v5524_v28 = vpop.eup %5523  ;;  %4016 = vst.msk [vmem:[%s7093_s17 + $0x8] sm:$0xf] %vm4013_vm11, %v4519_v55  ;;  %v4520_v57 = vpack.c.bf16 %v3856_v30, %v3856_v30  ;;  %v3767_v40 = vadd.f32 1.0, %v5522_v18  ;;  %5543 = vpow2.f32 %v4459_v11 }
 0x510   : > { %v5526_v17 = vpop.eup %5525  ;;  %4014 = vst.msk [vmem:[%s7093_s17] sm:$0xf] %vm4013_vm11, %v4517_v8  ;;  %v4518_v35 = vpack.c.bf16 %v3854_v60, %v3854_v60  ;;  %v3765_v3 = vadd.f32 1.0, %v5524_v28  ;;  %v4911_v6 = vpop.f32.mrb[68].mxu1 }
 0x511   : > { %v5528_v2 = vpop.eup %5527  ;;  %4017 = vst.msk [vmem:[%s7093_s17 + $0xc] sm:$0xf] %vm4013_vm11, %v4520_v57  ;;  %5545 = vrcp.f32 %v3767_v40  ;;  %v3768_v33 = vadd.f32 1.0, %v5526_v17  ;;  %v7107_v9 = vadd.f32 %v4911_v6, %v7024_v16  ;;  %v3559_v47 = vpop.f32.mrb[69].mxu1 }
 0x512   : > { %v5530_v44 = vpop.eup %5529  ;;  %4015 = vst.msk [vmem:[%s7093_s17 + $0x4] sm:$0xf] %vm4013_vm11, %v4518_v35  ;;  %5547 = vrcp.f32 %v3765_v3  ;;  %v3766_v62 = vadd.f32 1.0, %v5528_v2  ;;  %v7112_v32 = vadd.f32 %v7024_v16, %v3559_v47  ;;  %v4912_v5 = vpop.f32.mrb[70].mxu1 }
 0x513   : > { %v5532_v52 = vpop.eup %5531  ;;  %v3859_v46 = vmul.f32 %v5530_v44, %v7043_v42  ;;  %5549 = vrcp.f32 %v3768_v33  ;;  %v4464_v39 = vmul.f32 -1.442695, %v7107_v9  ;;  %v7117_v59 = vadd.f32 %v4912_v5, %v7024_v16  ;;  %v3562_v48 = vpop.f32.mrb[71].mxu1 }
 0x514   : > { %v5534_v24 = vpop.eup %5533  ;;  %v3857_v7 = vmul.f32 %v5532_v52, %v7046_v13  ;;  %5551 = vrcp.f32 %v3766_v62  ;;  %v4462_v26 = vmul.f32 -1.442695, %v7112_v32  ;;  %v7122_v56 = vadd.f32 %v7024_v16, %v3562_v48 }
 0x515   : > { %v5536_v29 = vpop.eup %5535  ;;  %v4523_v42 = vpack.c.bf16 %v3859_v46, %v3859_v46  ;;  %v3860_v43 = vmul.f32 %v5534_v24, %v7050_v22  ;;  %5553 = vpow2.f32 %v4464_v39  ;;  %v4465_v25 = vmul.f32 -1.442695, %v7117_v59 }
 0x516   : > { %v5538_v38 = vpop.eup %5537  ;;  %v4521_v1 = vpack.c.bf16 %v3857_v7, %v3857_v7  ;;  %v3858_v10 = vmul.f32 %v5536_v29, %v7054_v20  ;;  %5555 = vpow2.f32 %v4462_v26  ;;  %v4463_v13 = vmul.f32 -1.442695, %v7122_v56 }
 0x517   : > { %v5540_v27 = vpop.eup %5539  ;;  %4020 = vst.msk [vmem:[%s7093_s17 + $0x18] sm:$0xf] %vm4013_vm11, %v4523_v42  ;;  %v4524_v37 = vpack.c.bf16 %v3860_v43, %v3860_v43  ;;  %v3771_v45 = vadd.f32 1.0, %v5538_v38  ;;  %5557 = vpow2.f32 %v4465_v25 }
 0x518   : > { %v5542_v34 = vpop.eup %5541  ;;  %4018 = vst.msk [vmem:[%s7093_s17 + $0x10] sm:$0xf] %vm4013_vm11, %v4521_v1  ;;  %v4522_v22 = vpack.c.bf16 %v3858_v10, %v3858_v10  ;;  %v3769_v63 = vadd.f32 1.0, %v5540_v27  ;;  %5559 = vpow2.f32 %v4463_v13  ;;  %v4915_v4 = vpop.f32.mrb[72].mxu1 }
 0x519   : > { %v5544_v36 = vpop.eup %5543  ;;  %4021 = vst.msk [vmem:[%s7093_s17 + $0x1c] sm:$0xf] %vm4013_vm11, %v4524_v37  ;;  %5561 = vrcp.f32 %v3771_v45  ;;  %v3772_v20 = vadd.f32 1.0, %v5542_v34  ;;  %v7135_v0 = vadd.f32 %v4915_v4, %v7024_v16  ;;  %v3575_v49 = vpop.f32.mrb[73].mxu1 }
 0x51a   : > { %4019 = vst.msk [vmem:[%s7093_s17 + $0x14] sm:$0xf] %vm4013_vm11, %v4522_v22  ;;  %5563 = vrcp.f32 %v3769_v63  ;;  %v3770_v19 = vadd.f32 1.0, %v5544_v36  ;;  %v7140_v23 = vadd.f32 %v7024_v16, %v3575_v49  ;;  %v4916_v58 = vpop.f32.mrb[74].mxu1 }
 0x51b   : > { %v5546_v31 = vpop.eup %5545  ;;  %5565 = vrcp.f32 %v3772_v20  ;;  %v4468_v12 = vmul.f32 -1.442695, %v7135_v0  ;;  %v7144_v21 = vadd.f32 %v4916_v58, %v7024_v16  ;;  %v3578_v55 = vpop.f32.mrb[75].mxu1 }
 0x51c   : > { %v5548_v30 = vpop.eup %5547  ;;  %v3863_v11 = vmul.f32 %v5546_v31, %v7059_v14  ;;  %5567 = vrcp.f32 %v3770_v19  ;;  %v4466_v18 = vmul.f32 -1.442695, %v7140_v23  ;;  %v7149_v8 = vadd.f32 %v7024_v16, %v3578_v55 }
 0x51d   : > { %v5550_v60 = vpop.eup %5549  ;;  %v3861_v28 = vmul.f32 %v5548_v30, %v7062_v53  ;;  %5569 = vpow2.f32 %v4468_v12  ;;  %v4469_v57 = vmul.f32 -1.442695, %v7144_v21 }
 0x51e   : > { %v5552_v40 = vpop.eup %5551  ;;  %v4527_v17 = vpack.c.bf16 %v3863_v11, %v3863_v11  ;;  %v3864_v35 = vmul.f32 %v5550_v60, %v7066_v41  ;;  %5571 = vpow2.f32 %v4466_v18  ;;  %v4467_v14 = vmul.f32 -1.442695, %v7149_v8 }
 0x51f   : > { %v5554_v3 = vpop.eup %5553  ;;  %v4525_v6 = vpack.c.bf16 %v3861_v28, %v3861_v28  ;;  %v3862_v2 = vmul.f32 %v5552_v40, %v7070_v54  ;;  %5573 = vpow2.f32 %v4469_v57 }
 0x520   : > { %v5556_v33 = vpop.eup %5555  ;;  %4024 = vst.msk [vmem:[%s7093_s17 + $0x28] sm:$0xf] %vm4013_vm11, %v4527_v17  ;;  %v4528_v53 = vpack.c.bf16 %v3864_v35, %v3864_v35  ;;  %v3775_v47 = vadd.f32 1.0, %v5554_v3  ;;  %5575 = vpow2.f32 %v4467_v14 }
 0x521   : > { %v5558_v44 = vpop.eup %5557  ;;  %4022 = vst.msk [vmem:[%s7093_s17 + $0x20] sm:$0xf] %vm4013_vm11, %v4525_v6  ;;  %v4526_v41 = vpack.c.bf16 %v3862_v2, %v3862_v2  ;;  %v3773_v62 = vadd.f32 1.0, %v5556_v33  ;;  %v4919_v5 = vpop.f32.mrb[76].mxu1 }
 0x522   : > { %v5560_v52 = vpop.eup %5559  ;;  %4025 = vst.msk [vmem:[%s7093_s17 + $0x2c] sm:$0xf] %vm4013_vm11, %v4528_v53  ;;  %5577 = vrcp.f32 %v3775_v47  ;;  %v3776_v46 = vadd.f32 1.0, %v5558_v44  ;;  %v7163_v54 = vadd.f32 %v4919_v5, %v7024_v16  ;;  %v3591_v39 = vpop.f32.mrb[77].mxu1 }
 0x523   : > { %v5562_v48 = vpop.eup %5561  ;;  %4023 = vst.msk [vmem:[%s7093_s17 + $0x24] sm:$0xf] %vm4013_vm11, %v4526_v41  ;;  %5579 = vrcp.f32 %v3773_v62  ;;  %v3774_v24 = vadd.f32 1.0, %v5560_v52  ;;  %v7168_v7 = vadd.f32 %v7024_v16, %v3591_v39  ;;  %v4920_v26 = vpop.f32.mrb[78].mxu1 }
 0x524   : > { %v5564_v29 = vpop.eup %5563  ;;  %v3867_v42 = vmul.f32 %v5562_v48, %v7075_v51  ;;  %5581 = vrcp.f32 %v3776_v46  ;;  %v4472_v43 = vmul.f32 -1.442695, %v7163_v54  ;;  %v7173_v25 = vadd.f32 %v4920_v26, %v7024_v16  ;;  %v3594_v38 = vpop.f32.mrb[79].mxu1 }
 0x525   : > { %v5566_v1 = vpop.eup %5565  ;;  %v3865_v10 = vmul.f32 %v5564_v29, %v7078_v50  ;;  %5583 = vrcp.f32 %v3774_v24  ;;  %v4470_v13 = vmul.f32 -1.442695, %v7168_v7  ;;  %v7178_v27 = vadd.f32 %v7024_v16, %v3594_v38 }
 0x526   : > { %v5568_v37 = vpop.eup %5567  ;;  %v4531_v51 = vpack.c.bf16 %v3867_v42, %v3867_v42  ;;  %v3868_v45 = vmul.f32 %v5566_v1, %v7082_v61  ;;  %5585 = vpow2.f32 %v4472_v43  ;;  %v4473_v34 = vmul.f32 -1.442695, %v7173_v25 }
 0x527   : > { %v5570_v22 = vpop.eup %5569  ;;  %v4529_v63 = vpack.c.bf16 %v3865_v10, %v3865_v10  ;;  %v3866_v4 = vmul.f32 %v5568_v37, %v7087_v15  ;;  %5587 = vpow2.f32 %v4470_v13  ;;  %v4471_v50 = vmul.f32 -1.442695, %v7178_v27 }
 0x528   : > { %v5572_v36 = vpop.eup %5571  ;;  %4028 = vst.msk [vmem:[%s7093_s17 + $0x38] sm:$0xf] %vm4013_vm11, %v4531_v51  ;;  %v4532_v20 = vpack.c.bf16 %v3868_v45, %v3868_v45  ;;  %v3779_v49 = vadd.f32 1.0, %v5570_v22  ;;  %5589 = vpow2.f32 %v4473_v34 }
 0x529   : > { %v5574_v19 = vpop.eup %5573  ;;  %4026 = vst.msk [vmem:[%s7093_s17 + $0x30] sm:$0xf] %vm4013_vm11, %v4529_v63  ;;  %v4530_v61 = vpack.c.bf16 %v3866_v4, %v3866_v4  ;;  %v3777_v58 = vadd.f32 1.0, %v5572_v36  ;;  %5591 = vpow2.f32 %v4471_v50  ;;  %v4923_v31 = vpop.f32.mrb[80].mxu1 }
 0x52a   : > { %v5576_v12 = vpop.eup %5575  ;;  %4029 = vst.msk [vmem:[%s7093_s17 + $0x3c] sm:$0xf] %vm4013_vm11, %v4532_v20  ;;  %5593 = vrcp.f32 %v3779_v49  ;;  %v3780_v15 = vadd.f32 1.0, %v5574_v19  ;;  %v7191_v55 = vadd.f32 %v4923_v31, %v7024_v16  ;;  %v3607_v30 = vpop.f32.mrb[81].mxu1 }
 0x52b   : > { %4027 = vst.msk [vmem:[%s7093_s17 + $0x34] sm:$0xf] %vm4013_vm11, %v4530_v61  ;;  %5595 = vrcp.f32 %v3777_v58  ;;  %v3778_v11 = vadd.f32 1.0, %v5576_v12  ;;  %v7196_v18 = vadd.f32 %v7024_v16, %v3607_v30  ;;  %v4924_v60 = vpop.f32.mrb[82].mxu1 }
 0x52c   : > { %v5578_v28 = vpop.eup %5577  ;;  %5597 = vrcp.f32 %v3780_v15  ;;  %v4476_v57 = vmul.f32 -1.442695, %v7191_v55  ;;  %v7200_v40 = vadd.f32 %v4924_v60, %v7024_v16  ;;  %v3610_v17 = vpop.f32.mrb[83].mxu1 }
 0x52d   : > { %v5580_v35 = vpop.eup %5579  ;;  %v3871_v14 = vmul.f32 %v5578_v28, %v7107_v9  ;;  %5599 = vrcp.f32 %v3778_v11  ;;  %v4474_v3 = vmul.f32 -1.442695, %v7196_v18  ;;  %v7205_v6 = vadd.f32 %v7024_v16, %v3610_v17 }
 0x52e   : > { %v5582_v2 = vpop.eup %5581  ;;  %v3869_v33 = vmul.f32 %v5580_v35, %v7112_v32  ;;  %5601 = vpow2.f32 %v4476_v57  ;;  %v4477_v53 = vmul.f32 -1.442695, %v7200_v40 }
 0x52f   : > { %v5584_v47 = vpop.eup %5583  ;;  %v4535_v44 = vpack.c.bf16 %v3871_v14, %v3871_v14  ;;  %v3872_v41 = vmul.f32 %v5582_v2, %v7117_v59  ;;  %5603 = vpow2.f32 %v4474_v3  ;;  %v4475_v9 = vmul.f32 -1.442695, %v7205_v6 }
 0x530   : > { %v5586_v62 = vpop.eup %5585  ;;  %v4533_v5 = vpack.c.bf16 %v3869_v33, %v3869_v33  ;;  %v3870_v16 = vmul.f32 %v5584_v47, %v7122_v56  ;;  %5605 = vpow2.f32 %v4477_v53 }
 0x531   : > { %v5588_v52 = vpop.eup %5587  ;;  %4032 = vst.msk [vmem:[%s7093_s17 + $0x48] sm:$0xf] %vm4013_vm11, %v4535_v44  ;;  %v4536_v32 = vpack.c.bf16 %v3872_v41, %v3872_v41  ;;  %v3783_v46 = vadd.f32 1.0, %v5586_v62  ;;  %5607 = vpow2.f32 %v4475_v9 }
 0x532   : > { %v5590_v39 = vpop.eup %5589  ;;  %4030 = vst.msk [vmem:[%s7093_s17 + $0x40] sm:$0xf] %vm4013_vm11, %v4533_v5  ;;  %v4534_v59 = vpack.c.bf16 %v3870_v16, %v3870_v16  ;;  %v3781_v48 = vadd.f32 1.0, %v5588_v52 }
 0x533   : > { %v5592_v24 = vpop.eup %5591  ;;  %4033 = vst.msk [vmem:[%s7093_s17 + $0x4c] sm:$0xf] %vm4013_vm11, %v4536_v32  ;;  %5609 = vrcp.f32 %v3783_v46  ;;  %v3784_v26 = vadd.f32 1.0, %v5590_v39 }
 0x534   : > { %v5594_v29 = vpop.eup %5593  ;;  %4031 = vst.msk [vmem:[%s7093_s17 + $0x44] sm:$0xf] %vm4013_vm11, %v4534_v59  ;;  %5611 = vrcp.f32 %v3781_v48  ;;  %v3782_v56 = vadd.f32 1.0, %v5592_v24 }
 0x535   : > { %v5596_v42 = vpop.eup %5595  ;;  %v3875_v43 = vmul.f32 %v5594_v29, %v7135_v0  ;;  %5613 = vrcp.f32 %v3784_v26 }
 0x536   : > { %v5598_v38 = vpop.eup %5597  ;;  %v3873_v1 = vmul.f32 %v5596_v42, %v7140_v23  ;;  %5615 = vrcp.f32 %v3782_v56 }
 0x537   : > { %v5600_v10 = vpop.eup %5599  ;;  %v4539_v13 = vpack.c.bf16 %v3875_v43, %v3875_v43  ;;  %v3876_v37 = vmul.f32 %v5598_v38, %v7144_v21 }
 0x538   : > { %v5602_v51 = vpop.eup %5601  ;;  %v4537_v45 = vpack.c.bf16 %v3873_v1, %v3873_v1  ;;  %v3874_v34 = vmul.f32 %v5600_v10, %v7149_v8 }
 0x539   : > { %v5604_v22 = vpop.eup %5603  ;;  %4036 = vst.msk [vmem:[%s7093_s17 + $0x58] sm:$0xf] %vm4013_vm11, %v4539_v13  ;;  %v4540_v0 = vpack.c.bf16 %v3876_v37, %v3876_v37  ;;  %v3787_v63 = vadd.f32 1.0, %v5602_v51 }
 0x53a   : > { %v5606_v4 = vpop.eup %5605  ;;  %4034 = vst.msk [vmem:[%s7093_s17 + $0x50] sm:$0xf] %vm4013_vm11, %v4537_v45  ;;  %v4538_v23 = vpack.c.bf16 %v3874_v34, %v3874_v34  ;;  %v3785_v50 = vadd.f32 1.0, %v5604_v22 }
 0x53b   : > { %v5608_v36 = vpop.eup %5607  ;;  %4037 = vst.msk [vmem:[%s7093_s17 + $0x5c] sm:$0xf] %vm4013_vm11, %v4540_v0  ;;  %5617 = vrcp.f32 %v3787_v63  ;;  %v3788_v21 = vadd.f32 1.0, %v5606_v4 }
 0x53c   : > { %4035 = vst.msk [vmem:[%s7093_s17 + $0x54] sm:$0xf] %vm4013_vm11, %v4538_v23  ;;  %5619 = vrcp.f32 %v3785_v50  ;;  %v3786_v8 = vadd.f32 1.0, %v5608_v36 }
 0x53d   : > { %v5610_v20 = vpop.eup %5609  ;;  %5621 = vrcp.f32 %v3788_v21 }
 0x53e   : > { %v5612_v49 = vpop.eup %5611  ;;  %v3879_v19 = vmul.f32 %v5610_v20, %v7163_v54  ;;  %5623 = vrcp.f32 %v3786_v8 }
 0x53f   : > { %v5614_v61 = vpop.eup %5613  ;;  %v3877_v58 = vmul.f32 %v5612_v49, %v7168_v7 }
 0x540   : > { %v5616_v31 = vpop.eup %5615  ;;  %v4543_v12 = vpack.c.bf16 %v3879_v19, %v3879_v19  ;;  %v3880_v15 = vmul.f32 %v5614_v61, %v7173_v25 }
 0x541   : > { %v4541_v30 = vpack.c.bf16 %v3877_v58, %v3877_v58  ;;  %v3878_v11 = vmul.f32 %v5616_v31, %v7178_v27 }
 0x542   : > { %4040 = vst.msk [vmem:[%s7093_s17 + $0x68] sm:$0xf] %vm4013_vm11, %v4543_v12  ;;  %v4544_v60 = vpack.c.bf16 %v3880_v15, %v3880_v15 }
 0x543   : > { %4038 = vst.msk [vmem:[%s7093_s17 + $0x60] sm:$0xf] %vm4013_vm11, %v4541_v30  ;;  %v4542_v28 = vpack.c.bf16 %v3878_v11, %v3878_v11 }
 0x544   : > { %4041 = vst.msk [vmem:[%s7093_s17 + $0x6c] sm:$0xf] %vm4013_vm11, %v4544_v60 }
 0x545   : > { %v5618_v54 = vpop.eup %5617  ;;  %4039 = vst.msk [vmem:[%s7093_s17 + $0x64] sm:$0xf] %vm4013_vm11, %v4542_v28 }
 0x546   : > { %v5620_v7 = vpop.eup %5619  ;;  %v3883_v25 = vmul.f32 %v5618_v54, %v7191_v55 }
 0x547   : > { %v5622_v57 = vpop.eup %5621  ;;  %v3881_v27 = vmul.f32 %v5620_v7, %v7196_v18 }
 0x548   : > { %v5624_v17 = vpop.eup %5623  ;;  %v4547_v35 = vpack.c.bf16 %v3883_v25, %v3883_v25  ;;  %v3884_v14 = vmul.f32 %v5622_v57, %v7200_v40 }
 0x549   : > { %v4545_v3 = vpack.c.bf16 %v3881_v27, %v3881_v27  ;;  %v3882_v2 = vmul.f32 %v5624_v17, %v7205_v6 }
 0x54a   : > { %4044 = vst.msk [vmem:[%s7093_s17 + $0x78] sm:$0xf] %vm4013_vm11, %v4547_v35  ;;  %v4548_v33 = vpack.c.bf16 %v3884_v14, %v3884_v14 }
 0x54b   : > { %4042 = vst.msk [vmem:[%s7093_s17 + $0x70] sm:$0xf] %vm4013_vm11, %v4545_v3  ;;  %v4546_v53 = vpack.c.bf16 %v3882_v2, %v3882_v2 }
 0x54c   : > { %4045 = vst.msk [vmem:[%s7093_s17 + $0x7c] sm:$0xf] %vm4013_vm11, %v4548_v33 }
 0x54d   : > { %4043 = vst.msk [vmem:[%s7093_s17 + $0x74] sm:$0xf] %vm4013_vm11, %v4546_v53 }
 0x54e PF: > { %s22_s23 = sadd.s32 1, %s5647_s23   ;;  %s7394_s21 = smov %s5643_s22 }
 0x54f   : > { %p19_p5 = scmp.ge.s32.totalorder %s22_s23, 4   ;;  %s7395_s22 = smov %s7397_s24 }
 0x551   :  { %21 = sbr.rel (!%p19_p5) target bundleno = 2 (0x2), region = 106 }

</bundles_post_ra>
